<compile_context>
chip_gen: v6e
topology: v6e:2x2x1
jax: 0.10.0
libtpu: 0.0.40
codegen_flags: <defaults>
</compile_context>

<pallas_src>
import numpy as np
import jax
import jax.numpy as jnp
from jax.experimental import pallas as pl
from jax.experimental.pallas import tpu as pltpu

B = 16          # number of states in s_list
N = 8           # rows (buses) per state
RAW = 8         # raw feature columns per row (s[:, 1:-1] -> 6 features)
FEAT = 6        # features fed to attention / proj
ATT_DIM = 400   # self.att_dim in the module
A_PAD = 512     # att_dim zero-padded to a multiple of 128 lanes
SUBJ_PAD = 128  # lane-aligned region carrying the small per-state score terms
OUT_PAD = 128   # lane-dense output block width (col 0 holds the result)
MAX_TILE_B = 256

# Python-float constants only: jnp constants at module scope would be captured
# by the kernel trace and rejected ("captures constants") by pallas_call.
SCALE = float(1.0 / np.sqrt(ATT_DIM))
NEG = -1e30

# Per-dot precision (no global jax.config mutation).  Total matmul work after
# the pack-time folds is tiny, so HIGHEST costs nothing and keeps the refactored
# kernel numerically comparable to the straightforward f32 reference.
HP = jax.lax.Precision.HIGHEST


# ---------------------------------------------------------------------------
# Pallas kernel: one grid step = TILE_B states, everything batched.
# ---------------------------------------------------------------------------
def actor_kernel(s_ref, w_subj_ref, b_subj_ref, w_av_ref, w34_ref, b34_ref,
                 out_ref):
    s = s_ref[...]                                     # (TB, N, RAW)
    tb = s.shape[0]
    subj_bus = s[:, 0:1, 1:2]                          # (TB, 1, 1)   s[0, 1]
    subj_loc = s[:, 0:1, 3]                            # (TB, 1)      s[0, 3]
    loc = s[:, :, 3]                                   # (TB, N)
    feat = s[:, :, 1:1 + FEAT]                         # (TB, N, 6)   s[:, 1:-1]
    # s[:, 1] = s[:, 1] - subject_bus_idx (only feature column 0 after slicing)
    col = jax.lax.broadcasted_iota(jnp.int32, (tb, N, FEAT), 2)
    feat = feat - jnp.where(col == 0, subj_bus, 0.0)
    x_subject = feat[:, 0, :]                          # (TB, 6)

    mask_prev = (loc < subj_loc).astype(jnp.float32)   # (TB, N) rows before subject
    mask_next = (loc > subj_loc).astype(jnp.float32)   # (TB, N) rows after subject

    # One fused (TB,6)@(6,128+512) matmul gives, per state:
    #   cols 0:6    z_up   = x @ A_up^T   + c_up^T
    #   cols 6:12   z_down = x @ A_down^T + c_down^T
    #   col  12     x.d_up   + e_up
    #   col  13     x.d_down + e_down
    #   cols 128:   x @ (Wp W2) + (bp W2 + b2)   (proj branch with linear2 folded)
    subj = (jnp.dot(x_subject, w_subj_ref[...], precision=HP,
                    preferred_element_type=jnp.float32) + b_subj_ref[...])
    z_u = subj[:, 0:FEAT]
    z_d = subj[:, FEAT:2 * FEAT]
    sc_u = subj[:, 2 * FEAT:2 * FEAT + 1]
    sc_d = subj[:, 2 * FEAT + 1:2 * FEAT + 2]
    x_proj = subj[:, SUBJ_PAD:]                        # (TB, A_PAD)

    def branch(z, sc, mask):
        # score[b, n] = (k[b, n] . q[b]) / sqrt(att_dim) = (feat.z + sc) * SCALE
        scores = (jnp.sum(feat * z[:, None, :], axis=-1) + sc) * SCALE   # (TB, N)
        ms = jnp.where(mask > 0.0, scores, NEG)
        mx = jnp.max(ms, axis=-1, keepdims=True)                         # (TB, 1)
        p = jnp.exp(ms - mx) * mask                                      # (TB, N)
        denom = jnp.sum(p, axis=-1, keepdims=True)                       # (TB, 1)
        valid = (jnp.sum(mask, axis=-1, keepdims=True) > 0.0).astype(jnp.float32)
        wf = jnp.sum(p[:, :, None] * feat, axis=1)                       # (TB, 6)
        nwf = wf / jnp.maximum(denom, 1e-30) * valid                     # (TB, 6)
        return nwf, valid

    # torch pairing: prev rows -> att_up, next rows -> att_down (summed afterwards).
    nwf_u, valid_u = branch(z_u, sc_u, mask_prev)
    nwf_d, valid_d = branch(z_d, sc_d, mask_next)

    # linear2(att_up + att_down + proj) with W2/b2 already folded into w_av / x_proj:
    #   x = (p^T F / denom) @ (Wv W2) + valid * (bv W2) + x_proj
    lhs = jnp.concatenate([nwf_u, nwf_d, valid_u, valid_d], axis=-1)     # (TB, 14)
    x = jnp.dot(lhs, w_av_ref[...], precision=HP,
                preferred_element_type=jnp.float32) + x_proj
    h = jnp.maximum(x, 0.0)                            # relu(linear2(...))

    # linear4(linear3(h)) folded into one (A_PAD, 1) vector + scalar bias.
    y = jnp.tanh(jnp.dot(h, w34_ref[...], precision=HP,
                         preferred_element_type=jnp.float32) + b34_ref[...])
    # Lane-dense store: broadcast the (TB, 1) result across the 128-lane block.
    out_ref[...] = jnp.broadcast_to((y + 1.0) * 1.5, out_ref.shape)


# ---------------------------------------------------------------------------
# Wrapper: single grid step for small batches (grid grows only for big batches);
# tiny packed weights stay resident in VMEM via constant index_maps.
# ---------------------------------------------------------------------------
def actor_forward(s_batch, packed):
    nb = s_batch.shape[0]
    tile_b = nb if nb <= MAX_TILE_B else MAX_TILE_B
    assert nb % tile_b == 0
    grid = (nb // tile_b,)
    s_spec = pl.BlockSpec((tile_b, N, RAW), lambda i: (i, 0, 0))
    w_specs = [pl.BlockSpec(p.shape, lambda i: (0, 0)) for p in packed]  # resident
    out_spec = pl.BlockSpec((tile_b, OUT_PAD), lambda i: (i, 0))
    out = pl.pallas_call(
        actor_kernel,
        out_shape=jax.ShapeDtypeStruct((nb, OUT_PAD), jnp.float32),
        grid_spec=pltpu.PrefetchScalarGridSpec(
            num_scalar_prefetch=0,
            grid=grid,
            in_specs=[s_spec] + w_specs,
            out_specs=out_spec),
        compiler_params=pltpu.CompilerParams(
            dimension_semantics=("parallel",)),
    )(s_batch.astype(jnp.float32), *packed)
    return out[:, :1]


# ---------------------------------------------------------------------------
# Parameter packing (done once, host-side, in float64 for exactness).
# ---------------------------------------------------------------------------
def pack_params(params):
    p64 = [np.asarray(p, dtype=np.float64) for p in params]
    (wq_u, bq_u, wk_u, bk_u, wv_u, bv_u,
     wq_d, bq_d, wk_d, bk_d, wv_d, bv_d,
     wp, bp, w2, b2, w3, b3, w4, b4) = p64
    A, Ap = ATT_DIM, A_PAD

    def score_terms(wq, bq, wk, bk):
        # k.q = f (Wk Wq^T) x^T + f (Wk bq^T) + x (Wq bk^T) + bk.bq^T
        return wk @ wq.T, wk @ bq.T, wq @ bk.T, bk @ bq.T

    Au, cu, du, eu = score_terms(wq_u, bq_u, wk_u, bk_u)
    Ad, cd, dd, ed = score_terms(wq_d, bq_d, wk_d, bk_d)

    # Distribute linear2 into the value / proj weights (exact: no nonlinearity
    # between attn_up + attn_down + proj and linear2).
    wp2 = wp @ w2                    # (6, 400)
    bp2 = bp @ w2 + b2               # (1, 400)  -- b2 added exactly once here
    wv_u2, bv_u2 = wv_u @ w2, bv_u @ w2
    wv_d2, bv_d2 = wv_d @ w2, bv_d @ w2

    # Fold linear3 into linear4 (exact: no nonlinearity between them).
    w34 = w3 @ w4                    # (400, 1)
    b34 = b3 @ w4 + b4               # (1, 1)

    w_subj = np.zeros((FEAT, SUBJ_PAD + Ap), np.float64)
    b_subj = np.zeros((1, SUBJ_PAD + Ap), np.float64)
    w_subj[:, 0:FEAT] = Au.T
    b_subj[:, 0:FEAT] = cu.T
    w_subj[:, FEAT:2 * FEAT] = Ad.T
    b_subj[:, FEAT:2 * FEAT] = cd.T
    w_subj[:, 2 * FEAT:2 * FEAT + 1] = du
    b_subj[:, 2 * FEAT:2 * FEAT + 1] = eu
    w_subj[:, 2 * FEAT + 1:2 * FEAT + 2] = dd
    b_subj[:, 2 * FEAT + 1:2 * FEAT + 2] = ed
    w_subj[:, SUBJ_PAD:SUBJ_PAD + A] = wp2
    b_subj[:, SUBJ_PAD:SUBJ_PAD + A] = bp2

    # rows 0:6 = Wv_up@W2, 6:12 = Wv_down@W2, 12 = bv_up@W2, 13 = bv_down@W2
    w_av = np.zeros((2 * FEAT + 2, Ap), np.float64)
    w_av[0:FEAT, 0:A] = wv_u2
    w_av[FEAT:2 * FEAT, 0:A] = wv_d2
    w_av[2 * FEAT, 0:A] = bv_u2[0]
    w_av[2 * FEAT + 1, 0:A] = bv_d2[0]

    w34p = np.zeros((Ap, 1), np.float64)
    w34p[:A, :] = w34
    b34p = b34

    packed = (w_subj, b_subj, w_av, w34p, b34p)
    return tuple(jnp.asarray(p, dtype=jnp.float32) for p in packed)


# ---------------------------------------------------------------------------
# Plain-JAX per-state reference (mirrors the torch forward) for correctness.
# ---------------------------------------------------------------------------
def actor_reference(s_batch, params):
    (wq_u, bq_u, wk_u, bk_u, wv_u, bv_u,
     wq_d, bq_d, wk_d, bk_d, wv_d, bv_d,
     wp, bp, w2, b2, w3, b3, w4, b4) = params

    def attn(x_subject, feat, mask, wq, bq, wk, bk, wv, bv):
        q = jnp.dot(x_subject, wq, precision=HP) + bq      # (1, A)
        k = jnp.dot(feat, wk, precision=HP) + bk            # (N, A)
        v = jnp.dot(feat, wv, precision=HP) + bv            # (N, A)
        scores = jnp.dot(k, q.T, precision=HP) * SCALE      # (N, 1)
        ms = jnp.where(mask > 0, scores, NEG)
        p = jnp.exp(ms - jnp.max(ms)) * mask
        denom = jnp.sum(p)
        out = jnp.dot(p.T, v, precision=HP) / jnp.maximum(denom, 1e-30)   # (1, A)
        return out * (jnp.sum(mask) > 0)                    # empty set -> zeros(1, A)

    outs = []
    for b in range(s_batch.shape[0]):
        s = s_batch[b]
        subj_bus, subj_loc = s[0, 1], s[0, 3]
        s = s.at[:, 1].add(-subj_bus)
        feat = s[:, 1:-1]                                    # (N, 6)
        x_subject = feat[0:1, :]
        loc = s[:, 3:4]
        mask_prev = (loc < subj_loc).astype(jnp.float32)
        mask_next = (loc > subj_loc).astype(jnp.float32)
        x_d = attn(x_subject, feat, mask_prev, wq_u, bq_u, wk_u, bk_u, wv_u, bv_u)
        x_u = attn(x_subject, feat, mask_next, wq_d, bq_d, wk_d, bk_d, wv_d, bv_d)
        x_proj = jnp.dot(x_subject, wp, precision=HP) + bp
        x = x_d + x_u + x_proj
        h = jnp.maximum(jnp.dot(x, w2, precision=HP) + b2, 0.0)
        h = jnp.dot(h, w3, precision=HP) + b3
        y = (jnp.tanh(jnp.dot(h, w4, precision=HP) + b4) + 1.0) * 1.5
        outs.append(y)
    return jnp.concatenate(outs, axis=0)


# ---------------------------------------------------------------------------
# Torch-Linear-style parameter init (weights stored (in_features, out_features)).
# ---------------------------------------------------------------------------
def init_params(key):
    def linear(k, fan_in, fan_out):
        kw, kb = jax.random.split(k)
        bound = 1.0 / np.sqrt(fan_in)
        w = jax.random.uniform(kw, (fan_in, fan_out), jnp.float32, -bound, bound)
        b = jax.random.uniform(kb, (1, fan_out), jnp.float32, -bound, bound)
        return w, b

    keys = jax.random.split(key, 10)
    wq_u, bq_u = linear(keys[0], FEAT, ATT_DIM)   # att_up.q
    wk_u, bk_u = linear(keys[1], FEAT, ATT_DIM)   # att_up.k
    wv_u, bv_u = linear(keys[2], FEAT, ATT_DIM)   # att_up.v
    wq_d, bq_d = linear(keys[3], FEAT, ATT_DIM)   # att_down.q
    wk_d, bk_d = linear(keys[4], FEAT, ATT_DIM)   # att_down.k
    wv_d, bv_d = linear(keys[5], FEAT, ATT_DIM)   # att_down.v
    wp, bp = linear(keys[6], FEAT, ATT_DIM)       # proj
    w2, b2 = linear(keys[7], ATT_DIM, ATT_DIM)    # linear2
    w3, b3 = linear(keys[8], ATT_DIM, ATT_DIM)    # linear3
    w4, b4 = linear(keys[9], ATT_DIM, 1)          # linear4
    return (wq_u, bq_u, wk_u, bk_u, wv_u, bv_u,
            wq_d, bq_d, wk_d, bk_d, wv_d, bv_d,
            wp, bp, w2, b2, w3, b3, w4, b4)


if __name__ == "__main__":
    key = jax.random.PRNGKey(0)
    k_params, k_state, k_loc = jax.random.split(key, 3)
    params = init_params(k_params)
    packed = pack_params(params)

    # Synthetic batch of B states with distinct bus indices (col 1) and
    # locations (col 3) so the prev/next masks are non-trivial.
    s_batch = jax.random.uniform(k_state, (B, N, RAW), jnp.float32, -1.0, 1.0)
    locs = jax.random.uniform(k_loc, (B, N), jnp.float32, 0.0, 10.0)
    s_batch = s_batch.at[:, :, 3].set(locs)
    bus_ids = jnp.tile(jnp.arange(N, dtype=jnp.float32)[None, :], (B, 1)) + 3.0
    s_batch = s_batch.at[:, :, 1].set(bus_ids)
    # Exercise the empty prev/next branches (torch returns zeros(1, att_dim)).
    s_batch = s_batch.at[0, 0, 3].set(-1.0)    # subject is first -> no prev rows
    s_batch = s_batch.at[1, 0, 3].set(20.0)    # subject is last  -> no next rows

    out = jax.block_until_ready(actor_forward(s_batch, packed))
    ref = jax.block_until_ready(actor_reference(s_batch, params))

    assert out.shape == (B, 1)
    np.testing.assert_allclose(np.asarray(out), np.asarray(ref), rtol=2e-3, atol=2e-3)
    print("KERNEL_OK")
</pallas_src>

<mosaic_0001>
module attributes {stable_mosaic.version = 11 : i64} {
  func.func @actor_kernel(%arg0: i32, %arg1: memref<16x8x8xf32, #tpu.memory_space<vmem>>, %arg2: memref<6x640xf32, #tpu.memory_space<vmem>>, %arg3: memref<1x640xf32, #tpu.memory_space<vmem>>, %arg4: memref<14x512xf32, #tpu.memory_space<vmem>>, %arg5: memref<512x1xf32, #tpu.memory_space<vmem>>, %arg6: memref<1x1xf32, #tpu.memory_space<vmem>>, %arg7: memref<16x128xf32, #tpu.memory_space<vmem>>) attributes {dimension_semantics = [#tpu.dimension_semantics<parallel>], iteration_bounds = array<i64: 1>, scalar_prefetch = 0 : i64, scratch_operands = 0 : i64, tpu.core_type = #tpu.core_type<tc>, window_params = [{transform_indices = @transform_0, window_bounds = array<i64: 16, 8, 8>}, {pipeline_mode = #tpu.pipeline_mode<synchronous>, transform_indices = @transform_1, window_bounds = array<i64: 6, 640>}, {pipeline_mode = #tpu.pipeline_mode<synchronous>, transform_indices = @transform_2, window_bounds = array<i64: 1, 640>}, {pipeline_mode = #tpu.pipeline_mode<synchronous>, transform_indices = @transform_3, window_bounds = array<i64: 14, 512>}, {pipeline_mode = #tpu.pipeline_mode<synchronous>, transform_indices = @transform_4, window_bounds = array<i64: 512, 1>}, {pipeline_mode = #tpu.pipeline_mode<synchronous>, transform_indices = @transform_5, window_bounds = array<i64: 1, 1>}, {transform_indices = @transform_6, window_bounds = array<i64: 16, 128>}]} {
    %c0 = arith.constant 0 : index
    %c0_0 = arith.constant 0 : index
    %c0_1 = arith.constant 0 : index
    %0 = vector.load %arg1[%c0, %c0_0, %c0_1] : memref<16x8x8xf32, #tpu.memory_space<vmem>>, vector<16x8x8xf32>
    %1 = vector.extract_strided_slice %0 {offsets = [0, 0, 1], sizes = [16, 1, 1], strides = [1, 1, 1]} : vector<16x8x8xf32> to vector<16x1x1xf32>
    %2 = vector.extract_strided_slice %0 {offsets = [0, 0, 3], sizes = [16, 1, 1], strides = [1, 1, 1]} : vector<16x8x8xf32> to vector<16x1x1xf32>
    %3 = vector.shape_cast %2 : vector<16x1x1xf32> to vector<16x1xf32>
    %4 = vector.extract_strided_slice %0 {offsets = [0, 0, 3], sizes = [16, 8, 1], strides = [1, 1, 1]} : vector<16x8x8xf32> to vector<16x8x1xf32>
    %5 = vector.shape_cast %4 : vector<16x8x1xf32> to vector<16x8xf32>
    %6 = vector.extract_strided_slice %0 {offsets = [0, 0, 1], sizes = [16, 8, 6], strides = [1, 1, 1]} : vector<16x8x8xf32> to vector<16x8x6xf32>
    %7 = tpu.iota {dimensions = array<i32: 2>} : vector<16x8x6xi32>
    %c0_i32 = arith.constant 0 : i32
    %8 = vector.broadcast %c0_i32 : i32 to vector<16x8x6xi32>
    %9 = arith.cmpi eq, %7, %8 : vector<16x8x6xi32>
    %cst = arith.constant 0.000000e+00 : f32
    %10 = vector.shape_cast %1 : vector<16x1x1xf32> to vector<16x1x1xf32>
    %11 = vector.broadcast %10 : vector<16x1x1xf32> to vector<16x8x6xf32>
    %12 = vector.broadcast %cst : f32 to vector<16x8x6xf32>
    %13 = arith.select %9, %11, %12 : vector<16x8x6xi1>, vector<16x8x6xf32>
    %14 = arith.subf %6, %13 : vector<16x8x6xf32>
    %15 = vector.extract_strided_slice %14 {offsets = [0, 0, 0], sizes = [16, 1, 6], strides = [1, 1, 1]} : vector<16x8x6xf32> to vector<16x1x6xf32>
    %16 = vector.shape_cast %15 : vector<16x1x6xf32> to vector<16x6xf32>
    %17 = vector.broadcast %3 : vector<16x1xf32> to vector<16x8xf32>
    %18 = arith.cmpf olt, %5, %17 : vector<16x8xf32>
    %19 = arith.extui %18 : vector<16x8xi1> to vector<16x8xi32>
    %20 = arith.sitofp %19 : vector<16x8xi32> to vector<16x8xf32>
    %21 = vector.broadcast %3 : vector<16x1xf32> to vector<16x8xf32>
    %22 = arith.cmpf ogt, %5, %21 : vector<16x8xf32>
    %23 = arith.extui %22 : vector<16x8xi1> to vector<16x8xi32>
    %24 = arith.sitofp %23 : vector<16x8xi32> to vector<16x8xf32>
    %c0_2 = arith.constant 0 : index
    %c0_3 = arith.constant 0 : index
    %25 = vector.load %arg2[%c0_2, %c0_3] : memref<6x640xf32, #tpu.memory_space<vmem>>, vector<6x640xf32>
    %cst_4 = arith.constant dense<0.000000e+00> : vector<16x640xf32>
    %26 = tpu.matmul %16, %25, %cst_4 {dimension_numbers = #tpu.dot_dimension_numbers<[1], [0], [0], [1], [0, 0, 1, 1], [], []>, precision = #tpu.contract_precision<fp32>} : vector<16x6xf32>, vector<6x640xf32>, vector<16x640xf32> -> vector<16x640xf32>
    %c0_5 = arith.constant 0 : index
    %c0_6 = arith.constant 0 : index
    %27 = vector.load %arg3[%c0_5, %c0_6] : memref<1x640xf32, #tpu.memory_space<vmem>>, vector<1x640xf32>
    %28 = vector.broadcast %27 : vector<1x640xf32> to vector<16x640xf32>
    %29 = arith.addf %26, %28 : vector<16x640xf32>
    %30 = vector.extract_strided_slice %29 {offsets = [0, 0], sizes = [16, 6], strides = [1, 1]} : vector<16x640xf32> to vector<16x6xf32>
    %31 = vector.extract_strided_slice %29 {offsets = [0, 6], sizes = [16, 6], strides = [1, 1]} : vector<16x640xf32> to vector<16x6xf32>
    %32 = vector.extract_strided_slice %29 {offsets = [0, 12], sizes = [16, 1], strides = [1, 1]} : vector<16x640xf32> to vector<16x1xf32>
    %33 = vector.extract_strided_slice %29 {offsets = [0, 13], sizes = [16, 1], strides = [1, 1]} : vector<16x640xf32> to vector<16x1xf32>
    %34 = vector.extract_strided_slice %29 {offsets = [0, 128], sizes = [16, 512], strides = [1, 1]} : vector<16x640xf32> to vector<16x512xf32>
    %35 = vector.shape_cast %30 : vector<16x6xf32> to vector<16x1x6xf32>
    %36 = vector.broadcast %35 : vector<16x1x6xf32> to vector<16x8x6xf32>
    %37 = arith.mulf %14, %36 : vector<16x8x6xf32>
    %cst_7 = arith.constant dense<0.000000e+00> : vector<16x8xf32>
    %38 = vector.multi_reduction <add>, %37, %cst_7 [2] : vector<16x8x6xf32> to vector<16x8xf32>
    %39 = vector.broadcast %32 : vector<16x1xf32> to vector<16x8xf32>
    %40 = arith.addf %38, %39 : vector<16x8xf32>
    %cst_8 = arith.constant 5.000000e-02 : f32
    %41 = vector.broadcast %cst_8 : f32 to vector<16x8xf32>
    %42 = arith.mulf %40, %41 : vector<16x8xf32>
    %cst_9 = arith.constant 0.000000e+00 : f32
    %43 = vector.broadcast %cst_9 : f32 to vector<16x8xf32>
    %44 = arith.cmpf ogt, %20, %43 : vector<16x8xf32>
    %cst_10 = arith.constant -1.000000e+30 : f32
    %45 = vector.broadcast %cst_10 : f32 to vector<16x8xf32>
    %46 = arith.select %44, %42, %45 : vector<16x8xi1>, vector<16x8xf32>
    %cst_11 = arith.constant dense<0xFF800000> : vector<16xf32>
    %47 = vector.multi_reduction <maximumf>, %46, %cst_11 [1] : vector<16x8xf32> to vector<16xf32>
    %48 = vector.shape_cast %47 : vector<16xf32> to vector<16x1xf32>
    %49 = vector.broadcast %48 : vector<16x1xf32> to vector<16x8xf32>
    %50 = arith.subf %46, %49 : vector<16x8xf32>
    %51 = math.exp %50 : vector<16x8xf32>
    %52 = arith.mulf %51, %20 : vector<16x8xf32>
    %cst_12 = arith.constant dense<0.000000e+00> : vector<16xf32>
    %53 = vector.multi_reduction <add>, %52, %cst_12 [1] : vector<16x8xf32> to vector<16xf32>
    %54 = vector.shape_cast %53 : vector<16xf32> to vector<16x1xf32>
    %cst_13 = arith.constant dense<0.000000e+00> : vector<16xf32>
    %55 = vector.multi_reduction <add>, %20, %cst_13 [1] : vector<16x8xf32> to vector<16xf32>
    %56 = vector.shape_cast %55 : vector<16xf32> to vector<16x1xf32>
    %cst_14 = arith.constant 0.000000e+00 : f32
    %57 = vector.broadcast %cst_14 : f32 to vector<16x1xf32>
    %58 = arith.cmpf ogt, %56, %57 : vector<16x1xf32>
    %59 = arith.extui %58 : vector<16x1xi1> to vector<16x1xi32>
    %60 = arith.sitofp %59 : vector<16x1xi32> to vector<16x1xf32>
    %61 = vector.shape_cast %52 : vector<16x8xf32> to vector<16x8x1xf32>
    %62 = vector.broadcast %61 : vector<16x8x1xf32> to vector<16x8x6xf32>
    %63 = arith.mulf %62, %14 : vector<16x8x6xf32>
    %cst_15 = arith.constant dense<0.000000e+00> : vector<16x6xf32>
    %64 = vector.multi_reduction <add>, %63, %cst_15 [1] : vector<16x8x6xf32> to vector<16x6xf32>
    %cst_16 = arith.constant 1.000000e-30 : f32
    %65 = vector.broadcast %cst_16 : f32 to vector<16x1xf32>
    %66 = arith.maximumf %54, %65 : vector<16x1xf32>
    %67 = vector.broadcast %66 : vector<16x1xf32> to vector<16x6xf32>
    %68 = arith.divf %64, %67 : vector<16x6xf32>
    %69 = vector.broadcast %60 : vector<16x1xf32> to vector<16x6xf32>
    %70 = arith.mulf %68, %69 : vector<16x6xf32>
    %71 = vector.shape_cast %31 : vector<16x6xf32> to vector<16x1x6xf32>
    %72 = vector.broadcast %71 : vector<16x1x6xf32> to vector<16x8x6xf32>
    %73 = arith.mulf %14, %72 : vector<16x8x6xf32>
    %cst_17 = arith.constant dense<0.000000e+00> : vector<16x8xf32>
    %74 = vector.multi_reduction <add>, %73, %cst_17 [2] : vector<16x8x6xf32> to vector<16x8xf32>
    %75 = vector.broadcast %33 : vector<16x1xf32> to vector<16x8xf32>
    %76 = arith.addf %74, %75 : vector<16x8xf32>
    %cst_18 = arith.constant 5.000000e-02 : f32
    %77 = vector.broadcast %cst_18 : f32 to vector<16x8xf32>
    %78 = arith.mulf %76, %77 : vector<16x8xf32>
    %cst_19 = arith.constant 0.000000e+00 : f32
    %79 = vector.broadcast %cst_19 : f32 to vector<16x8xf32>
    %80 = arith.cmpf ogt, %24, %79 : vector<16x8xf32>
    %cst_20 = arith.constant -1.000000e+30 : f32
    %81 = vector.broadcast %cst_20 : f32 to vector<16x8xf32>
    %82 = arith.select %80, %78, %81 : vector<16x8xi1>, vector<16x8xf32>
    %cst_21 = arith.constant dense<0xFF800000> : vector<16xf32>
    %83 = vector.multi_reduction <maximumf>, %82, %cst_21 [1] : vector<16x8xf32> to vector<16xf32>
    %84 = vector.shape_cast %83 : vector<16xf32> to vector<16x1xf32>
    %85 = vector.broadcast %84 : vector<16x1xf32> to vector<16x8xf32>
    %86 = arith.subf %82, %85 : vector<16x8xf32>
    %87 = math.exp %86 : vector<16x8xf32>
    %88 = arith.mulf %87, %24 : vector<16x8xf32>
    %cst_22 = arith.constant dense<0.000000e+00> : vector<16xf32>
    %89 = vector.multi_reduction <add>, %88, %cst_22 [1] : vector<16x8xf32> to vector<16xf32>
    %90 = vector.shape_cast %89 : vector<16xf32> to vector<16x1xf32>
    %cst_23 = arith.constant dense<0.000000e+00> : vector<16xf32>
    %91 = vector.multi_reduction <add>, %24, %cst_23 [1] : vector<16x8xf32> to vector<16xf32>
    %92 = vector.shape_cast %91 : vector<16xf32> to vector<16x1xf32>
    %cst_24 = arith.constant 0.000000e+00 : f32
    %93 = vector.broadcast %cst_24 : f32 to vector<16x1xf32>
    %94 = arith.cmpf ogt, %92, %93 : vector<16x1xf32>
    %95 = arith.extui %94 : vector<16x1xi1> to vector<16x1xi32>
    %96 = arith.sitofp %95 : vector<16x1xi32> to vector<16x1xf32>
    %97 = vector.shape_cast %88 : vector<16x8xf32> to vector<16x8x1xf32>
    %98 = vector.broadcast %97 : vector<16x8x1xf32> to vector<16x8x6xf32>
    %99 = arith.mulf %98, %14 : vector<16x8x6xf32>
    %cst_25 = arith.constant dense<0.000000e+00> : vector<16x6xf32>
    %100 = vector.multi_reduction <add>, %99, %cst_25 [1] : vector<16x8x6xf32> to vector<16x6xf32>
    %cst_26 = arith.constant 1.000000e-30 : f32
    %101 = vector.broadcast %cst_26 : f32 to vector<16x1xf32>
    %102 = arith.maximumf %90, %101 : vector<16x1xf32>
    %103 = vector.broadcast %102 : vector<16x1xf32> to vector<16x6xf32>
    %104 = arith.divf %100, %103 : vector<16x6xf32>
    %105 = vector.broadcast %96 : vector<16x1xf32> to vector<16x6xf32>
    %106 = arith.mulf %104, %105 : vector<16x6xf32>
    %107 = tpu.concatenate %70, %106, %60, %96 in 1 : vector<16x6xf32>, vector<16x6xf32>, vector<16x1xf32>, vector<16x1xf32> -> vector<16x14xf32>
    %c0_27 = arith.constant 0 : index
    %c0_28 = arith.constant 0 : index
    %108 = vector.load %arg4[%c0_27, %c0_28] : memref<14x512xf32, #tpu.memory_space<vmem>>, vector<14x512xf32>
    %cst_29 = arith.constant dense<0.000000e+00> : vector<16x512xf32>
    %109 = tpu.matmul %107, %108, %cst_29 {dimension_numbers = #tpu.dot_dimension_numbers<[1], [0], [0], [1], [0, 0, 1, 1], [], []>, precision = #tpu.contract_precision<fp32>} : vector<16x14xf32>, vector<14x512xf32>, vector<16x512xf32> -> vector<16x512xf32>
    %110 = arith.addf %109, %34 : vector<16x512xf32>
    %cst_30 = arith.constant 0.000000e+00 : f32
    %111 = vector.broadcast %cst_30 : f32 to vector<16x512xf32>
    %112 = arith.maximumf %110, %111 : vector<16x512xf32>
    %c0_31 = arith.constant 0 : index
    %c0_32 = arith.constant 0 : index
    %113 = vector.load %arg5[%c0_31, %c0_32] : memref<512x1xf32, #tpu.memory_space<vmem>>, vector<512x1xf32>
    %cst_33 = arith.constant dense<0.000000e+00> : vector<16x1xf32>
    %114 = tpu.matmul %112, %113, %cst_33 {dimension_numbers = #tpu.dot_dimension_numbers<[1], [0], [0], [1], [0, 0, 1, 1], [], []>, precision = #tpu.contract_precision<fp32>} : vector<16x512xf32>, vector<512x1xf32>, vector<16x1xf32> -> vector<16x1xf32>
    %c0_34 = arith.constant 0 : index
    %c0_35 = arith.constant 0 : index
    %115 = vector.load %arg6[%c0_34, %c0_35] : memref<1x1xf32, #tpu.memory_space<vmem>>, vector<1x1xf32>
    %116 = vector.broadcast %115 : vector<1x1xf32> to vector<16x1xf32>
    %117 = arith.addf %114, %116 : vector<16x1xf32>
    %118 = math.tanh %117 : vector<16x1xf32>
    %cst_36 = arith.constant 1.000000e+00 : f32
    %119 = vector.broadcast %cst_36 : f32 to vector<16x1xf32>
    %120 = arith.addf %118, %119 : vector<16x1xf32>
    %cst_37 = arith.constant 1.500000e+00 : f32
    %121 = vector.broadcast %cst_37 : f32 to vector<16x1xf32>
    %122 = arith.mulf %120, %121 : vector<16x1xf32>
    %123 = vector.shape_cast %122 : vector<16x1xf32> to vector<16x1xf32>
    %124 = vector.broadcast %123 : vector<16x1xf32> to vector<16x128xf32>
    %c0_38 = arith.constant 0 : index
    %c0_39 = arith.constant 0 : index
    %125 = vector.load %arg7[%c0_38, %c0_39] : memref<16x128xf32, #tpu.memory_space<vmem>>, vector<16x128xf32>
    tpu.vector_store %arg7[%c0_38, %c0_39], %124 {strides = array<i32>} : memref<16x128xf32, #tpu.memory_space<vmem>>, vector<16x128xf32>,
    return
  }
  func.func @transform_0(%arg0: i32) -> (i32, i32, i32) {
    %c0_i32 = arith.constant 0 : i32
    %c0_i32_0 = arith.constant 0 : i32
    %c0_i32_1 = arith.constant 0 : i32
    return %arg0, %c0_i32, %c0_i32_0 : i32, i32, i32
  }
  func.func @transform_1(%arg0: i32) -> (i32, i32) {
    %c0_i32 = arith.constant 0 : i32
    %c0_i32_0 = arith.constant 0 : i32
    %c0_i32_1 = arith.constant 0 : i32
    return %c0_i32, %c0_i32_0 : i32, i32
  }
  func.func @transform_2(%arg0: i32) -> (i32, i32) {
    %c0_i32 = arith.constant 0 : i32
    %c0_i32_0 = arith.constant 0 : i32
    %c0_i32_1 = arith.constant 0 : i32
    return %c0_i32, %c0_i32_0 : i32, i32
  }
  func.func @transform_3(%arg0: i32) -> (i32, i32) {
    %c0_i32 = arith.constant 0 : i32
    %c0_i32_0 = arith.constant 0 : i32
    %c0_i32_1 = arith.constant 0 : i32
    return %c0_i32, %c0_i32_0 : i32, i32
  }
  func.func @transform_4(%arg0: i32) -> (i32, i32) {
    %c0_i32 = arith.constant 0 : i32
    %c0_i32_0 = arith.constant 0 : i32
    %c0_i32_1 = arith.constant 0 : i32
    return %c0_i32, %c0_i32_0 : i32, i32
  }
  func.func @transform_5(%arg0: i32) -> (i32, i32) {
    %c0_i32 = arith.constant 0 : i32
    %c0_i32_0 = arith.constant 0 : i32
    %c0_i32_1 = arith.constant 0 : i32
    return %c0_i32, %c0_i32_0 : i32, i32
  }
  func.func @transform_6(%arg0: i32) -> (i32, i32) {
    %c0_i32 = arith.constant 0 : i32
    %c0_i32_0 = arith.constant 0 : i32
    return %arg0, %c0_i32 : i32, i32
  }
}

</mosaic_0001>

<bundles_post_ra>
// kernel: tpu_custom_call.1
= control target key start
LH: loop header
LB: loop body
LE: loop exit
PB: predicated region body
PF: predicated region fallthrough
CT: control target
= control target key end

     0   :  { %s12467_s0 = inlined_call_operand.vmem [shape: f32[16,8,8], index: 0, kind: input, shape index: {}]   ;;  %s12468_s1 = inlined_call_operand.vmem [shape: f32[6,640], index: 1, kind: input, shape index: {}]   ;;  %s12469_s2 = inlined_call_operand.vmem [shape: f32[1,640], index: 2, kind: input, shape index: {}]   ;;  %s12470_s3 = inlined_call_operand.vmem [shape: f32[14,512], index: 3, kind: input, shape index: {}]   ;;  %s12471_s4 = inlined_call_operand.vmem [shape: f32[512,1], index: 4, kind: input, shape index: {}]   ;;  %s12472_s5 = inlined_call_operand.<no memory space> [shape: f32[1,1], index: 5, kind: input, shape index: {}]   ;;  %s12473_s6 = inlined_call_operand.hbm [shape: f32[16,128], index: 6, kind: output, shape index: {}]  }
   0x1   :  { %v11_v0 = vstv %s12472_s5 }
   0x2   :  { %12 = vst [vmem:[#allocation2] sm:$0x1] %v11_v0 }
   0x3   :  { %v8817_v1 = vld [vmem:[%s12467_s0 + $0x10] sm:$0xff]  ;;  %v8822_v2 = vld [vmem:[%s12467_s0] sm:$0xff]  ;;  %s8762_s27 = smov 127   ;;  %v8831_v3 = vld [vmem:[%s12467_s0 + $0x18] sm:$0xff] }
   0x4   :  { %65 = vrot.lane.b32.xlu1 %v8817_v1, %s8762_s27  ;;  %61 = vrot.lane.b32.xlu0 %v8822_v2, %s8762_s27  ;;  %v8836_v4 = vld [vmem:[%s12467_s0 + $0x8] sm:$0xff]  ;;  %v8850_v6 = vld [vmem:[%s12467_s0 + $0x20] sm:$0xff] }
   0x5   :  { %v8845_v5 = vld [vmem:[%s12467_s0 + $0x28] sm:$0xff] }
   0x8   :  { %67 = vrot.lane.b32.xlu1 %v8831_v3, %s8762_s27  ;;  %63 = vrot.lane.b32.xlu0 %v8836_v4, %s8762_s27 }
   0x9   :  { %13 = vsyncpa [#allocation4], 0  ;;  %v8859_v7 = vld [vmem:[%s12467_s0 + $0x38] sm:$0xff]  ;;  %v8864_v8 = vld [vmem:[%s12467_s0 + $0x30] sm:$0xff]  ;;  %v42_v33 = vlaneseq  ;;  %s8763_s11 = smov 1   ;;  %vm553_vm1 = vcmask 1045504  }
   0xa   :  { %v8873_v9 = vld [vmem:[%s12467_s0 + $0x48] sm:$0xff]  ;;  %v8878_v10 = vld [vmem:[%s12467_s0 + $0x40] sm:$0xff]  ;;  %v8887_v11 = vld [vmem:[%s12467_s0 + $0x50] sm:$0xff]  ;;  %vm510_vm2 = vcmask 1041409   ;;  %vm513_vm3 = vcmask 1042434   ;;  %vm516_vm4 = vcmask 1043459  }
   0xb   :  { %v8892_v12 = vld [vmem:[%s12467_s0 + $0x58] sm:$0xff]  ;;  %v8901_v13 = vld [vmem:[%s12467_s0 + $0x60] sm:$0xff]  ;;  %v8906_v14 = vld [vmem:[%s12467_s0 + $0x68] sm:$0xff]  ;;  %v8927_v34 = vand.u32 127, %v42_v33  ;;  %vm519_vm5 = vcmask 1044484   ;;  %vm522_vm6 = vcmask 1045509  }
   0xc   :  { %71 = vrot.lane.b32.xlu1 %v8845_v5, %s8762_s27  ;;  %69 = vrot.lane.b32.xlu0 %v8850_v6, %s8762_s27  ;;  %v8915_v15 = vld [vmem:[%s12467_s0 + $0x70] sm:$0xff]  ;;  %v8920_v16 = vld [vmem:[%s12467_s0 + $0x78] sm:$0xff]  ;;  %vm525_vm7 = vcmask 1046534   ;;  %vm528_vm8 = vcmask 1047559   ;;  %vm548_vm9 = vcmask 48128  }
   0xd   :  { %vm44_vm0 = vcmp.eq.s32.totalorder %v8927_v34, 0 }
  0x10   :  { %75 = vrot.lane.b32.xlu1 %v8859_v7, %s8762_s27  ;;  %73 = vrot.lane.b32.xlu0 %v8864_v8, %s8762_s27 }
  0x14   :  { %79 = vrot.lane.b32.xlu1 %v8873_v9, %s8762_s27  ;;  %77 = vrot.lane.b32.xlu0 %v8878_v10, %s8762_s27 }
  0x18   :  { %81 = vrot.lane.b32.xlu0 %v8887_v11, %s8762_s27  ;;  %83 = vrot.lane.b32.xlu1 %v8892_v12, %s8762_s27 }
  0x1c   :  { %85 = vrot.lane.b32.xlu0 %v8901_v13, %s8762_s27  ;;  %87 = vrot.lane.b32.xlu1 %v8906_v14, %s8762_s27 }
  0x20   :  { %89 = vrot.lane.b32.xlu0 %v8915_v15, %s8762_s27  ;;  %91 = vrot.lane.b32.xlu1 %v8920_v16, %s8762_s27 }
  0x76   :  { %v66_v17 = vpop.permute.xlu1 %65  ;;  %v62_v18 = vpop.permute.xlu0 %61 }
  0x77   :  { %8457 = vpush %v62_v18 }
  0x7a   :  { %v68_v19 = vpop.permute.xlu1 %67  ;;  %v64_v20 = vpop.permute.xlu0 %63 }
  0x7b   :  { %8459 = vpush %v64_v20  ;;  %v462_v20 = vld [vmem:[%s12468_s1 + $0x8] sm:$0x3f] }
  0x7c   :  { %8461 = vpush %v66_v17 }
  0x7d   :  { %8463 = vpush %v68_v19 }
  0x7e   :  { %v72_v21 = vpop.permute.xlu1 %71  ;;  %v70_v22 = vpop.permute.xlu0 %69 }
  0x7f   :  { %8465 = vpush %v70_v22  ;;  %v558_v22 = vsel %vm553_vm1, %v462_v20, 0 }
  0x80   :  { %8467 = vpush %v72_v21 }
  0x82   :  { %v76_v23 = vpop.permute.xlu1 %75  ;;  %v74_v24 = vpop.permute.xlu0 %73 }
  0x83   :  { %8469 = vpush %v74_v24  ;;  %v8985_v24 = vand.u32 4294901760, %v558_v22 }
  0x84   :  { %8471 = vpush %v76_v23  ;;  %v461_v23 = vld [vmem:[%s12468_s1] sm:$0x3f] }
  0x85   :  { %600 = vmatprep.subr.mxu0 %v8985_v24 }
  0x86   :  { %v80_v25 = vpop.permute.xlu1 %79  ;;  %v78_v26 = vpop.permute.xlu0 %77 }
  0x87   :  { %8473 = vpush %v78_v26 }
  0x88   :  { %8475 = vpush %v80_v25  ;;  %v555_v25 = vsel %vm553_vm1, %v461_v23, 0 }
  0x89   :  { %v8988_v26 = vand.u32 4294901760, %v555_v25 }
  0x8a   :  { %v82_v27 = vpop.permute.xlu0 %81  ;;  %v84_v28 = vpop.permute.xlu1 %83 }
  0x8b   :  { %8477 = vpush %v82_v27  ;;  %602 = vmatpush1.msra.mxu0 %v8988_v26 }
  0x8c   :  { %8479 = vpush %v84_v28 }
  0x8e   :  { %v86_v29 = vpop.permute.xlu0 %85  ;;  %v88_v30 = vpop.permute.xlu1 %87 }
  0x8f   :  { %8481 = vpush %v86_v29  ;;  %v8994_v29 = vsub.f32 %v558_v22, %v8985_v24 }
  0x90   :  { %8483 = vpush %v88_v30 }
  0x91   :  { %779 = vmatprep.subr.mxu0 %v8994_v29 }
  0x92   :  { %v90_v31 = vpop.permute.xlu0 %89  ;;  %v92_v32 = vpop.permute.xlu1 %91 }
  0x93   :  { %8485 = vpush %v90_v31  ;;  %v8998_v31 = vsub.f32 %v555_v25, %v8988_v26 }
  0x94   :  { %8487 = vpush %v92_v32 }
  0xa8   :  { %s8458_s7 = spop %8457 }
  0xa9   :  { %v94_v38 = vstv %s8458_s7 }
  0xaa   :  { %v141_v41 = vsel %vm44_vm0, %v94_v38, 0.0 }
  0xac   :  { %s8460_s8 = spop %8459 }
  0xad   :  { %v97_v35 = vstv %s8460_s8  ;;  %s8462_s9 = spop %8461 }
  0xae   :  { %v142_v36 = vsel %vm44_vm0, %v97_v35, 0.0  ;;  %v100_v37 = vstv %s8462_s9  ;;  %s8464_s10 = spop %8463  ;;  %v690_v35 = vand.u32 4294901760, %v8994_v29 }
  0xaf   :  { %v143_v39 = vsel %vm44_vm0, %v100_v37, 0.0  ;;  %175 = vrot.lane.b32.xlu0 %v142_v36, %s8763_s11  ;;  %v103_v40 = vstv %s8464_s10  ;;  %v696_v37 = vand.u32 4294901760, %v8998_v31 }
  0xb0   :  { %177 = vrot.lane.b32.xlu1 %v143_v39, %s8763_s11  ;;  %s8466_s12 = spop %8465  ;;  %v144_v42 = vsel %vm44_vm0, %v103_v40, 0.0 }
  0xb1   :  { %s8468_s13 = spop %8467  ;;  %v106_v43 = vstv %s8466_s12  ;;  %s8769_s12 = smov 123  }
  0xb2   :  { %v109_v44 = vstv %s8468_s13  ;;  %v145_v45 = vsel %vm44_vm0, %v106_v43, 0.0 }
  0xb3   :  { %173 = vrot.lane.b32.xlu0 %v141_v41, %s8763_s11  ;;  %v146_v46 = vsel %vm44_vm0, %v109_v44, 0.0  ;;  %v691_v41 = vsub.f32 %v8994_v29, %v690_v35  ;;  %v697_v44 = vsub.f32 %v8998_v31, %v696_v37 }
  0xb4   :  { %179 = vrot.lane.b32.xlu1 %v144_v42, %s8763_s11  ;;  %s8470_s14 = spop %8469 }
  0xb5   :  { %s8472_s15 = spop %8471  ;;  %v112_v47 = vstv %s8470_s14 }
  0xb6   :  { %v147_v49 = vsel %vm44_vm0, %v112_v47, 0.0  ;;  %v115_v51 = vstv %s8472_s15 }
  0xb7   :  { %181 = vrot.lane.b32.xlu0 %v145_v45, %s8763_s11  ;;  %v148_v55 = vsel %vm44_vm0, %v115_v51, 0.0 }
  0xb8   :  { %183 = vrot.lane.b32.xlu1 %v146_v46, %s8763_s11  ;;  %s8474_s16 = spop %8473  ;;  %v692_v46 = vand.u32 4294901760, %v691_v41 }
  0xb9   :  { %s8476_s17 = spop %8475  ;;  %v118_v56 = vstv %s8474_s16 }
  0xba   :  { %v121_v48 = vstv %s8476_s17  ;;  %v149_v60 = vsel %vm44_vm0, %v118_v56, 0.0  ;;  %693 = vmatprep.subr.mxu1 %v692_v46 }
  0xbb   :  { %v150_v50 = vsel %vm44_vm0, %v121_v48, 0.0  ;;  %v698_v48 = vand.u32 4294901760, %v697_v44 }
  0xbc   :  { %185 = vrot.lane.b32.xlu1 %v147_v49, %s8763_s11  ;;  %191 = vrot.lane.b32.xlu0 %v150_v50, %s8763_s11  ;;  %s8478_s18 = spop %8477 }
  0xbd   :  { %v124_v52 = vstv %s8478_s18  ;;  %s8480_s19 = spop %8479  ;;  %699 = vmatpush1.msra.mxu1 %v698_v48 }
  0xbe   :  { %v151_v53 = vsel %vm44_vm0, %v124_v52, 0.0  ;;  %v127_v54 = vstv %s8480_s19  ;;  %863 = vmatprep.subr.mxu1 %v8985_v24 }
  0xbf   :  { %v152_v57 = vsel %vm44_vm0, %v127_v54, 0.0 }
  0xc0   :  { %187 = vrot.lane.b32.xlu1 %v148_v55, %s8763_s11  ;;  %193 = vrot.lane.b32.xlu0 %v151_v53, %s8763_s11  ;;  %s8482_s20 = spop %8481  ;;  %v12474_v55 = vmov 0.0  }
  0xc1   :  { %s8484_s21 = spop %8483  ;;  %v130_v58 = vstv %s8482_s20  ;;  %732 = vmatprep.mubr.f32.mxu1 %v12474_v55  ;;  %635 = vmatprep.mubr.f32.mxu0 %v12474_v55 }
  0xc2   :  { %v133_v59 = vstv %s8484_s21  ;;  %v153_v61 = vsel %vm44_vm0, %v130_v58, 0.0 }
  0xc3   :  { %v154_v62 = vsel %vm44_vm0, %v133_v59, 0.0 }
  0xc4   :  { %195 = vrot.lane.b32.xlu1 %v152_v57, %s8763_s11  ;;  %189 = vrot.lane.b32.xlu0 %v149_v60, %s8763_s11  ;;  %s8486_s22 = spop %8485 }
  0xc5   :  { %s8488_s23 = spop %8487  ;;  %v136_v63 = vstv %s8486_s22 }
  0xc6   :  { %v139_v0 = vstv %s8488_s23  ;;  %v155_v17 = vsel %vm44_vm0, %v136_v63, 0.0 }
  0xc7   :  { %v156_v18 = vsel %vm44_vm0, %v139_v0, 0.0 }
  0xc8   :  { %197 = vrot.lane.b32.xlu0 %v153_v61, %s8763_s11  ;;  %199 = vrot.lane.b32.xlu1 %v154_v62, %s8763_s11 }
  0xcc   :  { %201 = vrot.lane.b32.xlu0 %v155_v17, %s8763_s11  ;;  %203 = vrot.lane.b32.xlu1 %v156_v18, %s8763_s11 }
 0x121   :  { %v176_v19 = vpop.permute.xlu0 %175 }
 0x122   :  { %v178_v21 = vpop.permute.xlu1 %177  ;;  %v8991_v27 = vsub.f32 %v8836_v4, %v176_v19 }
 0x123   :  { %v9007_v36 = vsub.f32 %v8817_v1, %v178_v21 }
 0x124   :  { %12760 = vst [vmem:[#allocation6_spill] sm:$0xff] %v8991_v27  ;;  %v509_v38 = vrot.slane %v8991_v27, 7 }
 0x125   :  { %v174_v28 = vpop.permute.xlu0 %173  ;;  %12762 = vst [vmem:[#allocation8_spill] sm:$0xff] %v9007_v36  ;;  %v512_v47 = vrot.slane %v9007_v36, 6 }
 0x126   :  { %v180_v30 = vpop.permute.xlu1 %179  ;;  %v9002_v32 = vsub.f32 %v8822_v2, %v174_v28 }
 0x127   :  { %v9012_v39 = vsub.f32 %v8831_v3, %v180_v30 }
 0x128   :  { %12761 = vst [vmem:[#allocation7_spill] sm:$0xff] %v9002_v32  ;;  %v511_v45 = vsel %vm510_vm2, %v509_v38, %v9002_v32 }
 0x129   :  { %12763 = vst [vmem:[#allocation9_spill] sm:$0xff] %v9012_v39  ;;  %v182_v40 = vpop.permute.xlu0 %181  ;;  %v515_v49 = vrot.slane %v9012_v39, 5  ;;  %v514_v53 = vsel %vm513_vm3, %v512_v47, %v511_v45 }
 0x12a   :  { %v184_v42 = vpop.permute.xlu1 %183  ;;  %v9018_v43 = vsub.f32 %v8850_v6, %v182_v40 }
 0x12b   :  { %v9028_v50 = vsub.f32 %v8845_v5, %v184_v42  ;;  %v517_v57 = vsel %vm516_vm4, %v515_v49, %v514_v53 }
 0x12c   :  { %12764 = vst [vmem:[#allocation10_spill] sm:$0xff] %v9018_v43  ;;  %v518_v54 = vrot.slane %v9018_v43, 4 }
 0x12d   :  { %12765 = vst [vmem:[#allocation11_spill] sm:$0xff] %v9028_v50  ;;  %v521_v58 = vrot.slane %v9028_v50, 3 }
 0x12e   :  { %v186_v51 = vpop.permute.xlu1 %185  ;;  %v192_v52 = vpop.permute.xlu0 %191  ;;  %v520_v61 = vsel %vm519_vm5, %v518_v54, %v517_v57 }
 0x12f   :  { %v9034_v56 = vsub.f32 %v8864_v8, %v186_v51  ;;  %v9043_v63 = vsub.f32 %v8873_v9, %v192_v52  ;;  %v523_v18 = vsel %vm522_vm6, %v521_v58, %v520_v61 }
 0x131   :  { %12766 = vst [vmem:[#allocation12_spill] sm:$0xff] %v9034_v56  ;;  %v524_v62 = vrot.slane %v9034_v56, 2  ;;  %12767 = vst [vmem:[#allocation13_spill] sm:$0xff] %v9043_v63  ;;  %v530_v23 = vrot.slane %v9043_v63, 7 }
 0x132   :  { %v188_v59 = vpop.permute.xlu1 %187  ;;  %v194_v60 = vpop.permute.xlu0 %193 }
 0x133   :  { %v9046_v0 = vsub.f32 %v8859_v7, %v188_v59  ;;  %v9049_v17 = vsub.f32 %v8887_v11, %v194_v60  ;;  %v526_v22 = vsel %vm525_vm7, %v524_v62, %v523_v18 }
 0x135   :  { %12768 = vst [vmem:[#allocation14_spill] sm:$0xff] %v9046_v0  ;;  %12769 = vst [vmem:[#allocation15_spill] sm:$0xff] %v9049_v17  ;;  %v527_v19 = vrot.slane %v9046_v0, 1  ;;  %v532_v38 = vrot.slane %v9049_v17, 6 }
 0x136   :  { %v196_v20 = vpop.permute.xlu1 %195  ;;  %v190_v21 = vpop.permute.xlu0 %189 }
 0x137   :  { %v9056_v25 = vsub.f32 %v8892_v12, %v196_v20  ;;  %v9059_v28 = vsub.f32 %v8878_v10, %v190_v21  ;;  %v529_v30 = vsel %vm528_vm8, %v527_v19, %v526_v22  ;;  %v8765_v19 = vmov 3  }
 0x138   :  { %544 = vrot.lane.b32.xlu0 %v529_v30, %s8762_s27  ;;  %8503 = vset.pattern.permute.xlu1 %v8765_v19 }
 0x139   :  { %12770 = vst [vmem:[#allocation16_spill] sm:$0xff] %v9056_v25  ;;  %12771 = vst [vmem:[#allocation17_spill] sm:$0xff] %v9059_v28  ;;  %v531_v40 = vsel %vm510_vm2, %v530_v23, %v9059_v28  ;;  %v534_v41 = vrot.slane %v9056_v25, 5  ;;  %8504 = vset.pattern.permute.xlu0 %v8765_v19 }
 0x13a   :  { %v198_v42 = vpop.permute.xlu0 %197  ;;  %v200_v44 = vpop.permute.xlu1 %199  ;;  %v533_v47 = vsel %vm513_vm3, %v532_v38, %v531_v40  ;;  %v465_v40 = vld [vmem:[%s12468_s1 + $0x20] sm:$0x3f] }
 0x13b   :  { %v9068_v45 = vsub.f32 %v8901_v13, %v198_v42  ;;  %v9071_v46 = vsub.f32 %v8906_v14, %v200_v44  ;;  %v535_v52 = vsel %vm516_vm4, %v534_v41, %v533_v47  ;;  %v567_v44 = vsel %vm553_vm1, %v465_v40, 0 }
 0x13c   :  { %241 = vperm.xlu0 %8504, %v8836_v4   ;;  %v9180_v47 = vand.u32 4294901760, %v567_v44 }
 0x13d   :  { %12772 = vst [vmem:[#allocation18_spill] sm:$0xff] %v9068_v45  ;;  %12773 = vst [vmem:[#allocation19_spill] sm:$0xff] %v9071_v46  ;;  %v536_v48 = vrot.slane %v9068_v45, 4  ;;  %v538_v53 = vrot.slane %v9071_v46, 3 }
 0x13e   :  { %v202_v49 = vpop.permute.xlu0 %201  ;;  %v204_v51 = vpop.permute.xlu1 %203 }
 0x13f   :  { %v9078_v54 = vsub.f32 %v8915_v15, %v202_v49  ;;  %v9081_v57 = vsub.f32 %v8920_v16, %v204_v51  ;;  %v537_v58 = vsel %vm519_vm5, %v536_v48, %v535_v52  ;;  %v1715_v48 = vsub.f32 %v567_v44, %v9180_v47 }
 0x140   :  { %v539_v61 = vsel %vm522_vm6, %v538_v53, %v537_v58  ;;  %271 = vperm.xlu0 %8504, %v8892_v12   ;;  %v8766_v51 = vmov 13   ;;  %v8767_v52 = vmov 12   ;;  %v9250_v53 = vshrl.u32 %v42_v33, 7 }
 0x141   :  { %12774 = vst [vmem:[#allocation20_spill] sm:$0xff] %v9078_v54  ;;  %12775 = vst [vmem:[#allocation21_spill] sm:$0xff] %v9081_v57  ;;  %v540_v59 = vrot.slane %v9078_v54, 2  ;;  %v542_v60 = vrot.slane %v9081_v57, 1 }
 0x142   :  { %v9253_v58 = vsub.s32 1, %v9250_v53  ;;  %v9263_v33 = vsub.s32 0, %v9250_v53 }
 0x143   :  { %v541_v62 = vsel %vm525_vm7, %v540_v59, %v539_v61  ;;  %v9258_v59 = vld [vmem:[%s12469_s2] sm:$0x1f] }
 0x144   :  { %v543_v18 = vsel %vm528_vm8, %v542_v60, %v541_v62  ;;  %277 = vperm.xlu0 %8504, %v8906_v14   ;;  %v475_v61 = vrot.slane %v9258_v59, %v9253_v58 }
 0x145   :  { %546 = vrot.lane.b32.xlu1 %v543_v18, %s8762_s27 }
 0x148   :  { %283 = vperm.xlu0 %8504, %v8920_v16  }
 0x149   :  { %238 = vperm.xlu1 %8503, %v8822_v2  }
 0x14c   :  { %8506 = vset.pattern.permute.xlu0 %v8766_v51 }
 0x14d   :  { %244 = vperm.xlu1 %8503, %v8817_v1   ;;  %v464_v1 = vld [vmem:[%s12468_s1 + $0x18] sm:$0x3f] }
 0x151   :  { %247 = vperm.xlu1 %8503, %v8831_v3   ;;  %v564_v3 = vsel %vm553_vm1, %v464_v1, 0 }
 0x155   :  { %250 = vperm.xlu1 %8503, %v8850_v6   ;;  %v9115_v6 = vand.u32 4294901760, %v564_v3 }
 0x159   :  { %253 = vperm.xlu1 %8503, %v8845_v5  }
 0x15d   :  { %262 = vperm.xlu1 %8503, %v8878_v10   ;;  %v9131_v10 = vsub.f32 %v564_v3, %v9115_v6 }
 0x15f   :  { %v1204_v14 = vand.u32 4294901760, %v9131_v10 }
 0x161   :  { %265 = vperm.xlu1 %8503, %v8873_v9   ;;  %v1205_v21 = vsub.f32 %v9131_v10, %v1204_v14 }
 0x163   :  { %v1206_v29 = vand.u32 4294901760, %v1205_v21 }
 0x165   :  { %256 = vperm.xlu1 %8503, %v8864_v8   ;;  %v463_v8 = vld [vmem:[%s12468_s1 + $0x10] sm:$0x3f] }
 0x166   :  { %v561_v12 = vsel %vm553_vm1, %v463_v8, 0 }
 0x169   :  { %268 = vperm.xlu1 %8503, %v8887_v11  }
 0x16d   :  { %259 = vperm.xlu1 %8503, %v8859_v7  }
 0x171   :  { %274 = vperm.xlu1 %8503, %v8901_v13  }
 0x175   :  { %280 = vperm.xlu1 %8503, %v8915_v15   ;;  %v9139_v15 = vand.u32 4294901760, %v561_v12 }
 0x177   :  { %v9153_v22 = vsub.f32 %v561_v12, %v9139_v15 }
 0x179   :  { %8505 = vset.pattern.permute.xlu1 %v8767_v52 }
 0x1aa   :  { %v545_v2 = vpop.permute.xlu0 %544 }
 0x1ab   :  { %v549_v4 = vsel %vm548_vm9, %v545_v2, 0 }
 0x1ac   :  { %v9113_v5 = vand.u32 4294901760, %v549_v4 }
 0x1ae   :  { %v9118_v7 = vsub.f32 %v549_v4, %v9113_v5  ;;  %734 = vmatmul.mubr.f32.vlgmr.msra.gmra.mxu1 %v9113_v5 }
 0x1af   :  { %739 = vmatprep.mubr.f32.mxu1 %v12474_v55  ;;  %865 = vmatpush1.msra.mxu1 %v8988_v26 }
 0x1b0   :  { %v9127_v9 = vand.u32 4294901760, %v9118_v7  ;;  %1033 = vmatprep.subr.mxu1 %v8985_v24 }
 0x1b2   :  { %v639_v11 = vsub.f32 %v9118_v7, %v9127_v9 }
 0x1b4   :  { %v9136_v13 = vand.u32 4294901760, %v639_v11 }
 0x1b6   :  { %641 = vmatmul.mubr.f32.vlgmr.msra.gmra.mxu0 %v9136_v13 }
 0x1b7   :  { %v547_v16 = vpop.permute.xlu1 %546  ;;  %782 = vmatpush1.msra.mxu0 %v8998_v31  ;;  %646 = vmatprep.mubr.f32.mxu0 %v12474_v55  ;;  %v1716_v31 = vand.u32 4294901760, %v1715_v48 }
 0x1b8   :  { %v551_v24 = vsel %vm548_vm9, %v547_v16, 0  ;;  %950 = vmatprep.subr.mxu0 %v690_v35  ;;  %v1210_v35 = vand.u32 4294901760, %v9153_v22 }
 0x1b9   :  { %v9147_v20 = vand.u32 4294901760, %v551_v24 }
 0x1ba   :  { %v1211_v42 = vsub.f32 %v9153_v22, %v1210_v35 }
 0x1bb   :  { %v9156_v23 = vsub.f32 %v551_v24, %v9147_v20  ;;  %741 = vmatmul.mubr.f32.gmra.mxu1 %v9147_v20 }
 0x1bc   :  { %898 = vmatprep.mubr.f32.mxu1 %v12474_v55 }
 0x1bd   :  { %v9161_v30 = vand.u32 4294901760, %v9156_v23 }
 0x1bf   :  { %902 = vmatmul.mubr.f32.vlgmr.msra.gmra.mxu1 %v9127_v9  ;;  %v650_v38 = vsub.f32 %v9156_v23, %v9161_v30 }
 0x1c0   :  { %907 = vmatprep.mubr.f32.mxu1 %v12474_v55  ;;  %1035 = vmatpush1.msra.mxu1 %v8988_v26  ;;  %v1212_v26 = vand.u32 4294901760, %v1211_v42 }
 0x1c1   :  { %v9172_v41 = vand.u32 4294901760, %v650_v38  ;;  %1207 = vmatprep.subr.mxu1 %v1206_v29 }
 0x1c3   :  { %652 = vmatmul.mubr.f32.gmra.mxu0 %v9172_v41  ;;  %911 = vmatmul.mubr.f32.gmra.mxu1 %v9161_v30 }
 0x1c4   :  { %815 = vmatprep.mubr.f32.mxu0 %v12474_v55  ;;  %1068 = vmatprep.mubr.f32.mxu1 %v12474_v55 }
 0x1c7   :  { %818 = vmatmul.mubr.f32.vlgmr.msra.gmra.mxu0 %v9118_v7  ;;  %1070 = vmatmul.mubr.f32.vlgmr.msra.gmra.mxu1 %v9113_v5 }
 0x1c8   :  { %954 = vmatpush1.msra.mxu0 %v696_v37  ;;  %823 = vmatprep.mubr.f32.mxu0 %v12474_v55  ;;  %v1717_v37 = vsub.f32 %v1715_v48, %v1716_v31 }
 0x1c9   :  { %1075 = vmatprep.mubr.f32.mxu1 %v12474_v55  ;;  %1213 = vmatpush1.msra.mxu1 %v1212_v26 }
 0x1ca   :  { %1114 = vmatprep.subr.mxu0 %v9115_v6  ;;  %1377 = vmatprep.subr.mxu1 %v9115_v6  ;;  %v1718_v49 = vand.u32 4294901760, %v1717_v37 }
 0x1cb   :  { %826 = vmatmul.mubr.f32.gmra.mxu0 %v9156_v23  ;;  %1077 = vmatmul.mubr.f32.gmra.mxu1 %v9147_v20 }
 0x1cc   :  { %987 = vmatprep.mubr.f32.mxu0 %v12474_v55  ;;  %1246 = vmatprep.mubr.f32.mxu1 %v12474_v55 }
 0x1cf   :  { %989 = vmatmul.mubr.f32.vlgmr.msra.gmra.mxu0 %v9113_v5  ;;  %1248 = vmatmul.mubr.f32.vlgmr.msra.gmra.mxu1 %v9113_v5 }
 0x1d0   :  { %994 = vmatprep.mubr.f32.mxu0 %v12474_v55  ;;  %1253 = vmatprep.mubr.f32.mxu1 %v12474_v55 }
 0x1d1   :  { %1116 = vmatpush1.msra.mxu0 %v9139_v15  ;;  %1379 = vmatpush1.msra.mxu1 %v9139_v15 }
 0x1d2   :  { %1293 = vmatprep.subr.mxu0 %v9131_v10  ;;  %1547 = vmatprep.subr.mxu1 %v9115_v6 }
 0x1d3   :  { %996 = vmatmul.mubr.f32.gmra.mxu0 %v9147_v20  ;;  %1255 = vmatmul.mubr.f32.gmra.mxu1 %v9147_v20 }
 0x1d4   :  { %1149 = vmatprep.mubr.f32.mxu0 %v12474_v55  ;;  %1412 = vmatprep.mubr.f32.mxu1 %v12474_v55 }
 0x1d7   :  { %1155 = vmatmul.mubr.f32.vlgmr.msra.gmra.mxu0 %v9136_v13  ;;  %1416 = vmatmul.mubr.f32.vlgmr.msra.gmra.mxu1 %v9127_v9 }
 0x1d8   :  { %1160 = vmatprep.mubr.f32.mxu0 %v12474_v55  ;;  %1421 = vmatprep.mubr.f32.mxu1 %v12474_v55 }
 0x1d9   :  { %1296 = vmatpush1.msra.mxu0 %v9153_v22  ;;  %1549 = vmatpush1.msra.mxu1 %v9139_v15  ;;  %v8768_v22 = vmov 1966171168  }
 0x1da   :  { %1464 = vmatprep.subr.mxu0 %v1204_v14  ;;  %8432 = vmatprep.subr.mxu1 %v1718_v49 }
 0x1db   :  { %1166 = vmatmul.mubr.f32.gmra.mxu0 %v9172_v41  ;;  %1425 = vmatmul.mubr.f32.gmra.mxu1 %v9161_v30 }
 0x1dc   :  { %1329 = vmatprep.mubr.f32.mxu0 %v12474_v55  ;;  %1582 = vmatprep.mubr.f32.mxu1 %v12474_v55 }
 0x1df   :  { %1332 = vmatmul.mubr.f32.vlgmr.msra.gmra.mxu0 %v9118_v7  ;;  %1584 = vmatmul.mubr.f32.vlgmr.msra.gmra.mxu1 %v9113_v5 }
 0x1e0   :  { %1337 = vmatprep.mubr.f32.mxu0 %v12474_v55  ;;  %1589 = vmatprep.mubr.f32.mxu1 %v12474_v55 }
 0x1e1   :  { %1468 = vmatpush1.msra.mxu0 %v1210_v35  ;;  %8433 = vmatpush3.msra.mxu1 %v1718_v49 }
 0x1e2   :  { %8442 = vmatprep.subr.mxu1 %v9180_v47  ;;  %8427 = vmatprep.subr.mxu0 %v9180_v47 }
 0x1e3   :  { %1340 = vmatmul.mubr.f32.gmra.mxu0 %v9156_v23  ;;  %1591 = vmatmul.mubr.f32.gmra.mxu1 %v9147_v20 }
 0x1e4   :  { %8434 = vmatprep.mubr.f32.mxu1 %v9113_v5  ;;  %1501 = vmatprep.mubr.f32.mxu0 %v12474_v55 }
 0x1e7   :  { %1503 = vmatmul.mubr.f32.vlgmr.msra.gmra.mxu0 %v9113_v5  ;;  %8435 = vmatmul.mubr.f32.vlgmr.msra.gmra.mxu1 %v9147_v20 }
 0x1e8   :  { %8444 = vmatprep.mubr.f32.mxu1 %v9127_v9  ;;  %1508 = vmatprep.mubr.f32.mxu0 %v12474_v55 }
 0x1e9   :  { %8443 = vmatpush3.msra.mxu1 %v9180_v47  ;;  %8428 = vmatpush3.msra.mxu0 %v9180_v47 }
 0x1ea   :  { %8452 = vmatprep.subr.mxu1 %v9180_v47  ;;  %8437 = vmatprep.subr.mxu0 %v1715_v48 }
 0x1eb   :  { %1510 = vmatmul.mubr.f32.gmra.mxu0 %v9147_v20  ;;  %8445 = vmatmul.mubr.f32.vlgmr.msra.gmra.mxu1 %v9161_v30 }
 0x1ec   :  { %8429 = vmatprep.mubr.f32.mxu0 %v9136_v13  ;;  %8454 = vmatprep.mubr.f32.mxu1 %v9113_v5 }
 0x1ed   :  { %8453 = vmatpush3.msra.mxu1 %v9180_v47 }
 0x1ef   :  { %8430 = vmatmul.mubr.f32.vlgmr.msra.gmra.mxu0 %v9172_v41  ;;  %8455 = vmatmul.mubr.f32.vlgmr.msra.gmra.mxu1 %v9147_v20 }
 0x1f0   :  { %8439 = vmatprep.mubr.f32.mxu0 %v9118_v7  ;;  %8438 = vmatpush3.msra.mxu0 %v1715_v48  ;;  %v471_v7 = vrot.slane %v9258_v59, %v9263_v33 }
 0x1f1   :  { %8447 = vmatprep.subr.mxu0 %v1716_v31  ;;  %5062 = vmatprep.mubr.f32.mxu1 %v12474_v55 }
 0x1f3   :  { %8440 = vmatmul.mubr.f32.vlgmr.msra.gmra.mxu0 %v9156_v23  ;;  %v2090_v23 = vunpack.c.l.s4 %v8768_v22 }
 0x1f4   :  { %8449 = vmatprep.mubr.f32.mxu0 %v9113_v5  ;;  %8448 = vmatpush3.msra.mxu0 %v1716_v31 }
 0x1f5   :  { %v2091_v26 = vunpack.c.0.s8 %v2090_v23 }
 0x1f7   :  { %8450 = vmatmul.mubr.f32.vlgmr.msra.gmra.mxu0 %v9147_v20 }
 0x1f8   :  { %4955 = vmatprep.mubr.f32.mxu0 %v12474_v55 }
 0x26e   :  { %v735_v60 = vpop.f32.mrf.mxu1 }
 0x270   :  { %v737_v1 = vpop.f32.mrf.mxu1 }
 0x276   :  { %v642_v62 = vpop.f32.mrf.mxu0 }
 0x277   :  { %v643_v11 = vadd.f32 %v642_v62, %v471_v7  ;;  %v9274_v62 = vsub.s32 %v2091_v26, %v9250_v53 }
 0x278   :  { %v644_v18 = vpop.f32.mrf.mxu0 }
 0x279   :  { %v645_v2 = vadd.f32 %v644_v18, %v475_v61  ;;  %v736_v20 = vadd.f32 %v735_v60, %v643_v11 }
 0x27b   :  { %v742_v3 = vpop.f32.mrf.mxu1  ;;  %v738_v4 = vadd.f32 %v737_v1, %v645_v2 }
 0x27d   :  { %v744_v5 = vpop.f32.mrf.mxu1 }
 0x27f   :  { %v903_v6 = vpop.f32.mrf.mxu1 }
 0x281   :  { %v905_v8 = vpop.f32.mrf.mxu1 }
 0x283   :  { %v653_v9 = vpop.f32.mrf.mxu0  ;;  %v912_v10 = vpop.f32.mrf.mxu1 }
 0x284   :  { %v654_v24 = vadd.f32 %v653_v9, %v471_v7 }
 0x285   :  { %v655_v12 = vpop.f32.mrf.mxu0  ;;  %v914_v13 = vpop.f32.mrf.mxu1 }
 0x286   :  { %v656_v14 = vadd.f32 %v655_v12, %v475_v61  ;;  %v743_v42 = vadd.f32 %v742_v3, %v654_v24 }
 0x287   :  { %v819_v15 = vpop.f32.mrf.mxu0  ;;  %v1071_v16 = vpop.f32.mrf.mxu1 }
 0x288   :  { %v745_v21 = vadd.f32 %v744_v5, %v656_v14  ;;  %v820_v35 = vadd.f32 %v819_v15, %v736_v20  ;;  %v9277_v5 = vsub.s32 3, %v9250_v53 }
 0x289   :  { %v821_v30 = vpop.f32.mrf.mxu0  ;;  %v1073_v29 = vpop.f32.mrf.mxu1 }
 0x28a   :  { %v822_v38 = vadd.f32 %v821_v30, %v738_v4  ;;  %v904_v49 = vadd.f32 %v903_v6, %v820_v35 }
 0x28b   :  { %v827_v40 = vpop.f32.mrf.mxu0  ;;  %v1078_v41 = vpop.f32.mrf.mxu1 }
 0x28c   :  { %v906_v44 = vadd.f32 %v905_v8, %v822_v38  ;;  %v828_v31 = vadd.f32 %v827_v40, %v743_v42 }
 0x28d   :  { %v829_v47 = vpop.f32.mrf.mxu0  ;;  %v9267_v48 = vpop.f32.mrf.mxu1 }
 0x28e   :  { %12776 = vst [vmem:[#allocation22_spill] sm:$0xff] %v9267_v48  ;;  %v830_v37 = vadd.f32 %v829_v47, %v745_v21  ;;  %v913_v4 = vadd.f32 %v912_v10, %v828_v31  ;;  %v483_v10 = vrot.slane %v9258_v59, %v9277_v5 }
 0x28f   :  { %v990_v51 = vpop.f32.mrf.mxu0  ;;  %v9269_v52 = vpop.f32.mrf.mxu1 }
 0x290   :  { %12777 = vst [vmem:[#allocation23_spill] sm:$0xff] %v9269_v52  ;;  %v991_v60 = vadd.f32 %v990_v51, %v904_v49  ;;  %v9271_v61 = vadd.f32 %v914_v13, %v830_v37 }
 0x291   :  { %v992_v18 = vpop.f32.mrf.mxu0  ;;  %v1251_v1 = vpop.f32.mrf.mxu1 }
 0x292   :  { %12778 = vst [vmem:[#allocation24_spill] sm:$0xff] %v9271_v61  ;;  %v1072_v2 = vadd.f32 %v1071_v16, %v991_v60  ;;  %v993_v3 = vadd.f32 %v992_v18, %v906_v44 }
 0x293   :  { %v997_v7 = vpop.f32.mrf.mxu0  ;;  %v9279_v8 = vpop.f32.mrf.mxu1 }
 0x294   :  { %12779 = vst [vmem:[#allocation25_spill] sm:$0xff] %v9279_v8  ;;  %v998_v6 = vadd.f32 %v997_v7, %v913_v4  ;;  %3679 = vperm.xlu0 %8506, %v1072_v2   ;;  %2427 = vperm.xlu1 %8505, %v1072_v2   ;;  %v2095_v9 = vrot.slane %v1072_v2, %v9274_v62 }
 0x295   :  { %v9282_v11 = vpop.f32.mrf.mxu0  ;;  %v1258_v12 = vpop.f32.mrf.mxu1  ;;  %v9284_v13 = vadd.f32 %v1073_v29, %v993_v3  ;;  %v2088_v38 = vcombine.high %v1072_v2, %v1072_v2 }
 0x296   :  { %12780 = vst [vmem:[#allocation26_spill] sm:$0xff] %v9282_v11  ;;  %v9286_v14 = vadd.f32 %v1078_v41, %v998_v6  ;;  %v2111_v15 = vrot.slane %v2095_v9, %v9274_v62  ;;  %v2103_v16 = vcombine.high %v2095_v9, %v2095_v9 }
 0x297   :  { %12781 = vst [vmem:[#allocation27_spill] sm:$0xff] %v9284_v13  ;;  %v9291_v24 = vpop.f32.mrf.mxu0  ;;  %v9293_v20 = vpop.f32.mrf.mxu1  ;;  %v2102_v37 = vrot.slane %v2088_v38, %v9274_v62  ;;  %v9331_v38 = vsub.s32 4, %v9250_v53 }
 0x298   :  { %12782 = vst [vmem:[#allocation28_spill] sm:$0xff] %v9291_v24  ;;  %12783 = vst [vmem:[#allocation29_spill] sm:$0xff] %v9293_v20  ;;  %3682 = vperm.xlu0 %8506, %v9286_v14   ;;  %2430 = vperm.xlu1 %8505, %v9286_v14   ;;  %v2125_v21 = vrot.slane %v2103_v16, %v9274_v62  ;;  %v2189_v29 = vrot.slane %v2111_v15, %v9263_v33 }
 0x299   :  { %v1158_v22 = vpop.f32.mrf.mxu0  ;;  %v1419_v23 = vpop.f32.mrf.mxu1  ;;  %v2133_v31 = vcombine.high %v2111_v15, %v2111_v15  ;;  %v2118_v4 = vrot.slane %v2102_v37, %v9274_v62 }
 0x29a   :  { %v1159_v30 = vadd.f32 %v1158_v22, %v483_v10  ;;  %v2193_v35 = vrot.slane %v2125_v21, %v9263_v33  ;;  %v2135_v22 = vcombine.high %v2125_v21, %v2125_v21 }
 0x29b   :  { %v9300_v40 = vpop.f32.mrf.mxu0  ;;  %v9302_v41 = vpop.f32.mrf.mxu1  ;;  %v2197_v3 = vrot.slane %v2133_v31, %v9263_v33  ;;  %v2205_v16 = vrot.slane %v2118_v4, %v9263_v33 }
 0x29c   :  { %12784 = vst [vmem:[#allocation30_spill] sm:$0xff] %v9300_v40  ;;  %12785 = vst [vmem:[#allocation31_spill] sm:$0xff] %v9302_v41  ;;  %2250 = vrot.lane.b32.xlu0 %v2189_v29, %s8763_s11  ;;  %2252 = vrot.lane.b32.xlu1 %v2193_v35, %s8763_s11  ;;  %v1252_v42 = vadd.f32 %v1251_v1, %v1159_v30  ;;  %v2104_v30 = vcombine.high %v2102_v37, %v2102_v37 }
 0x29d   :  { %v1169_v44 = vpop.f32.mrf.mxu0  ;;  %v1428_v26 = vpop.f32.mrf.mxu1  ;;  %8508 = vset.pattern.permute.xlu0 %v8765_v19  ;;  %8507 = vset.pattern.permute.xlu1 %v8765_v19 }
 0x29e   :  { %v1170_v47 = vadd.f32 %v1169_v44, %v483_v10  ;;  %v2132_v21 = vrot.slane %v2104_v30, %v9274_v62 }
 0x29f   :  { %v9309_v49 = vpop.f32.mrf.mxu0  ;;  %v9311_v51 = vpop.f32.mrf.mxu1 }
 0x2a0   :  { %12786 = vst [vmem:[#allocation32_spill] sm:$0xff] %v9309_v49  ;;  %12787 = vst [vmem:[#allocation33_spill] sm:$0xff] %v9311_v51  ;;  %3502 = vrot.lane.b32.xlu0 %v2189_v29, %s8769_s12  ;;  %3504 = vrot.lane.b32.xlu1 %v2193_v35, %s8769_s12  ;;  %v1259_v60 = vadd.f32 %v1258_v12, %v1170_v47  ;;  %v2144_v12 = vrot.slane %v9286_v14, %v9274_v62 }
 0x2a1   :  { %v1335_v18 = vpop.f32.mrf.mxu0  ;;  %v1587_v1 = vpop.f32.mrf.mxu1  ;;  %v2201_v47 = vrot.slane %v2135_v22, %v9263_v33 }
 0x2a2   :  { %v1336_v2 = vadd.f32 %v1335_v18, %v1252_v42  ;;  %v2160_v31 = vrot.slane %v2144_v12, %v9274_v62 }
 0x2a3   :  { %v9317_v7 = vpop.f32.mrf.mxu0  ;;  %v9319_v19 = vpop.f32.mrf.mxu1 }
 0x2a4   :  { %12788 = vst [vmem:[#allocation34_spill] sm:$0xff] %v9317_v7  ;;  %12789 = vst [vmem:[#allocation35_spill] sm:$0xff] %v9319_v19  ;;  %2254 = vrot.lane.b32.xlu0 %v2197_v3, %s8763_s11  ;;  %3506 = vrot.lane.b32.xlu1 %v2197_v3, %s8769_s12  ;;  %v1420_v6 = vadd.f32 %v1419_v23, %v1336_v2  ;;  %v2182_v19 = vcombine.high %v2160_v31, %v2160_v31 }
 0x2a5   :  { %v1343_v9 = vpop.f32.mrf.mxu0  ;;  %v1594_v10 = vpop.f32.mrf.mxu1 }
 0x2a6   :  { %v1344_v15 = vadd.f32 %v1343_v9, %v1259_v60  ;;  %v2209_v9 = vrot.slane %v2132_v21, %v9263_v33 }
 0x2a7   :  { %v9326_v29 = vpop.f32.mrf.mxu0  ;;  %v8436_v23 = vpop.f32.mrf.mxu1 }
 0x2a8   :  { %12790 = vst [vmem:[#allocation36_spill] sm:$0xff] %v9326_v29  ;;  %3510 = vrot.lane.b32.xlu1 %v2205_v16, %s8769_s12  ;;  %2258 = vrot.lane.b32.xlu0 %v2205_v16, %s8763_s11  ;;  %v1429_v35 = vadd.f32 %v1428_v26, %v1344_v15  ;;  %v487_v26 = vrot.slane %v9258_v59, %v9331_v38 }
 0x2a9   :  { %v1506_v42 = vpop.f32.mrf.mxu0  ;;  %v1755_v18 = vpop.f32.mrf.mxu1  ;;  %v2152_v15 = vcombine.high %v2144_v12, %v2144_v12 }
 0x2aa   :  { %v1507_v44 = vadd.f32 %v1506_v42, %v1420_v6  ;;  %v2221_v6 = vrot.slane %v2160_v31, %v9263_v33  ;;  %v2229_v31 = vrot.slane %v2182_v19, %v9263_v33 }
 0x2ab   :  { %v9336_v37 = vpop.f32.mrf.mxu0  ;;  %v8446_v42 = vpop.f32.mrf.mxu1 }
 0x2ac   :  { %12791 = vst [vmem:[#allocation37_spill] sm:$0xff] %v9336_v37  ;;  %3508 = vrot.lane.b32.xlu1 %v2201_v47, %s8769_s12  ;;  %2256 = vrot.lane.b32.xlu0 %v2201_v47, %s8763_s11  ;;  %v9342_v60 = vadd.f32 %v1587_v1, %v1507_v44  ;;  %v2174_v47 = vrot.slane %v2152_v15, %v9274_v62 }
 0x2ad   :  { %v1513_v2 = vpop.f32.mrf.mxu0 }
 0x2ae   :  { %12792 = vst [vmem:[#allocation38_spill] sm:$0xff] %v9342_v60  ;;  %v1514_v3 = vadd.f32 %v1513_v2, %v1429_v35  ;;  %v2134_v35 = vcombine.high %v2118_v4, %v2118_v4  ;;  %v2184_v19 = vcombine.high %v2174_v47, %v2174_v47 }
 0x2af   :  { %v8431_v16 = vpop.f32.mrf.mxu0 }
 0x2b0   :  { %v1680_v22 = vadd.f32 %v8431_v16, %v487_v26  ;;  %2266 = vrot.lane.b32.xlu1 %v2221_v6, %s8763_s11  ;;  %2260 = vrot.lane.b32.xlu0 %v2209_v9, %s8763_s11  ;;  %v9348_v30 = vadd.f32 %v1594_v10, %v1514_v3  ;;  %v1916_v16 = vpop.f32.mrf.mxu1  ;;  %v2137_v10 = vcombine.high %v9286_v14, %v9286_v14 }
 0x2b1   :  { %v1669_v59 = vpop.f32.mrf.mxu0 }
 0x2b2   :  { %12793 = vst [vmem:[#allocation39_spill] sm:$0xff] %v9348_v30  ;;  %v1670_v1 = vadd.f32 %v1669_v59, %v487_v26  ;;  %v1762_v44 = vadd.f32 %v8436_v23, %v1680_v22  ;;  %v2225_v23 = vrot.slane %v2174_v47, %v9263_v33  ;;  %v2213_v26 = vrot.slane %v2134_v35, %v9263_v33 }
 0x2b3   :  { %v8441_v2 = vpop.f32.mrf.mxu0 }
 0x2b4   :  { %v1843_v55 = vadd.f32 %v8441_v2, %v1762_v44  ;;  %3512 = vrot.lane.b32.xlu1 %v2209_v9, %s8769_s12  ;;  %3518 = vrot.lane.b32.xlu0 %v2221_v6, %s8769_s12  ;;  %v1756_v12 = vadd.f32 %v1755_v18, %v1670_v1  ;;  %v8456_v18 = vpop.f32.mrf.mxu1  ;;  %v2151_v9 = vrot.slane %v2137_v10, %v9274_v62 }
 0x2b5   :  { %v1835_v60 = vpop.f32.mrf.mxu0 }
 0x2b6   :  { %v1836_v3 = vadd.f32 %v1835_v60, %v1756_v12  ;;  %v1925_v30 = vadd.f32 %v8446_v42, %v1843_v55  ;;  %v2167_v55 = vrot.slane %v2151_v9, %v9274_v62  ;;  %v2136_v60 = vcombine.high %v2132_v21, %v2132_v21  ;;  %v9377_v21 = vpop.permute.xlu1 %238 }
 0x2b7   :  { %v8451_v4 = vpop.f32.mrf.mxu0  ;;  %v2233_v42 = vrot.slane %v2184_v19, %v9263_v33  ;;  %v2153_v59 = vcombine.high %v2151_v9, %v2151_v9 }
 0x2b8   :  { %v2005_v15 = vadd.f32 %v8451_v4, %v1925_v30  ;;  %3520 = vrot.lane.b32.xlu1 %v2225_v23, %s8769_s12  ;;  %2262 = vrot.lane.b32.xlu0 %v2213_v26, %s8763_s11  ;;  %v9359_v6 = vadd.f32 %v1916_v16, %v1836_v3  ;;  %v2237_v22 = vrot.slane %v2167_v55, %v9263_v33 }
 0x2b9   :  { %v2217_v30 = vrot.slane %v2136_v60, %v9263_v33  ;;  %v2181_v1 = vrot.slane %v2153_v59, %v9274_v62  ;;  %v2183_v47 = vcombine.high %v2167_v55, %v2167_v55 }
 0x2ba   :  { %12794 = vst [vmem:[#allocation40_spill] sm:$0xff] %v9359_v6  ;;  %v9363_v14 = vadd.f32 %v8456_v18, %v2005_v15  ;;  %v9383_v35 = vpop.permute.xlu1 %244  ;;  %v9407_v18 = vpop.permute.xlu0 %241 }
 0x2bb   :  { %v2241_v44 = vrot.slane %v2181_v1, %v9263_v33  ;;  %v2245_v2 = vrot.slane %v2183_v47, %v9263_v33  ;;  %v2185_v12 = vcombine.high %v2181_v1, %v2181_v1 }
 0x2bc   :  { %12795 = vst [vmem:[#allocation41_spill] sm:$0xff] %v9363_v14  ;;  %2270 = vrot.lane.b32.xlu1 %v2229_v31, %s8763_s11  ;;  %3514 = vrot.lane.b32.xlu0 %v2213_v26, %s8769_s12 }
 0x2bd   :  { %v2249_v16 = vrot.slane %v2185_v12, %v9263_v33 }
 0x2be   :  { %v9390_v62 = vpop.permute.xlu1 %247  ;;  %v9411_v9 = vpop.permute.xlu0 %271 }
 0x2c0   :  { %3522 = vrot.lane.b32.xlu1 %v2229_v31, %s8769_s12  ;;  %2268 = vrot.lane.b32.xlu0 %v2225_v23, %s8763_s11 }
 0x2c2   :  { %v9395_v10 = vpop.permute.xlu1 %250  ;;  %v9415_v60 = vpop.permute.xlu0 %277 }
 0x2c4   :  { %3526 = vrot.lane.b32.xlu1 %v2237_v22, %s8769_s12  ;;  %2264 = vrot.lane.b32.xlu0 %v2217_v30, %s8763_s11 }
 0x2c6   :  { %v9397_v3 = vpop.permute.xlu1 %253 }
 0x2c8   :  { %2272 = vrot.lane.b32.xlu1 %v2233_v42, %s8763_s11  ;;  %3516 = vrot.lane.b32.xlu0 %v2217_v30, %s8769_s12  ;;  %v9419_v30 = vpop.permute.xlu0 %283 }
 0x2ca   :  { %v9399_v23 = vpop.permute.xlu1 %262 }
 0x2cc   :  { %3524 = vrot.lane.b32.xlu1 %v2233_v42, %s8769_s12  ;;  %2274 = vrot.lane.b32.xlu0 %v2237_v22, %s8763_s11 }
 0x2ce   :  { %v9401_v26 = vpop.permute.xlu1 %265 }
 0x2d0   :  { %3528 = vrot.lane.b32.xlu1 %v2241_v44, %s8769_s12  ;;  %2276 = vrot.lane.b32.xlu0 %v2241_v44, %s8763_s11 }
 0x2d2   :  { %v9403_v4 = vpop.permute.xlu1 %256 }
 0x2d3   :  { %v312_v40 = vrot.slane %v9403_v4, %v9263_v33 }
 0x2d4   :  { %3530 = vrot.lane.b32.xlu1 %v2245_v2, %s8769_s12  ;;  %2278 = vrot.lane.b32.xlu0 %v2245_v2, %s8763_s11 }
 0x2d6   :  { %v9405_v15 = vpop.permute.xlu1 %268 }
 0x2d8   :  { %3532 = vrot.lane.b32.xlu1 %v2249_v16, %s8769_s12  ;;  %2280 = vrot.lane.b32.xlu0 %v2249_v16, %s8763_s11  ;;  %s8770_s11 = smov 3  }
 0x2da   :  { %v9409_v31 = vpop.permute.xlu1 %259 }
 0x2de   :  { %v9413_v55 = vpop.permute.xlu1 %274 }
 0x2e2   :  { %v9417_v22 = vpop.permute.xlu1 %280 }
 0x30f   :  { %v9421_v19 = vpop.permute.xlu1 %2427  ;;  %v9423_v42 = vpop.permute.xlu0 %3679 }
 0x313   :  { %v9425_v59 = vpop.permute.xlu1 %2430  ;;  %v9427_v1 = vpop.permute.xlu0 %3682 }
 0x317   :  { %v2253_v44 = vpop.permute.xlu1 %2252  ;;  %v2251_v47 = vpop.permute.xlu0 %2250 }
 0x318   :  { %v2299_v2 = vmul.f32 %v2253_v44, %v8991_v27  ;;  %v2298_v12 = vmul.f32 %v2251_v47, %v9002_v32 }
 0x31a   :  { %2332 = vrot.lane.b32.xlu1 %v2299_v2, %s8762_s27  ;;  %2330 = vrot.lane.b32.xlu0 %v2298_v12, %s8762_s27 }
 0x31b   :  { %v3505_v16 = vpop.permute.xlu1 %3504  ;;  %v3503_v14 = vpop.permute.xlu0 %3502 }
 0x31c   :  { %v3551_v6 = vmul.f32 %v3505_v16, %v8991_v27  ;;  %v3550_v48 = vmul.f32 %v3503_v14, %v9002_v32 }
 0x31e   :  { %3584 = vrot.lane.b32.xlu1 %v3551_v6, %s8762_s27  ;;  %3582 = vrot.lane.b32.xlu0 %v3550_v48, %s8762_s27 }
 0x31f   :  { %v3507_v51 = vpop.permute.xlu1 %3506  ;;  %v2255_v13 = vpop.permute.xlu0 %2254 }
 0x320   :  { %v3552_v44 = vmul.f32 %v3507_v51, %v9007_v36  ;;  %v2300_v47 = vmul.f32 %v2255_v13, %v9007_v36 }
 0x322   :  { %3586 = vrot.lane.b32.xlu1 %v3552_v44, %s8762_s27  ;;  %2334 = vrot.lane.b32.xlu0 %v2300_v47, %s8762_s27 }
 0x323   :  { %v3511_v2 = vpop.permute.xlu1 %3510  ;;  %v2259_v12 = vpop.permute.xlu0 %2258 }
 0x324   :  { %v3554_v16 = vmul.f32 %v3511_v2, %v9018_v43  ;;  %v2302_v14 = vmul.f32 %v2259_v12, %v9018_v43 }
 0x326   :  { %3590 = vrot.lane.b32.xlu1 %v3554_v16, %s8762_s27  ;;  %2338 = vrot.lane.b32.xlu0 %v2302_v14, %s8762_s27 }
 0x327   :  { %v3509_v48 = vpop.permute.xlu1 %3508  ;;  %v2257_v6 = vpop.permute.xlu0 %2256 }
 0x328   :  { %v3553_v51 = vmul.f32 %v3509_v48, %v9012_v39  ;;  %v2301_v13 = vmul.f32 %v2257_v6, %v9012_v39 }
 0x32a   :  { %3588 = vrot.lane.b32.xlu1 %v3553_v51, %s8762_s27  ;;  %2336 = vrot.lane.b32.xlu0 %v2301_v13, %s8762_s27 }
 0x32b   :  { %v2267_v44 = vpop.permute.xlu1 %2266  ;;  %v2261_v47 = vpop.permute.xlu0 %2260 }
 0x32c   :  { %v2306_v2 = vmul.f32 %v2267_v44, %v9059_v28  ;;  %v2303_v12 = vmul.f32 %v2261_v47, %v9028_v50 }
 0x32e   :  { %2346 = vrot.lane.b32.xlu1 %v2306_v2, %s8762_s27  ;;  %2340 = vrot.lane.b32.xlu0 %v2303_v12, %s8762_s27 }
 0x32f   :  { %v3513_v16 = vpop.permute.xlu1 %3512  ;;  %v3519_v14 = vpop.permute.xlu0 %3518 }
 0x330   :  { %v3555_v48 = vmul.f32 %v3513_v16, %v9028_v50  ;;  %v3558_v6 = vmul.f32 %v3519_v14, %v9059_v28 }
 0x332   :  { %3592 = vrot.lane.b32.xlu1 %v3555_v48, %s8762_s27  ;;  %3598 = vrot.lane.b32.xlu0 %v3558_v6, %s8762_s27 }
 0x333   :  { %v3521_v51 = vpop.permute.xlu1 %3520  ;;  %v2263_v13 = vpop.permute.xlu0 %2262 }
 0x334   :  { %v3559_v44 = vmul.f32 %v3521_v51, %v9043_v63  ;;  %v2304_v47 = vmul.f32 %v2263_v13, %v9034_v56 }
 0x336   :  { %3600 = vrot.lane.b32.xlu1 %v3559_v44, %s8762_s27  ;;  %2342 = vrot.lane.b32.xlu0 %v2304_v47, %s8762_s27 }
 0x337   :  { %v2271_v2 = vpop.permute.xlu1 %2270  ;;  %v3515_v12 = vpop.permute.xlu0 %3514 }
 0x338   :  { %v2308_v16 = vmul.f32 %v2271_v2, %v9049_v17  ;;  %v3556_v14 = vmul.f32 %v3515_v12, %v9034_v56 }
 0x33a   :  { %2350 = vrot.lane.b32.xlu1 %v2308_v16, %s8762_s27  ;;  %3594 = vrot.lane.b32.xlu0 %v3556_v14, %s8762_s27 }
 0x33b   :  { %v3523_v48 = vpop.permute.xlu1 %3522  ;;  %v2269_v6 = vpop.permute.xlu0 %2268 }
 0x33c   :  { %v3560_v51 = vmul.f32 %v3523_v48, %v9049_v17  ;;  %v2307_v13 = vmul.f32 %v2269_v6, %v9043_v63  ;;  %v316_v63 = vrot.slane %v9409_v31, %v9263_v33  ;;  %v8733_v31 = vld [vmem:[%s12467_s0 + $0x38] sm:$0xff] }
 0x33e   :  { %3602 = vrot.lane.b32.xlu1 %v3560_v51, %s8762_s27  ;;  %2348 = vrot.lane.b32.xlu0 %v2307_v13, %s8762_s27 }
 0x33f   :  { %v3527_v44 = vpop.permute.xlu1 %3526  ;;  %v2265_v47 = vpop.permute.xlu0 %2264 }
 0x340   :  { %v3562_v2 = vmul.f32 %v3527_v44, %v9068_v45  ;;  %v2305_v12 = vmul.f32 %v2265_v47, %v9046_v0 }
 0x342   :  { %3606 = vrot.lane.b32.xlu1 %v3562_v2, %s8762_s27  ;;  %2344 = vrot.lane.b32.xlu0 %v2305_v12, %s8762_s27 }
 0x343   :  { %v2273_v16 = vpop.permute.xlu1 %2272  ;;  %v3517_v14 = vpop.permute.xlu0 %3516 }
 0x344   :  { %v2309_v48 = vmul.f32 %v2273_v16, %v9056_v25  ;;  %v3557_v6 = vmul.f32 %v3517_v14, %v9046_v0 }
 0x346   :  { %2352 = vrot.lane.b32.xlu1 %v2309_v48, %s8762_s27  ;;  %3596 = vrot.lane.b32.xlu0 %v3557_v6, %s8762_s27 }
 0x347   :  { %v3525_v51 = vpop.permute.xlu1 %3524  ;;  %v2275_v13 = vpop.permute.xlu0 %2274 }
 0x348   :  { %v3561_v44 = vmul.f32 %v3525_v51, %v9056_v25  ;;  %v2310_v47 = vmul.f32 %v2275_v13, %v9068_v45 }
 0x34a   :  { %3604 = vrot.lane.b32.xlu1 %v3561_v44, %s8762_s27  ;;  %2354 = vrot.lane.b32.xlu0 %v2310_v47, %s8762_s27 }
 0x34b   :  { %v3529_v2 = vpop.permute.xlu1 %3528  ;;  %v2277_v12 = vpop.permute.xlu0 %2276 }
 0x34c   :  { %v3563_v16 = vmul.f32 %v3529_v2, %v9071_v46  ;;  %v2311_v14 = vmul.f32 %v2277_v12, %v9071_v46 }
 0x34e   :  { %3608 = vrot.lane.b32.xlu1 %v3563_v16, %s8762_s27  ;;  %2356 = vrot.lane.b32.xlu0 %v2311_v14, %s8762_s27 }
 0x34f   :  { %v3531_v48 = vpop.permute.xlu1 %3530  ;;  %v2279_v6 = vpop.permute.xlu0 %2278 }
 0x350   :  { %v3564_v51 = vmul.f32 %v3531_v48, %v9078_v54  ;;  %v2312_v13 = vmul.f32 %v2279_v6, %v9078_v54 }
 0x352   :  { %3610 = vrot.lane.b32.xlu1 %v3564_v51, %s8762_s27  ;;  %2358 = vrot.lane.b32.xlu0 %v2312_v13, %s8762_s27 }
 0x353   :  { %v3533_v44 = vpop.permute.xlu1 %3532  ;;  %v2281_v47 = vpop.permute.xlu0 %2280 }
 0x354   :  { %v3565_v2 = vmul.f32 %v3533_v44, %v9081_v57  ;;  %v2313_v12 = vmul.f32 %v2281_v47, %v9081_v57 }
 0x356   :  { %3612 = vrot.lane.b32.xlu1 %v3565_v2, %s8762_s27  ;;  %2360 = vrot.lane.b32.xlu0 %v2313_v12, %s8762_s27 }
 0x38c   :  { %v2333_v16 = vpop.permute.xlu1 %2332  ;;  %v2331_v14 = vpop.permute.xlu0 %2330 }
 0x38d   :  { %v2381_v48 = vsel %vm548_vm9, %v2333_v16, 0.0  ;;  %v2378_v6 = vsel %vm548_vm9, %v2331_v14, 0.0 }
 0x38e   :  { %2382 = vadd.xlane.f32.xlu1 %v2381_v48  ;;  %2379 = vadd.xlane.f32.xlu0 %v2378_v6 }
 0x390   :  { %v3585_v51 = vpop.permute.xlu1 %3584  ;;  %v3583_v13 = vpop.permute.xlu0 %3582 }
 0x391   :  { %v3630_v37 = vsel %vm548_vm9, %v3583_v13, 0.0  ;;  %v3633_v47 = vsel %vm548_vm9, %v3585_v51, 0.0 }
 0x392   :  { %3631 = vadd.xlane.f32.xlu0 %v3630_v37 }
 0x394   :  { %v3587_v44 = vpop.permute.xlu1 %3586  ;;  %v2335_v41 = vpop.permute.xlu0 %2334 }
 0x395   :  { %v2384_v2 = vsel %vm548_vm9, %v2335_v41, 0.0  ;;  %v3636_v16 = vsel %vm548_vm9, %v3587_v44, 0.0 }
 0x396   :  { %3634 = vadd.xlane.f32.xlu0 %v3633_v47  ;;  %2385 = vadd.xlane.f32.xlu1 %v2384_v2 }
 0x398   :  { %v3591_v12 = vpop.permute.xlu1 %3590  ;;  %v2339_v11 = vpop.permute.xlu0 %2338 }
 0x399   :  { %v2390_v14 = vsel %vm548_vm9, %v2339_v11, 0.0  ;;  %v3642_v37 = vsel %vm548_vm9, %v3591_v12, 0.0 }
 0x39a   :  { %3637 = vadd.xlane.f32.xlu0 %v3636_v16  ;;  %2391 = vadd.xlane.f32.xlu1 %v2390_v14 }
 0x39c   :  { %v3589_v48 = vpop.permute.xlu1 %3588  ;;  %v2337_v6 = vpop.permute.xlu0 %2336 }
 0x39d   :  { %v2387_v13 = vsel %vm548_vm9, %v2337_v6, 0.0  ;;  %v3639_v47 = vsel %vm548_vm9, %v3589_v48, 0.0 }
 0x39e   :  { %3643 = vadd.xlane.f32.xlu0 %v3642_v37  ;;  %2388 = vadd.xlane.f32.xlu1 %v2387_v13 }
 0x3a0   :  { %v2347_v51 = vpop.permute.xlu1 %2346  ;;  %v2341_v41 = vpop.permute.xlu0 %2340 }
 0x3a1   :  { %v2393_v2 = vsel %vm548_vm9, %v2341_v41, 0.0  ;;  %v2402_v16 = vsel %vm548_vm9, %v2347_v51, 0.0 }
 0x3a2   :  { %3640 = vadd.xlane.f32.xlu0 %v3639_v47  ;;  %2394 = vadd.xlane.f32.xlu1 %v2393_v2 }
 0x3a4   :  { %v3593_v44 = vpop.permute.xlu1 %3592  ;;  %v3599_v11 = vpop.permute.xlu0 %3598 }
 0x3a5   :  { %v3654_v14 = vsel %vm548_vm9, %v3599_v11, 0.0  ;;  %v3645_v37 = vsel %vm548_vm9, %v3593_v44, 0.0 }
 0x3a6   :  { %2403 = vadd.xlane.f32.xlu0 %v2402_v16  ;;  %3655 = vadd.xlane.f32.xlu1 %v3654_v14 }
 0x3a8   :  { %v3601_v12 = vpop.permute.xlu1 %3600  ;;  %v2343_v6 = vpop.permute.xlu0 %2342 }
 0x3a9   :  { %v2396_v13 = vsel %vm548_vm9, %v2343_v6, 0.0  ;;  %v3657_v51 = vsel %vm548_vm9, %v3601_v12, 0.0 }
 0x3aa   :  { %3646 = vadd.xlane.f32.xlu0 %v3645_v37  ;;  %2397 = vadd.xlane.f32.xlu1 %v2396_v13 }
 0x3ac   :  { %v2351_v48 = vpop.permute.xlu1 %2350  ;;  %v3595_v41 = vpop.permute.xlu0 %3594 }
 0x3ad   :  { %v3648_v47 = vsel %vm548_vm9, %v3595_v41, 0.0  ;;  %v2408_v44 = vsel %vm548_vm9, %v2351_v48, 0.0 }
 0x3ae   :  { %3649 = vadd.xlane.f32.xlu0 %v3648_v47 }
 0x3b0   :  { %v3603_v2 = vpop.permute.xlu1 %3602  ;;  %v2349_v61 = vpop.permute.xlu0 %2348 }
 0x3b1   :  { %v2405_v11 = vsel %vm548_vm9, %v2349_v61, 0.0  ;;  %v3660_v41 = vsel %vm548_vm9, %v3603_v2, 0.0 }
 0x3b2   :  { %3658 = vadd.xlane.f32.xlu0 %v3657_v51  ;;  %2406 = vadd.xlane.f32.xlu1 %v2405_v11 }
 0x3b4   :  { %v3607_v16 = vpop.permute.xlu1 %3606  ;;  %v2345_v14 = vpop.permute.xlu0 %2344 }
 0x3b5   :  { %v2399_v6 = vsel %vm548_vm9, %v2345_v14, 0.0  ;;  %v3666_v48 = vsel %vm548_vm9, %v3607_v16, 0.0 }
 0x3b6   :  { %2409 = vadd.xlane.f32.xlu0 %v2408_v44  ;;  %2400 = vadd.xlane.f32.xlu1 %v2399_v6 }
 0x3b8   :  { %v2353_v37 = vpop.permute.xlu1 %2352  ;;  %v3597_v13 = vpop.permute.xlu0 %3596 }
 0x3b9   :  { %v3651_v12 = vsel %vm548_vm9, %v3597_v13, 0.0  ;;  %v2411_v44 = vsel %vm548_vm9, %v2353_v37, 0.0 }
 0x3ba   :  { %3661 = vadd.xlane.f32.xlu0 %v3660_v41 }
 0x3bc   :  { %v3605_v47 = vpop.permute.xlu1 %3604  ;;  %v2355_v29 = vpop.permute.xlu0 %2354 }
 0x3bd   :  { %v2414_v61 = vsel %vm548_vm9, %v2355_v29, 0.0  ;;  %v3663_v13 = vsel %vm548_vm9, %v3605_v47, 0.0  ;;  %v2439_v47 = vrot.slane %v9421_v19, %v9253_v58 }
 0x3be   :  { %3652 = vadd.xlane.f32.xlu0 %v3651_v12  ;;  %2415 = vadd.xlane.f32.xlu1 %v2414_v61 }
 0x3c0   :  { %v3609_v51 = vpop.permute.xlu1 %3608  ;;  %v2357_v41 = vpop.permute.xlu0 %2356 }
 0x3c1   :  { %v2417_v29 = vsel %vm548_vm9, %v2357_v41, 0.0  ;;  %v3669_v12 = vsel %vm548_vm9, %v3609_v51, 0.0  ;;  %v3687_v41 = vrot.slane %v9423_v42, %v9263_v33 }
 0x3c2   :  { %3667 = vadd.xlane.f32.xlu1 %v3666_v48 }
 0x3c4   :  { %v3611_v11 = vpop.permute.xlu1 %3610  ;;  %v2359_v16 = vpop.permute.xlu0 %2358 }
 0x3c5   :  { %v3672_v14 = vsel %vm548_vm9, %v3611_v11, 0.0  ;;  %v2420_v61 = vsel %vm548_vm9, %v2359_v16, 0.0  ;;  %v2435_v11 = vrot.slane %v9421_v19, %v9263_v33  ;;  %v9532_v16 = vsub.s32 2, %v9250_v53 }
 0x3c6   :  { %3673 = vadd.xlane.f32.xlu0 %v3672_v14  ;;  %2412 = vadd.xlane.f32.xlu1 %v2411_v44 }
 0x3c7   :  { %12796 = vst [vmem:[#allocation42_spill] sm:$0xff] %v9532_v16 }
 0x3c8   :  { %v3613_v2 = vpop.permute.xlu1 %3612  ;;  %v2361_v37 = vpop.permute.xlu0 %2360 }
 0x3c9   :  { %v3675_v6 = vsel %vm548_vm9, %v3613_v2, 0.0  ;;  %v2423_v48 = vsel %vm548_vm9, %v2361_v37, 0.0  ;;  %v2443_v37 = vrot.slane %v9421_v19, %v9532_v16 }
 0x3ca   :  { %3676 = vadd.xlane.f32.xlu0 %v3675_v6  ;;  %3664 = vadd.xlane.f32.xlu1 %v3663_v13 }
 0x3ce   :  { %2418 = vadd.xlane.f32.xlu1 %v2417_v29 }
 0x3d2   :  { %3670 = vadd.xlane.f32.xlu1 %v3669_v12 }
 0x3d6   :  { %2421 = vadd.xlane.f32.xlu1 %v2420_v61 }
 0x3da   :  { %2424 = vadd.xlane.f32.xlu1 %v2423_v48  ;;  %v3691_v48 = vrot.slane %v9423_v42, %v9253_v58 }
 0x417   :  { %v2383_v14 = vpop.xlane.xlu1 %2382  ;;  %v2380_v44 = vpop.xlane.xlu0 %2379 }
 0x418   :  { %v2513_v2 = vadd.f32 %v2439_v47, %v2383_v14  ;;  %v2512_v6 = vadd.f32 %v2435_v11, %v2380_v44 }
 0x41a   :  { %v2529_v13 = vmul.f32 0.05, %v2513_v2  ;;  %v2528_v51 = vmul.f32 0.05, %v2512_v6 }
 0x41b   :  { %v3632_v29 = vpop.xlane.xlu0 %3631 }
 0x41c   :  { %v3764_v12 = vadd.f32 %v3687_v41, %v3632_v29  ;;  %2578 = vrot.lane.b32.xlu0 %v2529_v13, %s8770_s11  ;;  %2576 = vrot.lane.b32.xlu1 %v2528_v51, %s8770_s11  ;;  %v2451_v13 = vrot.slane %v9421_v19, %v9331_v38  ;;  %v3695_v51 = vrot.slane %v9423_v42, %v9532_v16 }
 0x41e   :  { %v3780_v61 = vmul.f32 0.05, %v3764_v12 }
 0x41f   :  { %v2386_v47 = vpop.xlane.xlu1 %2385  ;;  %v3635_v11 = vpop.xlane.xlu0 %3634 }
 0x420   :  { %v2514_v14 = vadd.f32 %v2443_v37, %v2386_v47  ;;  %v3765_v44 = vadd.f32 %v3691_v48, %v3635_v11  ;;  %3828 = vrot.lane.b32.xlu1 %v3780_v61, %s8770_s11  ;;  %v9548_v37 = vsub.s32 5, %v9250_v53  ;;  %v2447_v47 = vrot.slane %v9421_v19, %v9277_v5 }
 0x421   :  { %v3703_v11 = vrot.slane %v9423_v42, %v9331_v38 }
 0x422   :  { %v2530_v2 = vmul.f32 0.05, %v2514_v14  ;;  %v3781_v6 = vmul.f32 0.05, %v3765_v44 }
 0x423   :  { %v2392_v41 = vpop.xlane.xlu1 %2391  ;;  %v3638_v29 = vpop.xlane.xlu0 %3637 }
 0x424   :  { %v2516_v12 = vadd.f32 %v2451_v13, %v2392_v41  ;;  %v3766_v20 = vadd.f32 %v3695_v51, %v3638_v29  ;;  %2580 = vrot.lane.b32.xlu1 %v2530_v2, %s8770_s11  ;;  %3830 = vrot.lane.b32.xlu0 %v3781_v6, %s8770_s11  ;;  %v2455_v51 = vrot.slane %v9421_v19, %v9548_v37 }
 0x426   :  { %v2532_v61 = vmul.f32 0.05, %v2516_v12  ;;  %v3782_v48 = vmul.f32 0.05, %v3766_v20  ;;  %v3699_v20 = vrot.slane %v9423_v42, %v9277_v5 }
 0x427   :  { %v2389_v14 = vpop.xlane.xlu1 %2388  ;;  %v3644_v44 = vpop.xlane.xlu0 %3643 }
 0x428   :  { %v2515_v7 = vadd.f32 %v2447_v47, %v2389_v14  ;;  %v3768_v13 = vadd.f32 %v3703_v11, %v3644_v44  ;;  %2584 = vrot.lane.b32.xlu1 %v2532_v61, %s8770_s11  ;;  %3832 = vrot.lane.b32.xlu0 %v3782_v48, %s8770_s11  ;;  %v9563_v61 = vsub.s32 6, %v9250_v53  ;;  %v3719_v47 = vrot.slane %v9427_v1, %v9263_v33 }
 0x429   :  { %v2467_v11 = vrot.slane %v9425_v59, %v9263_v33 }
 0x42a   :  { %v2531_v2 = vmul.f32 0.05, %v2515_v7  ;;  %v3784_v6 = vmul.f32 0.05, %v3768_v13 }
 0x42b   :  { %v2395_v41 = vpop.xlane.xlu1 %2394  ;;  %v3641_v29 = vpop.xlane.xlu0 %3640 }
 0x42c   :  { %v2517_v12 = vadd.f32 %v2455_v51, %v2395_v41  ;;  %v3767_v8 = vadd.f32 %v3699_v20, %v3641_v29  ;;  %2582 = vrot.lane.b32.xlu1 %v2531_v2, %s8770_s11  ;;  %3836 = vrot.lane.b32.xlu0 %v3784_v6, %s8770_s11  ;;  %v2459_v20 = vrot.slane %v9421_v19, %v9563_v61 }
 0x42e   :  { %v2533_v48 = vmul.f32 0.05, %v2517_v12  ;;  %v3783_v7 = vmul.f32 0.05, %v3767_v8  ;;  %v3707_v8 = vrot.slane %v9423_v42, %v9548_v37 }
 0x42f   :  { %v3656_v14 = vpop.xlane.xlu1 %3655  ;;  %v2404_v44 = vpop.xlane.xlu0 %2403 }
 0x430   :  { %v3772_v13 = vadd.f32 %v3719_v47, %v3656_v14  ;;  %v2520_v51 = vadd.f32 %v2467_v11, %v2404_v44  ;;  %2586 = vrot.lane.b32.xlu1 %v2533_v48, %s8770_s11  ;;  %3834 = vrot.lane.b32.xlu0 %v3783_v7, %s8770_s11  ;;  %v3711_v7 = vrot.slane %v9423_v42, %v9563_v61 }
 0x432   :  { %v3788_v2 = vmul.f32 0.05, %v3772_v13  ;;  %v2536_v6 = vmul.f32 0.05, %v2520_v51  ;;  %v2471_v13 = vrot.slane %v9425_v59, %v9253_v58  ;;  %v3723_v51 = vrot.slane %v9427_v1, %v9253_v58 }
 0x433   :  { %v2398_v41 = vpop.xlane.xlu1 %2397  ;;  %v3647_v29 = vpop.xlane.xlu0 %3646 }
 0x434   :  { %v2518_v12 = vadd.f32 %v2459_v20, %v2398_v41  ;;  %v3769_v49 = vadd.f32 %v3707_v8, %v3647_v29  ;;  %3844 = vrot.lane.b32.xlu1 %v3788_v2, %s8770_s11  ;;  %2592 = vrot.lane.b32.xlu0 %v2536_v6, %s8770_s11  ;;  %v9586_v2 = vsub.s32 7, %v9250_v53 }
 0x436   :  { %v2534_v47 = vmul.f32 0.05, %v2518_v12  ;;  %v3785_v48 = vmul.f32 0.05, %v3769_v49  ;;  %v2463_v12 = vrot.slane %v9421_v19, %v9586_v2 }
 0x437   :  { %v3650_v11 = vpop.xlane.xlu0 %3649 }
 0x438   :  { %v3770_v14 = vadd.f32 %v3711_v7, %v3650_v11  ;;  %2588 = vrot.lane.b32.xlu1 %v2534_v47, %s8770_s11  ;;  %3838 = vrot.lane.b32.xlu0 %v3785_v48, %s8770_s11  ;;  %v2475_v47 = vrot.slane %v9425_v59, %v9532_v16 }
 0x43a   :  { %v3786_v44 = vmul.f32 0.05, %v3770_v14 }
 0x43b   :  { %v2407_v49 = vpop.xlane.xlu1 %2406  ;;  %v3659_v6 = vpop.xlane.xlu0 %3658 }
 0x43c   :  { %v2521_v20 = vadd.f32 %v2471_v13, %v2407_v49  ;;  %v3773_v8 = vadd.f32 %v3723_v51, %v3659_v6  ;;  %3840 = vrot.lane.b32.xlu1 %v3786_v44, %s8770_s11  ;;  %v3727_v44 = vrot.slane %v9427_v1, %v9532_v16 }
 0x43e   :  { %v2537_v41 = vmul.f32 0.05, %v2521_v20  ;;  %v3789_v29 = vmul.f32 0.05, %v3773_v8  ;;  %v3715_v20 = vrot.slane %v9423_v42, %v9586_v2  ;;  %v2479_v42 = vrot.slane %v9425_v59, %v9277_v5 }
 0x43f   :  { %v2401_v48 = vpop.xlane.xlu1 %2400  ;;  %v2410_v7 = vpop.xlane.xlu0 %2409 }
 0x440   :  { %v2519_v11 = vadd.f32 %v2463_v12, %v2401_v48  ;;  %v2522_v14 = vadd.f32 %v2475_v47, %v2410_v7  ;;  %2594 = vrot.lane.b32.xlu1 %v2537_v41, %s8770_s11  ;;  %3846 = vrot.lane.b32.xlu0 %v3789_v29, %s8770_s11  ;;  %v2483_v41 = vrot.slane %v9425_v59, %v9331_v38 }
 0x441   :  { %v3735_v7 = vrot.slane %v9427_v1, %v9331_v38 }
 0x442   :  { %v2535_v13 = vmul.f32 0.05, %v2519_v11  ;;  %v2538_v51 = vmul.f32 0.05, %v2522_v14 }
 0x443   :  { %v3662_v49 = vpop.xlane.xlu0 %3661 }
 0x444   :  { %v3774_v6 = vadd.f32 %v3727_v44, %v3662_v49  ;;  %2590 = vrot.lane.b32.xlu1 %v2535_v13, %s8770_s11  ;;  %2596 = vrot.lane.b32.xlu0 %v2538_v51, %s8770_s11 }
 0x446   :  { %v3790_v19 = vmul.f32 0.05, %v3774_v6 }
 0x447   :  { %v2416_v8 = vpop.xlane.xlu1 %2415  ;;  %v3653_v12 = vpop.xlane.xlu0 %3652 }
 0x448   :  { %v3771_v29 = vadd.f32 %v3715_v20, %v3653_v12  ;;  %3848 = vrot.lane.b32.xlu0 %v3790_v19, %s8770_s11  ;;  %v2524_v47 = vadd.f32 %v2483_v41, %v2416_v8  ;;  %v3731_v19 = vrot.slane %v9427_v1, %v9277_v5  ;;  %v2487_v41 = vrot.slane %v9425_v59, %v9548_v37 }
 0x44a   :  { %v3787_v48 = vmul.f32 0.05, %v3771_v29  ;;  %v2540_v13 = vmul.f32 0.05, %v2524_v47 }
 0x44b   :  { %v3668_v11 = vpop.xlane.xlu1 %3667 }
 0x44c   :  { %v3776_v14 = vadd.f32 %v3735_v7, %v3668_v11  ;;  %3842 = vrot.lane.b32.xlu1 %v3787_v48, %s8770_s11  ;;  %v3739_v11 = vrot.slane %v9427_v1, %v9548_v37 }
 0x44e   :  { %v3792_v51 = vmul.f32 0.05, %v3776_v14 }
 0x44f   :  { %v2413_v44 = vpop.xlane.xlu1 %2412  ;;  %v3674_v48 = vpop.xlane.xlu0 %3673 }
 0x450   :  { %v2523_v49 = vadd.f32 %v2479_v42, %v2413_v44  ;;  %3852 = vrot.lane.b32.xlu0 %v3792_v51, %s8770_s11  ;;  %2600 = vrot.lane.b32.xlu1 %v2540_v13, %s8770_s11  ;;  %v3743_v13 = vrot.slane %v9427_v1, %v9563_v61 }
 0x452   :  { %v2539_v6 = vmul.f32 0.05, %v2523_v49  ;;  %v3778_v42 = vadd.f32 %v3743_v13, %v3674_v48  ;;  %v2491_v49 = vrot.slane %v9425_v59, %v9563_v61  ;;  %v292_v13 = vrot.slane %v9407_v18, %v9263_v33 }
 0x453   :  { %v3665_v20 = vpop.xlane.xlu1 %3664 }
 0x454   :  { %v3775_v8 = vadd.f32 %v3731_v19, %v3665_v20  ;;  %2598 = vrot.lane.b32.xlu0 %v2539_v6, %s8770_s11  ;;  %v3677_v6 = vpop.xlane.xlu0 %3676  ;;  %v3747_v20 = vrot.slane %v9427_v1, %v9586_v2  ;;  %v288_v1 = vrot.slane %v9377_v21, %v9263_v33  ;;  %v296_v21 = vrot.slane %v9383_v35, %v9263_v33  ;;  %v8725_v35 = vld [vmem:[%s12467_s0 + $0x10] sm:$0xff] }
 0x456   :  { %v3791_v12 = vmul.f32 0.05, %v3775_v8  ;;  %vm367_vm15 = vcmp.lt.f32.partialorder %v8725_v35, %v296_v21 }
 0x457   :  { %v2419_v29 = vpop.xlane.xlu1 %2418 }
 0x458   :  { %v2525_v47 = vadd.f32 %v2487_v41, %v2419_v29  ;;  %3850 = vrot.lane.b32.xlu0 %v3791_v12, %s8770_s11  ;;  %v3794_v12 = vmul.f32 0.05, %v3778_v42  ;;  %v3779_v41 = vadd.f32 %v3747_v20, %v3677_v6  ;;  %v12797_v42 = vmov 0.0  }
 0x45a   :  { %v2541_v7 = vmul.f32 0.05, %v2525_v47  ;;  %v2495_v47 = vrot.slane %v9425_v59, %v9586_v2  ;;  %v8723_v59 = vld [vmem:[%s12467_s0] sm:$0xff] }
 0x45b   :  { %v3671_v14 = vpop.xlane.xlu1 %3670  ;;  %vm365_vm10 = vcmp.lt.f32.partialorder %v8723_v59, %v288_v1  ;;  %vm413_vm12 = vcmp.gt.f32.partialorder %v8723_v59, %v288_v1 }
 0x45c   :  { %v3777_v51 = vadd.f32 %v3739_v11, %v3671_v14  ;;  %2602 = vrot.lane.b32.xlu1 %v2541_v7, %s8770_s11  ;;  %v3795_v11 = vmul.f32 0.05, %v3779_v41 }
 0x45e   :  { %v3793_v44 = vmul.f32 0.05, %v3777_v51  ;;  %v8724_v51 = vld [vmem:[%s12467_s0 + $0x8] sm:$0xff] }
 0x45f   :  { %v2422_v19 = vpop.xlane.xlu1 %2421  ;;  %vm366_vm11 = vcmp.lt.f32.partialorder %v8724_v51, %v292_v13  ;;  %vm414_vm0 = vcmp.gt.f32.partialorder %v8724_v51, %v292_v13  ;;  %v8727_v51 = vld [vmem:[%s12467_s0 + $0x18] sm:$0xff] }
 0x460   :  { %v2526_v8 = vadd.f32 %v2491_v49, %v2422_v19  ;;  %3854 = vrot.lane.b32.xlu0 %v3793_v44, %s8770_s11  ;;  %v9644_v44 = vsel %vm365_vm10, 1.0, %v12797_v42  ;;  %v9649_v49 = vsel %vm366_vm11, 1.0, %v12797_v42  ;;  %v9654_v19 = vsel %vm413_vm12, 1.0, %v12797_v42 }
 0x461   :  { %vm2544_vm13 = vcmp.gt.f32.partialorder %v9644_v44, 0.0  ;;  %vm2545_vm14 = vcmp.gt.f32.partialorder %v9649_v49, 0.0  ;;  %vm3796_vm10 = vcmp.gt.f32.partialorder %v9654_v19, 0.0  ;;  %vm415_vm11 = vcmp.gt.f32.partialorder %v8725_v35, %v296_v21 }
 0x462   :  { %v2542_v29 = vmul.f32 0.05, %v2526_v8  ;;  %v9685_v1 = vsel %vm415_vm11, 1.0, %v12797_v42  ;;  %v308_v21 = vrot.slane %v9397_v3, %v9263_v33  ;;  %v8728_v3 = vld [vmem:[%s12467_s0 + $0x28] sm:$0xff] }
 0x463   :  { %v2425_v7 = vpop.xlane.xlu1 %2424  ;;  %vm3798_vm11 = vcmp.gt.f32.partialorder %v9685_v1, 0.0 }
 0x464   :  { %v2527_v48 = vadd.f32 %v2495_v47, %v2425_v7  ;;  %2604 = vrot.lane.b32.xlu1 %v2542_v29, %s8770_s11  ;;  %3856 = vrot.lane.b32.xlu0 %v3794_v12, %s8770_s11  ;;  %v304_v12 = vrot.slane %v9395_v10, %v9263_v33  ;;  %v9669_v29 = vsel %vm367_vm15, 1.0, %v12797_v42  ;;  %v300_v7 = vrot.slane %v9390_v62, %v9263_v33  ;;  %v8726_v10 = vld [vmem:[%s12467_s0 + $0x20] sm:$0xff] }
 0x466   :  { %v2543_v14 = vmul.f32 0.05, %v2527_v48  ;;  %vm369_vm12 = vcmp.lt.f32.partialorder %v8726_v10, %v304_v12  ;;  %v9680_v48 = vsel %vm414_vm0, 1.0, %v12797_v42  ;;  %vm368_vm15 = vcmp.lt.f32.partialorder %v8727_v51, %v300_v7 }
 0x467   :  { %v9688_v62 = vsel %vm369_vm12, 1.0, %v12797_v42  ;;  %vm417_vm0 = vcmp.gt.f32.partialorder %v8726_v10, %v304_v12  ;;  %v9704_v35 = vsel %vm368_vm15, 1.0, %v12797_v42  ;;  %vm416_vm12 = vcmp.gt.f32.partialorder %v8727_v51, %v300_v7 }
 0x468   :  { %2606 = vrot.lane.b32.xlu1 %v2543_v14, %s8770_s11  ;;  %3858 = vrot.lane.b32.xlu0 %v3795_v11, %s8770_s11  ;;  %12798 = vst [vmem:[#allocation43_spill] sm:$0xff] %v9688_v62  ;;  %12799 = vst [vmem:[#allocation44_spill] sm:$0xff] %v9704_v35  ;;  %v9723_v7 = vsel %vm416_vm12, 1.0, %v12797_v42 }
 0x469   :  { %12801 = vst [vmem:[#allocation46_spill] sm:$0xff] %v9723_v7 }
 0x48e   :  { %v2577_v18 = vpop.permute.xlu1 %2576  ;;  %v2579_v6 = vpop.permute.xlu0 %2578 }
 0x48f   :  { %v9656_v20 = vsel %vm2544_vm13, %v2577_v18, -1e+30  ;;  %v9658_v8 = vsel %vm2545_vm14, %v2579_v6, -1e+30  ;;  %vm2546_vm13 = vcmp.gt.f32.partialorder %v9669_v29, 0.0  ;;  %vm3797_vm14 = vcmp.gt.f32.partialorder %v9680_v48, 0.0 }
 0x490   :  { %2657 = vperm.xlu1 %8507, %v9656_v20   ;;  %2660 = vperm.xlu0 %8508, %v9658_v8  }
 0x492   :  { %v3829_v41 = vpop.permute.xlu1 %3828 }
 0x493   :  { %v9671_v47 = vsel %vm3796_vm10, %v3829_v41, -1e+30  ;;  %vm2548_vm10 = vcmp.gt.f32.partialorder %v9688_v62, 0.0  ;;  %v9707_v41 = vsel %vm417_vm0, 1.0, %v12797_v42 }
 0x494   :  { %3909 = vperm.xlu1 %8507, %v9671_v47   ;;  %12800 = vst [vmem:[#allocation45_spill] sm:$0xff] %v9707_v41  ;;  %vm3800_vm15 = vcmp.gt.f32.partialorder %v9707_v41, 0.0 }
 0x496   :  { %v2581_v11 = vpop.permute.xlu1 %2580  ;;  %v3831_v14 = vpop.permute.xlu0 %3830 }
 0x497   :  { %v9690_v13 = vsel %vm2546_vm13, %v2581_v11, -1e+30  ;;  %v9692_v59 = vsel %vm3797_vm14, %v3831_v14, -1e+30  ;;  %vm370_vm13 = vcmp.lt.f32.partialorder %v8728_v3, %v308_v21  ;;  %v320_v11 = vrot.slane %v9399_v23, %v9263_v33  ;;  %v8729_v23 = vld [vmem:[%s12467_s0 + $0x40] sm:$0xff] }
 0x498   :  { %2663 = vperm.xlu1 %8507, %v9690_v13   ;;  %3912 = vperm.xlu0 %8508, %v9692_v59   ;;  %vm2547_vm14 = vcmp.gt.f32.partialorder %v9704_v35, 0.0  ;;  %v9726_v51 = vsel %vm370_vm13, 1.0, %v12797_v42  ;;  %vm3799_vm13 = vcmp.gt.f32.partialorder %v9723_v7, 0.0 }
 0x499   :  { %vm373_vm0 = vcmp.lt.f32.partialorder %v8729_v23, %v320_v11  ;;  %vm2549_vm12 = vcmp.gt.f32.partialorder %v9726_v51, 0.0 }
 0x49a   :  { %v2585_v18 = vpop.permute.xlu1 %2584  ;;  %v3833_v6 = vpop.permute.xlu0 %3832  ;;  %v9742_v24 = vsel %vm373_vm0, 1.0, %v12797_v42 }
 0x49b   :  { %v9709_v12 = vsel %vm2548_vm10, %v2585_v18, -1e+30  ;;  %v9711_v10 = vsel %vm3798_vm11, %v3833_v6, -1e+30  ;;  %vm421_vm10 = vcmp.gt.f32.partialorder %v8729_v23, %v320_v11  ;;  %vm418_vm11 = vcmp.gt.f32.partialorder %v8728_v3, %v308_v21  ;;  %v8730_v21 = vld [vmem:[%s12467_s0 + $0x30] sm:$0xff] }
 0x49c   :  { %2669 = vperm.xlu1 %8507, %v9709_v12   ;;  %3915 = vperm.xlu0 %8508, %v9711_v10   ;;  %v9745_v57 = vsel %vm421_vm10, 1.0, %v12797_v42  ;;  %v9757_v3 = vsel %vm418_vm11, 1.0, %v12797_v42  ;;  %vm2552_vm0 = vcmp.gt.f32.partialorder %v9742_v24, 0.0  ;;  %vm419_vm10 = vcmp.gt.f32.partialorder %v8730_v21, %v312_v40 }
 0x49e   :  { %v2583_v14 = vpop.permute.xlu1 %2582  ;;  %v3837_v18 = vpop.permute.xlu0 %3836 }
 0x49f   :  { %v9728_v6 = vsel %vm2547_vm14, %v2583_v14, -1e+30  ;;  %v9730_v52 = vsel %vm3800_vm15, %v3837_v18, -1e+30  ;;  %vm371_vm14 = vcmp.lt.f32.partialorder %v8730_v21, %v312_v40  ;;  %vm3804_vm15 = vcmp.gt.f32.partialorder %v9745_v57, 0.0 }
 0x4a0   :  { %2666 = vperm.xlu1 %8507, %v9728_v6   ;;  %3921 = vperm.xlu0 %8508, %v9730_v52   ;;  %v9764_v54 = vsel %vm371_vm14, 1.0, %v12797_v42  ;;  %v328_v21 = vrot.slane %v9405_v15, %v9263_v33  ;;  %v8732_v15 = vld [vmem:[%s12467_s0 + $0x50] sm:$0xff] }
 0x4a1   :  { %12802 = vst [vmem:[#allocation47_spill] sm:$0xff] %v9764_v54  ;;  %vm2550_vm11 = vcmp.gt.f32.partialorder %v9764_v54, 0.0 }
 0x4a2   :  { %v2587_v14 = vpop.permute.xlu1 %2586  ;;  %v3835_v18 = vpop.permute.xlu0 %3834 }
 0x4a3   :  { %v9747_v11 = vsel %vm2549_vm12, %v2587_v14, -1e+30  ;;  %v9749_v4 = vsel %vm3799_vm13, %v3835_v18, -1e+30  ;;  %v324_v18 = vrot.slane %v9401_v26, %v9263_v33  ;;  %vm3801_vm12 = vcmp.gt.f32.partialorder %v9757_v3, 0.0  ;;  %v8731_v26 = vld [vmem:[%s12467_s0 + $0x48] sm:$0xff] }
 0x4a4   :  { %2672 = vperm.xlu1 %8507, %v9747_v11   ;;  %3918 = vperm.xlu0 %8508, %v9749_v4  }
 0x4a5   :  { %vm422_vm13 = vcmp.gt.f32.partialorder %v8731_v26, %v324_v18  ;;  %vm374_vm14 = vcmp.lt.f32.partialorder %v8731_v26, %v324_v18 }
 0x4a6   :  { %v3845_v23 = vpop.permute.xlu1 %3844  ;;  %v2593_v14 = vpop.permute.xlu0 %2592  ;;  %v9792_v0 = vsel %vm422_vm13, 1.0, %v12797_v42  ;;  %vm423_vm13 = vcmp.gt.f32.partialorder %v8732_v15, %v328_v21 }
 0x4a7   :  { %v9766_v46 = vsel %vm3804_vm15, %v3845_v23, -1e+30  ;;  %v9768_v25 = vsel %vm2552_vm0, %v2593_v14, -1e+30  ;;  %v9778_v23 = vsel %vm419_vm10, 1.0, %v12797_v42  ;;  %vm375_vm0 = vcmp.lt.f32.partialorder %v8732_v15, %v328_v21 }
 0x4a8   :  { %12803 = vst [vmem:[#allocation48_spill] sm:$0xff] %v9766_v46  ;;  %12804 = vst [vmem:[#allocation49_spill] sm:$0xff] %v9768_v25  ;;  %3933 = vperm.xlu1 %8507, %v9766_v46   ;;  %2681 = vperm.xlu0 %8508, %v9768_v25   ;;  %vm3802_vm15 = vcmp.gt.f32.partialorder %v9778_v23, 0.0  ;;  %vm372_vm10 = vcmp.lt.f32.partialorder %v8733_v31, %v316_v63  ;;  %v9823_v27 = vsel %vm423_vm13, 1.0, %v12797_v42 }
 0x4a9   :  { %12805 = vst [vmem:[#allocation50_spill] sm:$0xff] %v9778_v23  ;;  %v9812_v56 = vsel %vm372_vm10, 1.0, %v12797_v42  ;;  %12810 = vst [vmem:[#allocation55_spill] sm:$0xff] %v9823_v27  ;;  %v336_v21 = vrot.slane %v9413_v55, %v9263_v33  ;;  %vm3806_vm10 = vcmp.gt.f32.partialorder %v9823_v27, 0.0 }
 0x4aa   :  { %v2589_v45 = vpop.permute.xlu1 %2588  ;;  %v3839_v17 = vpop.permute.xlu0 %3838  ;;  %12807 = vst [vmem:[#allocation52_spill] sm:$0xff] %v9812_v56 }
 0x4ab   :  { %v9780_v14 = vsel %vm2550_vm11, %v2589_v45, -1e+30  ;;  %v9782_v40 = vsel %vm3801_vm12, %v3839_v17, -1e+30  ;;  %v9795_v17 = vsel %vm374_vm14, 1.0, %v12797_v42  ;;  %vm3805_vm12 = vcmp.gt.f32.partialorder %v9792_v0, 0.0 }
 0x4ac   :  { %2675 = vperm.xlu1 %8507, %v9780_v14   ;;  %3924 = vperm.xlu0 %8508, %v9782_v40   ;;  %vm2553_vm11 = vcmp.gt.f32.partialorder %v9795_v17, 0.0  ;;  %vm2551_vm14 = vcmp.gt.f32.partialorder %v9812_v56, 0.0 }
 0x4ae   :  { %v3841_v28 = vpop.permute.xlu1 %3840 }
 0x4af   :  { %v9797_v45 = vsel %vm3802_vm15, %v3841_v28, -1e+30  ;;  %v9809_v28 = vsel %vm375_vm0, 1.0, %v12797_v42  ;;  %vm420_vm0 = vcmp.gt.f32.partialorder %v8733_v31, %v316_v63 }
 0x4b0   :  { %3927 = vperm.xlu1 %8507, %v9797_v45   ;;  %12806 = vst [vmem:[#allocation51_spill] sm:$0xff] %v9809_v28  ;;  %vm2554_vm15 = vcmp.gt.f32.partialorder %v9809_v28, 0.0 }
 0x4b2   :  { %v2595_v18 = vpop.permute.xlu1 %2594  ;;  %v3847_v26 = vpop.permute.xlu0 %3846 }
 0x4b3   :  { %v9814_v50 = vsel %vm2553_vm11, %v2595_v18, -1e+30  ;;  %v9816_v43 = vsel %vm3805_vm12, %v3847_v26, -1e+30  ;;  %v9835_v26 = vsel %vm420_vm0, 1.0, %v12797_v42 }
 0x4b4   :  { %12808 = vst [vmem:[#allocation53_spill] sm:$0xff] %v9814_v50  ;;  %12809 = vst [vmem:[#allocation54_spill] sm:$0xff] %v9816_v43  ;;  %2684 = vperm.xlu1 %8507, %v9814_v50   ;;  %3936 = vperm.xlu0 %8508, %v9816_v43   ;;  %vm3803_vm13 = vcmp.gt.f32.partialorder %v9835_v26, 0.0 }
 0x4b5   :  { %12812 = vst [vmem:[#allocation57_spill] sm:$0xff] %v9835_v26 }
 0x4b6   :  { %v2591_v39 = vpop.permute.xlu1 %2590  ;;  %v2597_v36 = vpop.permute.xlu0 %2596 }
 0x4b7   :  { %v9825_v32 = vsel %vm2551_vm14, %v2591_v39, -1e+30  ;;  %v9827_v18 = vsel %vm2554_vm15, %v2597_v36, -1e+30  ;;  %v8734_v36 = vld [vmem:[%s12467_s0 + $0x60] sm:$0xff]  ;;  %v332_v39 = vrot.slane %v9411_v9, %v9263_v33 }
 0x4b8   :  { %12811 = vst [vmem:[#allocation56_spill] sm:$0xff] %v9827_v18  ;;  %2678 = vperm.xlu1 %8507, %v9825_v32   ;;  %2687 = vperm.xlu0 %8508, %v9827_v18   ;;  %vm377_vm11 = vcmp.lt.f32.partialorder %v8734_v36, %v336_v21  ;;  %vm425_vm12 = vcmp.gt.f32.partialorder %v8734_v36, %v336_v21  ;;  %v8735_v21 = vld [vmem:[%s12467_s0 + $0x58] sm:$0xff] }
 0x4b9   :  { %v9847_v55 = vsel %vm377_vm11, 1.0, %v12797_v42  ;;  %v9850_v31 = vsel %vm425_vm12, 1.0, %v12797_v42  ;;  %vm376_vm14 = vcmp.lt.f32.partialorder %v8735_v21, %v332_v39 }
 0x4ba   :  { %v3849_v15 = vpop.permute.xlu0 %3848  ;;  %12814 = vst [vmem:[#allocation59_spill] sm:$0xff] %v9847_v55  ;;  %12815 = vst [vmem:[#allocation60_spill] sm:$0xff] %v9850_v31  ;;  %vm2556_vm15 = vcmp.gt.f32.partialorder %v9847_v55, 0.0  ;;  %vm3808_vm0 = vcmp.gt.f32.partialorder %v9850_v31, 0.0  ;;  %v9869_v56 = vsel %vm376_vm14, 1.0, %v12797_v42 }
 0x4bb   :  { %v9837_v28 = vsel %vm3806_vm10, %v3849_v15, -1e+30  ;;  %12819 = vst [vmem:[#allocation64_spill] sm:$0xff] %v9869_v56  ;;  %vm424_vm10 = vcmp.gt.f32.partialorder %v8735_v21, %v332_v39  ;;  %vm2555_vm11 = vcmp.gt.f32.partialorder %v9869_v56, 0.0 }
 0x4bc   :  { %12813 = vst [vmem:[#allocation58_spill] sm:$0xff] %v9837_v28  ;;  %3939 = vperm.xlu0 %8508, %v9837_v28  }
 0x4be   :  { %v3843_v63 = vpop.permute.xlu1 %3842 }
 0x4bf   :  { %v9852_v15 = vsel %vm3803_vm13, %v3843_v63, -1e+30  ;;  %v340_v63 = vrot.slane %v9415_v60, %v9263_v33  ;;  %v9879_v60 = vsel %vm424_vm10, 1.0, %v12797_v42 }
 0x4c0   :  { %12816 = vst [vmem:[#allocation61_spill] sm:$0xff] %v9852_v15  ;;  %3930 = vperm.xlu1 %8507, %v9852_v15   ;;  %12821 = vst [vmem:[#allocation66_spill] sm:$0xff] %v9879_v60  ;;  %vm3807_vm13 = vcmp.gt.f32.partialorder %v9879_v60, 0.0  ;;  %v8737_v60 = vld [vmem:[%s12467_s0 + $0x70] sm:$0xff] }
 0x4c2   :  { %v2601_v9 = vpop.permute.xlu1 %2600  ;;  %v3853_v36 = vpop.permute.xlu0 %3852 }
 0x4c3   :  { %v9860_v27 = vsel %vm2556_vm15, %v2601_v9, -1e+30  ;;  %v9862_v26 = vsel %vm3808_vm0, %v3853_v36, -1e+30  ;;  %v8736_v9 = vld [vmem:[%s12467_s0 + $0x68] sm:$0xff] }
 0x4c4   :  { %12817 = vst [vmem:[#allocation62_spill] sm:$0xff] %v9860_v27  ;;  %12818 = vst [vmem:[#allocation63_spill] sm:$0xff] %v9862_v26  ;;  %2693 = vperm.xlu1 %8507, %v9860_v27   ;;  %3945 = vperm.xlu0 %8508, %v9862_v26   ;;  %vm378_vm12 = vcmp.lt.f32.partialorder %v8736_v9, %v340_v63  ;;  %vm426_vm14 = vcmp.gt.f32.partialorder %v8736_v9, %v340_v63 }
 0x4c5   :  { %v9883_v39 = vsel %vm378_vm12, 1.0, %v12797_v42  ;;  %v9892_v26 = vsel %vm426_vm14, 1.0, %v12797_v42 }
 0x4c6   :  { %v2599_v55 = vpop.permute.xlu0 %2598  ;;  %12822 = vst [vmem:[#allocation67_spill] sm:$0xff] %v9883_v39  ;;  %vm2557_vm15 = vcmp.gt.f32.partialorder %v9883_v39, 0.0  ;;  %12824 = vst [vmem:[#allocation69_spill] sm:$0xff] %v9892_v26 }
 0x4c7   :  { %v9872_v31 = vsel %vm2555_vm11, %v2599_v55, -1e+30  ;;  %v344_v55 = vrot.slane %v9417_v22, %v9263_v33  ;;  %v348_v22 = vrot.slane %v9419_v30, %v9263_v33  ;;  %vm3809_vm11 = vcmp.gt.f32.partialorder %v9892_v26, 0.0 }
 0x4c8   :  { %12820 = vst [vmem:[#allocation65_spill] sm:$0xff] %v9872_v31  ;;  %2690 = vperm.xlu0 %8508, %v9872_v31  }
 0x4c9   :  { %vm379_vm0 = vcmp.lt.f32.partialorder %v8737_v60, %v344_v55  ;;  %vm427_vm10 = vcmp.gt.f32.partialorder %v8737_v60, %v344_v55  ;;  %v8738_v60 = vld [vmem:[%s12467_s0 + $0x78] sm:$0xff]  ;;  %s8771_s0 = smov 5  }
 0x4ca   :  { %v3851_v36 = vpop.permute.xlu0 %3850  ;;  %v9904_v9 = vsel %vm379_vm0, 1.0, %v12797_v42  ;;  %vm380_vm12 = vcmp.lt.f32.partialorder %v8738_v60, %v348_v22 }
 0x4cb   :  { %v9885_v21 = vsel %vm3807_vm13, %v3851_v36, -1e+30  ;;  %12826 = vst [vmem:[#allocation71_spill] sm:$0xff] %v9904_v9  ;;  %vm428_vm13 = vcmp.gt.f32.partialorder %v8738_v60, %v348_v22  ;;  %vm2558_vm14 = vcmp.gt.f32.partialorder %v9904_v9, 0.0  ;;  %v9918_v26 = vsel %vm380_vm12, 1.0, %v12797_v42 }
 0x4cc   :  { %12823 = vst [vmem:[#allocation68_spill] sm:$0xff] %v9885_v21  ;;  %3942 = vperm.xlu0 %8508, %v9885_v21   ;;  %12829 = vst [vmem:[#allocation74_spill] sm:$0xff] %v9918_v26  ;;  %vm2559_vm0 = vcmp.gt.f32.partialorder %v9918_v26, 0.0  ;;  %vm3275_vm12 = vcmask 56328  }
 0x4ce   :  { %v2603_v56 = vpop.permute.xlu1 %2602 }
 0x4cf   :  { %v9894_v23 = vsel %vm2557_vm15, %v2603_v56, -1e+30  ;;  %v9907_v56 = vsel %vm427_vm10, 1.0, %v12797_v42 }
 0x4d0   :  { %12825 = vst [vmem:[#allocation70_spill] sm:$0xff] %v9894_v23  ;;  %2696 = vperm.xlu1 %8507, %v9894_v23   ;;  %12827 = vst [vmem:[#allocation72_spill] sm:$0xff] %v9907_v56  ;;  %vm3810_vm15 = vcmp.gt.f32.partialorder %v9907_v56, 0.0 }
 0x4d2   :  { %v3855_v63 = vpop.permute.xlu0 %3854 }
 0x4d3   :  { %v9909_v36 = vsel %vm3809_vm11, %v3855_v63, -1e+30  ;;  %v9921_v63 = vsel %vm428_vm13, 1.0, %v12797_v42  ;;  %v8519_v42 = vpack.i.bf16 %v9685_v1, %v9669_v29  ;;  %vm2784_vm11 = vcmask 64512  }
 0x4d4   :  { %12828 = vst [vmem:[#allocation73_spill] sm:$0xff] %v9909_v36  ;;  %3948 = vperm.xlu0 %8508, %v9909_v36   ;;  %12830 = vst [vmem:[#allocation75_spill] sm:$0xff] %v9921_v63  ;;  %vm3811_vm10 = vcmp.gt.f32.partialorder %v9921_v63, 0.0 }
 0x4d6   :  { %v2605_v30 = vpop.permute.xlu1 %2604  ;;  %v3857_v55 = vpop.permute.xlu0 %3856 }
 0x4d7   :  { %v9923_v39 = vsel %vm2558_vm14, %v2605_v30, -1e+30  ;;  %v9925_v21 = vsel %vm3810_vm15, %v3857_v55, -1e+30  ;;  %v8514_v30 = vpack.i.bf16 %v9680_v48, %v9654_v19  ;;  %v8509_v55 = vpack.i.bf16 %v9649_v49, %v9644_v44 }
 0x4d8   :  { %12831 = vst [vmem:[#allocation76_spill] sm:$0xff] %v9923_v39  ;;  %12832 = vst [vmem:[#allocation77_spill] sm:$0xff] %v9925_v21  ;;  %2699 = vperm.xlu1 %8507, %v9923_v39   ;;  %3951 = vperm.xlu0 %8508, %v9925_v21  }
 0x4da   :  { %v2607_v22 = vpop.permute.xlu1 %2606  ;;  %v3859_v60 = vpop.permute.xlu0 %3858 }
 0x4db   :  { %v9931_v56 = vsel %vm2559_vm0, %v2607_v22, -1e+30  ;;  %v9933_v9 = vsel %vm3811_vm10, %v3859_v60, -1e+30  ;;  %v8524_v22 = vpack.i.bf16 %v9723_v7, %v9704_v35  ;;  %v8529_v60 = vpack.i.bf16 %v9707_v41, %v9688_v62 }
 0x4dc   :  { %12833 = vst [vmem:[#allocation78_spill] sm:$0xff] %v9931_v56  ;;  %12834 = vst [vmem:[#allocation79_spill] sm:$0xff] %v9933_v9  ;;  %2702 = vperm.xlu1 %8507, %v9931_v56   ;;  %3954 = vperm.xlu0 %8508, %v9933_v9  }
 0x4e0   :  { %8510 = vperm.xlu1 %8507, %v8509_v55   ;;  %8515 = vperm.xlu0 %8508, %v8514_v30  }
 0x4e4   :  { %8520 = vperm.xlu1 %8507, %v8519_v42   ;;  %8525 = vperm.xlu0 %8508, %v8524_v22   ;;  %v9951_v42 = vsub.s32 %v8927_v34, %v9250_v53 }
 0x4e8   :  { %8530 = vperm.xlu1 %8507, %v8529_v60  }
 0x50b   :  { %v2658_v63 = vpop.permute.xlu1 %2657  ;;  %v2661_v26 = vpop.permute.xlu0 %2660 }
 0x50c   :  { %v2707_v60 = vrot.slane %v2658_v63, %v9951_v42  ;;  %v2711_v28 = vrot.slane %v2661_v26, %v9951_v42 }
 0x50e   :  { %v2768_v25 = vsel %vm510_vm2, %v2711_v28, %v2707_v60 }
 0x50f   :  { %v3910_v9 = vpop.permute.xlu1 %3909 }
 0x513   :  { %v2664_v21 = vpop.permute.xlu1 %2663  ;;  %v3913_v36 = vpop.permute.xlu0 %3912 }
 0x514   :  { %v2715_v46 = vrot.slane %v2664_v21, %v9951_v42  ;;  %v3963_v21 = vrot.slane %v3913_v36, %v9951_v42 }
 0x516   :  { %v2769_v62 = vsel %vm513_vm3, %v2715_v46, %v2768_v25  ;;  %v3959_v25 = vrot.slane %v3910_v9, %v9951_v42 }
 0x517   :  { %v2670_v56 = vpop.permute.xlu1 %2669  ;;  %v3916_v55 = vpop.permute.xlu0 %3915 }
 0x518   :  { %v2723_v63 = vrot.slane %v2670_v56, %v9951_v42  ;;  %v3967_v7 = vrot.slane %v3916_v55, %v9951_v42  ;;  %v4020_v56 = vsel %vm510_vm2, %v3963_v21, %v3959_v25 }
 0x51a   :  { %v4021_v55 = vsel %vm513_vm3, %v3967_v7, %v4020_v56 }
 0x51b   :  { %v2667_v30 = vpop.permute.xlu1 %2666  ;;  %v3922_v39 = vpop.permute.xlu0 %3921 }
 0x51c   :  { %v2719_v43 = vrot.slane %v2667_v30, %v9951_v42 }
 0x51e   :  { %v2770_v34 = vsel %vm516_vm4, %v2719_v43, %v2769_v62 }
 0x51f   :  { %v2673_v23 = vpop.permute.xlu1 %2672  ;;  %v3919_v31 = vpop.permute.xlu0 %3918  ;;  %v2771_v30 = vsel %vm519_vm5, %v2723_v63, %v2770_v34 }
 0x520   :  { %v2727_v53 = vrot.slane %v2673_v23, %v9951_v42  ;;  %v3971_v43 = vrot.slane %v3919_v31, %v9951_v42  ;;  %v3975_v31 = vrot.slane %v3922_v39, %v9951_v42 }
 0x522   :  { %v2772_v46 = vsel %vm522_vm6, %v2727_v53, %v2771_v30  ;;  %v4022_v60 = vsel %vm516_vm4, %v3971_v43, %v4021_v55 }
 0x523   :  { %v9947_v54 = vpop.permute.xlu1 %3933  ;;  %v2682_v27 = vpop.permute.xlu0 %2681  ;;  %v4023_v34 = vsel %vm519_vm5, %v3975_v31, %v4022_v60 }
 0x524   :  { %v2739_v60 = vrot.slane %v2682_v27, %v9951_v42 }
 0x527   :  { %v2676_v22 = vpop.permute.xlu1 %2675  ;;  %v3925_v18 = vpop.permute.xlu0 %3924 }
 0x528   :  { %v2731_v26 = vrot.slane %v2676_v22, %v9951_v42  ;;  %v3979_v9 = vrot.slane %v3925_v18, %v9951_v42 }
 0x52a   :  { %v2773_v28 = vsel %vm525_vm7, %v2731_v26, %v2772_v46  ;;  %v4024_v26 = vsel %vm522_vm6, %v3979_v9, %v4023_v34 }
 0x52b   :  { %v3928_v50 = vpop.permute.xlu1 %3927 }
 0x52f   :  { %v2685_v41 = vpop.permute.xlu1 %2684  ;;  %v3937_v35 = vpop.permute.xlu0 %3936 }
 0x533   :  { %v2679_v15 = vpop.permute.xlu1 %2678  ;;  %v2688_v23 = vpop.permute.xlu0 %2687 }
 0x534   :  { %v2735_v62 = vrot.slane %v2679_v15, %v9951_v42  ;;  %v3983_v15 = vrot.slane %v3928_v50, %v9951_v42  ;;  %v2743_v50 = vrot.slane %v2685_v41, %v9951_v42 }
 0x536   :  { %v2774_v36 = vsel %vm528_vm8, %v2735_v62, %v2773_v28  ;;  %v4025_v7 = vsel %vm525_vm7, %v3983_v15, %v4024_v26  ;;  %v3995_v62 = vrot.slane %v3937_v35, %v9951_v42  ;;  %v2747_v28 = vrot.slane %v2688_v23, %v9951_v42 }
 0x537   :  { %v2785_v22 = vsel %vm2784_vm11, %v2774_v36, -inf  ;;  %v3940_v53 = vpop.permute.xlu0 %3939  ;;  %v2775_v15 = vsel %vm510_vm2, %v2743_v50, %v2739_v60 }
 0x538   :  { %2786 = vmax.xlane.f32.xlu1 %v2785_v22  ;;  %v3999_v56 = vrot.slane %v3940_v53, %v9951_v42  ;;  %v3991_v22 = vrot.slane %v9947_v54, %v9951_v42  ;;  %v2776_v35 = vsel %vm513_vm3, %v2747_v28, %v2775_v15 }
 0x53a   :  { %v4027_v41 = vsel %vm510_vm2, %v3995_v62, %v3991_v22 }
 0x53b   :  { %v3931_v63 = vpop.permute.xlu1 %3930  ;;  %v4028_v23 = vsel %vm513_vm3, %v3999_v56, %v4027_v41 }
 0x53c   :  { %v3987_v21 = vrot.slane %v3931_v63, %v9951_v42 }
 0x53e   :  { %v4026_v30 = vsel %vm528_vm8, %v3987_v21, %v4025_v7 }
 0x53f   :  { %v3946_v25 = vpop.permute.xlu0 %3945  ;;  %v4036_v18 = vsel %vm2784_vm11, %v4026_v30, -inf  ;;  %v2694_v39 = vpop.permute.xlu1 %2693 }
 0x540   :  { %4037 = vmax.xlane.f32.xlu0 %v4036_v18  ;;  %v2755_v21 = vrot.slane %v2694_v39, %v9951_v42  ;;  %v4007_v7 = vrot.slane %v3946_v25, %v9951_v42 }
 0x543   :  { %v2691_v46 = vpop.permute.xlu0 %2690 }
 0x544   :  { %v2751_v9 = vrot.slane %v2691_v46, %v9951_v42 }
 0x546   :  { %v2777_v63 = vsel %vm516_vm4, %v2751_v9, %v2776_v35 }
 0x547   :  { %v3943_v43 = vpop.permute.xlu0 %3942  ;;  %v2778_v46 = vsel %vm519_vm5, %v2755_v21, %v2777_v63 }
 0x548   :  { %v4003_v31 = vrot.slane %v3943_v43, %v9951_v42 }
 0x54a   :  { %v4029_v54 = vsel %vm516_vm4, %v4003_v31, %v4028_v23 }
 0x54b   :  { %v2697_v36 = vpop.permute.xlu1 %2696  ;;  %v4030_v43 = vsel %vm519_vm5, %v4007_v7, %v4029_v54 }
 0x54c   :  { %v2759_v27 = vrot.slane %v2697_v36, %v9951_v42 }
 0x54e   :  { %v2779_v28 = vsel %vm522_vm6, %v2759_v27, %v2778_v46 }
 0x54f   :  { %v3949_v55 = vpop.permute.xlu0 %3948 }
 0x550   :  { %v4011_v26 = vrot.slane %v3949_v55, %v9951_v42 }
 0x552   :  { %v4031_v56 = vsel %vm522_vm6, %v4011_v26, %v4030_v43 }
 0x553   :  { %v2700_v34 = vpop.permute.xlu1 %2699  ;;  %v3952_v53 = vpop.permute.xlu0 %3951 }
 0x554   :  { %v2763_v30 = vrot.slane %v2700_v34, %v9951_v42  ;;  %v4015_v18 = vrot.slane %v3952_v53, %v9951_v42 }
 0x556   :  { %v2780_v25 = vsel %vm525_vm7, %v2763_v30, %v2779_v28  ;;  %v4032_v55 = vsel %vm525_vm7, %v4015_v18, %v4031_v56  ;;  %v8539_v56 = vpack.i.bf16 %v9757_v3, %v9795_v17 }
 0x557   :  { %v2703_v50 = vpop.permute.xlu1 %2702  ;;  %v3955_v62 = vpop.permute.xlu0 %3954 }
 0x558   :  { %v2767_v36 = vrot.slane %v2703_v50, %v9951_v42  ;;  %v4019_v39 = vrot.slane %v3955_v62, %v9951_v42 }
 0x55a   :  { %v2781_v22 = vsel %vm528_vm8, %v2767_v36, %v2780_v25  ;;  %v4033_v60 = vsel %vm528_vm8, %v4019_v39, %v4032_v55  ;;  %v8534_v36 = vpack.i.bf16 %v9742_v24, %v9726_v51  ;;  %v8544_v39 = vpack.i.bf16 %v9792_v0, %v9745_v57 }
 0x55b   :  { %v8511_v9 = vpop.permute.xlu1 %8510  ;;  %v8516_v31 = vpop.permute.xlu0 %8515  ;;  %v2788_v15 = vsel %vm2784_vm11, %v2781_v22, -inf  ;;  %v4039_v41 = vsel %vm2784_vm11, %v4033_v60, -inf }
 0x55c   :  { %v8513_v35 = vunpack.i.h.bf16 %v8511_v9  ;;  %v8512_v23 = vunpack.i.l.bf16 %v8511_v9  ;;  %v8518_v34 = vunpack.i.h.bf16 %v8516_v31  ;;  %v8517_v53 = vunpack.i.l.bf16 %v8516_v31  ;;  %2789 = vmax.xlane.f32.xlu0 %v2788_v15  ;;  %4040 = vmax.xlane.f32.xlu1 %v4039_v41 }
 0x55e   :  { %v3158_v63 = vrot.slane %v8513_v35, %v9951_v42  ;;  %v3154_v54 = vrot.slane %v8512_v23, %v9951_v42  ;;  %v4409_v27 = vrot.slane %v8518_v34, %v9951_v42  ;;  %v4405_v26 = vrot.slane %v8517_v53, %v9951_v42 }
 0x55f   :  { %v8521_v21 = vpop.permute.xlu1 %8520  ;;  %v10048_v15 = vpop.permute.xlu0 %8525 }
 0x560   :  { %v8523_v7 = vunpack.i.h.bf16 %v8521_v21  ;;  %v8522_v30 = vunpack.i.l.bf16 %v8521_v21  ;;  %v3215_v43 = vsel %vm510_vm2, %v3158_v63, %v3154_v54  ;;  %v4466_v50 = vsel %vm510_vm2, %v4409_v27, %v4405_v26 }
 0x562   :  { %v4413_v18 = vrot.slane %v8523_v7, %v9951_v42  ;;  %v3162_v46 = vrot.slane %v8522_v30, %v9951_v42 }
 0x563   :  { %v10038_v25 = vpop.permute.xlu1 %8530 }
 0x564   :  { %v10027_v62 = vsel %vm513_vm3, %v3162_v46, %v3215_v43  ;;  %v10030_v28 = vsel %vm513_vm3, %v4413_v18, %v4466_v50 }
 0x56d   :  { %8540 = vperm.xlu1 %8507, %v8539_v56  }
 0x572   :  { %8535 = vperm.xlu0 %8508, %v8534_v36  }
 0x576   :  { %8545 = vperm.xlu0 %8508, %v8544_v39  }
 0x5c1   :  { %v10040_v55 = vpop.xlane.xlu1 %2786 }
 0x5c2   :  { %v2796_v22 = vrot.slane %v10040_v55, %v9263_v33  ;;  %v2800_v60 = vrot.slane %v10040_v55, %v9253_v58  ;;  %v2804_v23 = vrot.slane %v10040_v55, %v9532_v16  ;;  %v2808_v54 = vrot.slane %v10040_v55, %v9277_v5 }
 0x5c3   :  { %v2812_v56 = vrot.slane %v10040_v55, %v9331_v38 }
 0x5c4   :  { %v2873_v9 = vsub.f32 %v9656_v20, %v2796_v22  ;;  %v2874_v31 = vsub.f32 %v9658_v8, %v2800_v60  ;;  %v2875_v27 = vsub.f32 %v9690_v13, %v2804_v23  ;;  %v2876_v36 = vsub.f32 %v9728_v6, %v2808_v54 }
 0x5c5   :  { %v2877_v39 = vsub.f32 %v9709_v12, %v2812_v56  ;;  %v2820_v6 = vrot.slane %v10040_v55, %v9563_v61  ;;  %v12836_v56 = vld [vmem:[#allocation46_spill] sm:$0xff] }
 0x5c6   :  { %v2889_v41 = vmul.f32 1.442695, %v2873_v9  ;;  %v2891_v35 = vmul.f32 1.442695, %v2874_v31  ;;  %v2893_v13 = vmul.f32 1.442695, %v2875_v27 }
 0x5c7   :  { %v2895_v22 = vmul.f32 1.442695, %v2876_v36 }
 0x5c8   :  { %8591 = vpow2.f32 %v2889_v41 }
 0x5c9   :  { %v10052_v34 = vpop.xlane.xlu0 %4037  ;;  %8593 = vpow2.f32 %v2891_v35 }
 0x5ca   :  { %v4047_v53 = vrot.slane %v10052_v34, %v9263_v33  ;;  %v4051_v63 = vrot.slane %v10052_v34, %v9253_v58  ;;  %v4055_v20 = vrot.slane %v10052_v34, %v9532_v16  ;;  %v4059_v8 = vrot.slane %v10052_v34, %v9277_v5 }
 0x5cb   :  { %v4063_v30 = vrot.slane %v10052_v34, %v9331_v38 }
 0x5cc   :  { %v4124_v26 = vsub.f32 %v9671_v47, %v4047_v53  ;;  %v4125_v21 = vsub.f32 %v9692_v59, %v4051_v63  ;;  %v4126_v7 = vsub.f32 %v9711_v10, %v4055_v20  ;;  %v4127_v18 = vsub.f32 %v9749_v4, %v4059_v8 }
 0x5cd   :  { %v4067_v47 = vrot.slane %v10052_v34, %v9548_v37  ;;  %v4128_v59 = vsub.f32 %v9730_v52, %v4063_v30  ;;  %v2816_v4 = vrot.slane %v10040_v55, %v9548_v37  ;;  %v2897_v53 = vmul.f32 1.442695, %v2877_v39 }
 0x5ce   :  { %v4142_v46 = vmul.f32 1.442695, %v4125_v21  ;;  %v4140_v43 = vmul.f32 1.442695, %v4124_v26  ;;  %v4144_v50 = vmul.f32 1.442695, %v4126_v7  ;;  %v2879_v63 = vsub.f32 %v9780_v14, %v2820_v6 }
 0x5cf   :  { %v4146_v10 = vmul.f32 1.442695, %v4127_v18  ;;  %v4129_v31 = vsub.f32 %v9782_v40, %v4067_v47  ;;  %v4148_v52 = vmul.f32 1.442695, %v4128_v59  ;;  %v2878_v35 = vsub.f32 %v9747_v11, %v2816_v4 }
 0x5d0   :  { %8595 = vpow2.f32 %v4142_v46  ;;  %v4071_v20 = vrot.slane %v10052_v34, %v9563_v61  ;;  %v2824_v11 = vrot.slane %v10040_v55, %v9586_v2  ;;  %v2901_v14 = vmul.f32 1.442695, %v2879_v63  ;;  %v12841_v63 = vld [vmem:[#allocation54_spill] sm:$0xff] }
 0x5d1   :  { %8597 = vpow2.f32 %v4140_v43  ;;  %v4150_v12 = vmul.f32 1.442695, %v4129_v31  ;;  %v2899_v40 = vmul.f32 1.442695, %v2878_v35  ;;  %v4075_v7 = vrot.slane %v10052_v34, %v9586_v2 }
 0x5d2   :  { %8599 = vpow2.f32 %v4144_v50  ;;  %v4130_v27 = vsub.f32 %v9797_v45, %v4071_v20  ;;  %v2880_v55 = vsub.f32 %v9825_v32, %v2824_v11  ;;  %v12843_v11 = vld [vmem:[#allocation56_spill] sm:$0xff] }
 0x5d3   :  { %8601 = vpow2.f32 %v2893_v13 }
 0x5d4   :  { %8603 = vpow2.f32 %v4146_v10  ;;  %v4152_v46 = vmul.f32 1.442695, %v4130_v27  ;;  %v2903_v32 = vmul.f32 1.442695, %v2880_v55  ;;  %v12844_v27 = vld [vmem:[#allocation48_spill] sm:$0xff] }
 0x5d5   :  { %v8592_v60 = vpop.eup %8591  ;;  %8605 = vpow2.f32 %v2895_v22 }
 0x5d6   :  { %v8594_v9 = vpop.eup %8593  ;;  %v2921_v41 = vmul.f32 %v8592_v60, %v9644_v44  ;;  %8607 = vpow2.f32 %v4148_v52  ;;  %v12838_v60 = vld [vmem:[#allocation45_spill] sm:$0xff] }
 0x5d7   :  { %v2922_v23 = vmul.f32 %v8594_v9, %v9649_v49  ;;  %8609 = vpow2.f32 %v2897_v53  ;;  %v12840_v53 = vld [vmem:[#allocation49_spill] sm:$0xff] }
 0x5d8   :  { %2954 = vperm.xlu0 %8508, %v2921_v41   ;;  %8611 = vpow2.f32 %v4150_v12  ;;  %v12839_v41 = vld [vmem:[#allocation43_spill] sm:$0xff] }
 0x5d9   :  { %2957 = vperm.xlu1 %8507, %v2922_v23   ;;  %8613 = vpow2.f32 %v2899_v40  ;;  %v8527_v23 = vunpack.i.l.bf16 %v10048_v15  ;;  %v12842_v40 = vld [vmem:[#allocation53_spill] sm:$0xff] }
 0x5da   :  { %8615 = vpow2.f32 %v2901_v14 }
 0x5db   :  { %8617 = vpow2.f32 %v4152_v46 }
 0x5dc   :  { %8619 = vpow2.f32 %v2903_v32 }
 0x5dd   :  { %v8596_v44 = vpop.eup %8595 }
 0x5de   :  { %v8598_v8 = vpop.eup %8597  ;;  %v4173_v49 = vmul.f32 %v8596_v44, %v9680_v48 }
 0x5df   :  { %v8600_v54 = vpop.eup %8599  ;;  %v4172_v26 = vmul.f32 %v8598_v8, %v9654_v19  ;;  %v12835_v19 = vld [vmem:[#allocation61_spill] sm:$0xff] }
 0x5e0   :  { %v8602_v21 = vpop.eup %8601  ;;  %4208 = vperm.xlu0 %8508, %v4173_v49   ;;  %v4174_v30 = vmul.f32 %v8600_v54, %v9685_v1  ;;  %v4131_v43 = vsub.f32 %v12835_v19, %v4075_v7  ;;  %v12837_v1 = vld [vmem:[#allocation44_spill] sm:$0xff] }
 0x5e1   :  { %4205 = vperm.xlu1 %8507, %v4172_v26   ;;  %v8604_v18 = vpop.eup %8603  ;;  %v2923_v48 = vmul.f32 %v8602_v21, %v9669_v29 }
 0x5e2   :  { %v8606_v45 = vpop.eup %8605  ;;  %v4175_v36 = vmul.f32 %v8604_v18, %v12836_v56  ;;  %v4154_v10 = vmul.f32 1.442695, %v4131_v43  ;;  %v3166_v18 = vrot.slane %v8527_v23, %v9951_v42 }
 0x5e3   :  { %v8608_v34 = vpop.eup %8607  ;;  %v2924_v47 = vmul.f32 %v8606_v45, %v12837_v1  ;;  %v12845_v45 = vld [vmem:[#allocation58_spill] sm:$0xff]  ;;  %v12847_v1 = vld [vmem:[#allocation47_spill] sm:$0xff] }
 0x5e4   :  { %4211 = vperm.xlu0 %8508, %v4174_v30   ;;  %v8610_v59 = vpop.eup %8609  ;;  %v4176_v6 = vmul.f32 %v8608_v34, %v12838_v60  ;;  %8621 = vpow2.f32 %v4154_v10  ;;  %v12848_v60 = vld [vmem:[#allocation65_spill] sm:$0xff] }
 0x5e5   :  { %2960 = vperm.xlu1 %8507, %v2923_v48   ;;  %v10100_v50 = vpop.xlane.xlu1 %4040  ;;  %v10103_v13 = vpop.xlane.xlu0 %2789  ;;  %v2925_v52 = vmul.f32 %v8610_v59, %v12839_v41 }
 0x5e6   :  { %v4083_v29 = vrot.slane %v10100_v50, %v9253_v58  ;;  %v2828_v4 = vrot.slane %v10103_v13, %v9263_v33  ;;  %v2832_v39 = vrot.slane %v10103_v13, %v9253_v58  ;;  %v2836_v22 = vrot.slane %v10103_v13, %v9532_v16  ;;  %v8612_v9 = vpop.eup %8611 }
 0x5e7   :  { %v4079_v31 = vrot.slane %v10100_v50, %v9263_v33  ;;  %v8614_v35 = vpop.eup %8613  ;;  %v8532_v58 = vunpack.i.l.bf16 %v10038_v25  ;;  %v4087_v33 = vrot.slane %v10100_v50, %v9532_v16  ;;  %v4177_v54 = vmul.f32 %v8612_v9, %v9757_v3 }
 0x5e8   :  { %4214 = vperm.xlu0 %8508, %v4175_v36   ;;  %v2881_v12 = vsub.f32 %v12840_v53, %v2828_v4  ;;  %v4133_v20 = vsub.f32 %v12841_v63, %v4083_v29  ;;  %v2882_v44 = vsub.f32 %v12842_v40, %v2832_v39  ;;  %v2883_v49 = vsub.f32 %v12843_v11, %v2836_v22  ;;  %v8616_v30 = vpop.eup %8615  ;;  %v12846_v36 = vld [vmem:[#allocation62_spill] sm:$0xff]  ;;  %v12853_v11 = vld [vmem:[#allocation52_spill] sm:$0xff] }
 0x5e9   :  { %2963 = vperm.xlu1 %8507, %v2924_v47   ;;  %v4132_v26 = vsub.f32 %v12844_v27, %v4079_v31  ;;  %v2844_v14 = vrot.slane %v10103_v13, %v9331_v38  ;;  %v2926_v21 = vmul.f32 %v8614_v35, %v9726_v51  ;;  %v3170_v48 = vrot.slane %v8532_v58, %v9951_v42  ;;  %v8618_v59 = vpop.eup %8617  ;;  %v12849_v31 = vld [vmem:[#allocation70_spill] sm:$0xff] }
 0x5ea   :  { %v2905_v7 = vmul.f32 1.442695, %v2881_v12  ;;  %v4158_v3 = vmul.f32 1.442695, %v4133_v20  ;;  %v2907_v46 = vmul.f32 1.442695, %v2882_v44  ;;  %v4134_v19 = vsub.f32 %v12845_v45, %v4087_v33  ;;  %v8620_v23 = vpop.eup %8619 }
 0x5eb   :  { %v2840_v43 = vrot.slane %v10103_v13, %v9277_v5  ;;  %v2848_v51 = vrot.slane %v10103_v13, %v9548_v37  ;;  %v2909_v56 = vmul.f32 1.442695, %v2883_v49  ;;  %v2885_v34 = vsub.f32 %v12846_v36, %v2844_v14  ;;  %v12851_v12 = vld [vmem:[#allocation68_spill] sm:$0xff]  ;;  %v12857_v45 = vld [vmem:[#allocation73_spill] sm:$0xff] }
 0x5ec   :  { %4217 = vperm.xlu0 %8508, %v4176_v6   ;;  %8623 = vpow2.f32 %v2905_v7  ;;  %v2927_v47 = vmul.f32 %v8616_v30, %v12847_v1  ;;  %v4156_v32 = vmul.f32 1.442695, %v4132_v26  ;;  %v3217_v29 = vsel %vm516_vm4, %v3166_v18, %v10027_v62  ;;  %v12852_v44 = vld [vmem:[#allocation76_spill] sm:$0xff]  ;;  %v12854_v26 = vld [vmem:[#allocation63_spill] sm:$0xff]  ;;  %v12856_v18 = vld [vmem:[#allocation57_spill] sm:$0xff] }
 0x5ed   :  { %2966 = vperm.xlu1 %8507, %v2925_v52   ;;  %v10123_v8 = vpop.permute.xlu0 %8535  ;;  %8625 = vpow2.f32 %v4158_v3  ;;  %v3218_v4 = vsel %vm519_vm5, %v3170_v48, %v3217_v29  ;;  %v4091_v39 = vrot.slane %v10100_v50, %v9277_v5  ;;  %v2852_v22 = vrot.slane %v10103_v13, %v9563_v61  ;;  %v12850_v52 = vld [vmem:[#allocation50_spill] sm:$0xff]  ;;  %v12859_v29 = vld [vmem:[#allocation51_spill] sm:$0xff] }
 0x5ee   :  { %v8537_v55 = vunpack.i.l.bf16 %v10123_v8  ;;  %8627 = vpow2.f32 %v2907_v46  ;;  %v2884_v6 = vsub.f32 %v12848_v60, %v2840_v43  ;;  %v4160_v9 = vmul.f32 1.442695, %v4134_v19 }
 0x5ef   :  { %8629 = vpow2.f32 %v2909_v56  ;;  %v2886_v41 = vsub.f32 %v12849_v31, %v2848_v51  ;;  %v4178_v62 = vmul.f32 %v8618_v59, %v12850_v52  ;;  %v2913_v35 = vmul.f32 1.442695, %v2885_v34  ;;  %v12862_v31 = vld [vmem:[#allocation59_spill] sm:$0xff] }
 0x5f0   :  { %4220 = vperm.xlu0 %8508, %v4177_v54   ;;  %v3174_v10 = vrot.slane %v8537_v55, %v9951_v42  ;;  %8631 = vpow2.f32 %v4156_v32  ;;  %v4095_v5 = vrot.slane %v10100_v50, %v9331_v38  ;;  %v4135_v58 = vsub.f32 %v12851_v12, %v4091_v39  ;;  %v12858_v32 = vld [vmem:[#allocation77_spill] sm:$0xff] }
 0x5f1   :  { %2969 = vperm.xlu1 %8507, %v2926_v21   ;;  %v2856_v63 = vrot.slane %v10103_v13, %v9586_v2  ;;  %8633 = vpow2.f32 %v4160_v9  ;;  %v2911_v20 = vmul.f32 1.442695, %v2884_v6  ;;  %v8622_v40 = vpop.eup %8621  ;;  %v2887_v33 = vsub.f32 %v12852_v44, %v2852_v22  ;;  %v12855_v21 = vld [vmem:[#allocation78_spill] sm:$0xff]  ;;  %v12861_v6 = vld [vmem:[#allocation55_spill] sm:$0xff] }
 0x5f2   :  { %v10155_v53 = vsel %vm522_vm6, %v3174_v10, %v3218_v4  ;;  %v2928_v49 = vmul.f32 %v8620_v23, %v12853_v11  ;;  %8635 = vpow2.f32 %v2913_v35  ;;  %v2915_v54 = vmul.f32 1.442695, %v2886_v41  ;;  %v12863_v35 = vld [vmem:[#allocation64_spill] sm:$0xff]  ;;  %v12864_v23 = vld [vmem:[#allocation67_spill] sm:$0xff] }
 0x5f3   :  { %v4099_v27 = vrot.slane %v10100_v50, %v9548_v37  ;;  %v4136_v14 = vsub.f32 %v12854_v26, %v4095_v5  ;;  %v2888_v7 = vsub.f32 %v12855_v21, %v2856_v63  ;;  %8637 = vpow2.f32 %v2911_v20  ;;  %v12865_v20 = vld [vmem:[#allocation66_spill] sm:$0xff]  ;;  %v12866_v44 = vld [vmem:[#allocation71_spill] sm:$0xff] }
 0x5f4   :  { %v4162_v13 = vmul.f32 1.442695, %v4135_v58  ;;  %v4179_v55 = vmul.f32 %v8622_v40, %v12856_v18  ;;  %8639 = vpow2.f32 %v2915_v54  ;;  %v2917_v48 = vmul.f32 1.442695, %v2887_v33  ;;  %v12867_v54 = vld [vmem:[#allocation60_spill] sm:$0xff] }
 0x5f5   :  { %2972 = vperm.xlu1 %8507, %v2927_v47   ;;  %v4103_v37 = vrot.slane %v10100_v50, %v9563_v61  ;;  %v4137_v19 = vsub.f32 %v12857_v45, %v4099_v27  ;;  %v4164_v43 = vmul.f32 1.442695, %v4136_v14  ;;  %v2919_v36 = vmul.f32 1.442695, %v2888_v7  ;;  %v12869_v7 = vld [vmem:[#allocation69_spill] sm:$0xff]  ;;  %v12871_v45 = vld [vmem:[#allocation75_spill] sm:$0xff] }
 0x5f6   :  { %8641 = vpow2.f32 %v4162_v13  ;;  %v4107_v47 = vrot.slane %v10100_v50, %v9586_v2  ;;  %v8549_v21 = vpack.i.bf16 %v12859_v29, %v12847_v1  ;;  %v8554_v1 = vpack.i.bf16 %v12861_v6, %v12850_v52  ;;  %v10210_v52 = vpop.permute.xlu0 %8545 }
 0x5f7   :  { %8643 = vpow2.f32 %v2917_v48  ;;  %v4138_v59 = vsub.f32 %v12858_v32, %v4103_v37  ;;  %v12870_v48 = vld [vmem:[#allocation72_spill] sm:$0xff]  ;;  %v8569_v37 = vpack.i.bf16 %v12867_v54, %v12862_v31 }
 0x5f8   :  { %8645 = vpow2.f32 %v4164_v43  ;;  %v8579_v43 = vpack.i.bf16 %v12870_v48, %v12866_v44 }
 0x5f9   :  { %4223 = vperm.xlu1 %8507, %v4178_v62   ;;  %v8624_v38 = vpop.eup %8623  ;;  %8647 = vpow2.f32 %v2919_v36  ;;  %v4168_v50 = vmul.f32 1.442695, %v4138_v59 }
 0x5fa   :  { %v2929_v30 = vmul.f32 %v8624_v38, %v9742_v24  ;;  %v8626_v3 = vpop.eup %8625  ;;  %v12868_v38 = vld [vmem:[#allocation74_spill] sm:$0xff] }
 0x5fb   :  { %v8628_v46 = vpop.eup %8627  ;;  %v4181_v56 = vmul.f32 %v8626_v3, %v9792_v0  ;;  %v4166_v0 = vmul.f32 1.442695, %v4137_v19 }
 0x5fc   :  { %2978 = vperm.xlu0 %8508, %v2929_v30   ;;  %v8630_v51 = vpop.eup %8629  ;;  %v2930_v24 = vmul.f32 %v8628_v46, %v9795_v17  ;;  %v12860_v17 = vld [vmem:[#allocation79_spill] sm:$0xff] }
 0x5fd   :  { %2975 = vperm.xlu1 %8507, %v2928_v49   ;;  %v8632_v34 = vpop.eup %8631  ;;  %v2931_v10 = vmul.f32 %v8630_v51, %v12859_v29  ;;  %v4139_v22 = vsub.f32 %v12860_v17, %v4107_v47  ;;  %8649 = vpow2.f32 %v4166_v0  ;;  %v8574_v51 = vpack.i.bf16 %v12869_v7, %v12864_v23 }
 0x5fe   :  { %v8634_v61 = vpop.eup %8633  ;;  %v4180_v4 = vmul.f32 %v8632_v34, %v9745_v57  ;;  %8651 = vpow2.f32 %v4168_v50 }
 0x5ff   :  { %v8636_v39 = vpop.eup %8635  ;;  %v4182_v9 = vmul.f32 %v8634_v61, %v12861_v6  ;;  %v4170_v12 = vmul.f32 1.442695, %v4139_v22 }
 0x600   :  { %4232 = vperm.xlu0 %8508, %v4181_v56   ;;  %v8638_v60 = vpop.eup %8637  ;;  %v2933_v2 = vmul.f32 %v8636_v39, %v12862_v31  ;;  %v8584_v56 = vpack.i.bf16 %v12871_v45, %v12868_v38 }
 0x601   :  { %4226 = vperm.xlu1 %8507, %v4179_v55   ;;  %v8640_v41 = vpop.eup %8639  ;;  %v2932_v57 = vmul.f32 %v8638_v60, %v12863_v35  ;;  %8653 = vpow2.f32 %v4170_v12  ;;  %v8559_v55 = vpack.i.bf16 %v12863_v35, %v12853_v11  ;;  %v8564_v11 = vpack.i.bf16 %v12865_v20, %v12856_v18 }
 0x602   :  { %v2934_v5 = vmul.f32 %v8640_v41, %v12864_v23 }
 0x603   :  { %v8642_v62 = vpop.eup %8641 }
 0x604   :  { %2984 = vperm.xlu0 %8508, %v2931_v10   ;;  %v8644_v58 = vpop.eup %8643  ;;  %v4183_v40 = vmul.f32 %v8642_v62, %v12865_v20 }
 0x605   :  { %2981 = vperm.xlu1 %8507, %v2930_v24   ;;  %v8646_v63 = vpop.eup %8645  ;;  %v2935_v33 = vmul.f32 %v8644_v58, %v12866_v44  ;;  %v10208_v24 = vpop.permute.xlu1 %8540 }
 0x606   :  { %v8648_v49 = vpop.eup %8647  ;;  %v4184_v27 = vmul.f32 %v8646_v63, %v12867_v54 }
 0x607   :  { %v2936_v26 = vmul.f32 %v8648_v49, %v12868_v38 }
 0x608   :  { %4235 = vperm.xlu0 %8508, %v4182_v9  }
 0x609   :  { %4229 = vperm.xlu1 %8507, %v4180_v4  }
 0x60a   :  { %v8650_v14 = vpop.eup %8649 }
 0x60b   :  { %v4185_v13 = vmul.f32 %v8650_v14, %v12869_v7  ;;  %v8652_v30 = vpop.eup %8651 }
 0x60c   :  { %2987 = vperm.xlu0 %8508, %v2932_v57   ;;  %v4186_v3 = vmul.f32 %v8652_v30, %v12870_v48 }
 0x60d   :  { %2990 = vperm.xlu1 %8507, %v2933_v2  }
 0x60e   :  { %v8654_v46 = vpop.eup %8653 }
 0x60f   :  { %v4187_v19 = vmul.f32 %v8654_v46, %v12871_v45 }
 0x610   :  { %4238 = vperm.xlu0 %8508, %v4183_v40  }
 0x611   :  { %2993 = vperm.xlu1 %8507, %v2934_v5  }
 0x614   :  { %4241 = vperm.xlu0 %8508, %v4184_v27  }
 0x615   :  { %2996 = vperm.xlu1 %8507, %v2935_v33  }
 0x618   :  { %4244 = vperm.xlu0 %8508, %v4185_v13  }
 0x619   :  { %2999 = vperm.xlu1 %8507, %v2936_v26  }
 0x61c   :  { %4247 = vperm.xlu0 %8508, %v4186_v3  }
 0x61d   :  { %8550 = vperm.xlu1 %8507, %v8549_v21  }
 0x620   :  { %4250 = vperm.xlu0 %8508, %v4187_v19  }
 0x621   :  { %8560 = vperm.xlu1 %8507, %v8559_v55  }
 0x624   :  { %8555 = vperm.xlu0 %8508, %v8554_v1  }
 0x625   :  { %8570 = vperm.xlu1 %8507, %v8569_v37  }
 0x628   :  { %8565 = vperm.xlu0 %8508, %v8564_v11  }
 0x629   :  { %8580 = vperm.xlu1 %8507, %v8579_v43  }
 0x62c   :  { %8575 = vperm.xlu0 %8508, %v8574_v51  }
 0x630   :  { %8585 = vperm.xlu0 %8508, %v8584_v56  }
 0x653   :  { %v10214_v34 = vpop.permute.xlu0 %2954 }
 0x654   :  { %v10212_v36 = vpop.permute.xlu1 %2957  ;;  %v3004_v22 = vrot.slane %v10214_v34, %v9951_v42 }
 0x655   :  { %v3008_v17 = vrot.slane %v10212_v36, %v9951_v42 }
 0x657   :  { %v3065_v2 = vsel %vm510_vm2, %v3008_v17, %v3004_v22 }
 0x65b   :  { %v10218_v18 = vpop.permute.xlu0 %4208 }
 0x65c   :  { %v10216_v47 = vpop.permute.xlu1 %4205  ;;  %v4259_v41 = vrot.slane %v10218_v18, %v9951_v42 }
 0x65d   :  { %v4255_v50 = vrot.slane %v10216_v47, %v9951_v42 }
 0x65f   :  { %v10224_v61 = vpop.permute.xlu0 %4211  ;;  %v4316_v33 = vsel %vm510_vm2, %v4259_v41, %v4255_v50 }
 0x660   :  { %v10220_v32 = vpop.permute.xlu1 %2960  ;;  %v4263_v57 = vrot.slane %v10224_v61, %v9951_v42 }
 0x661   :  { %v3012_v60 = vrot.slane %v10220_v32, %v9951_v42 }
 0x662   :  { %v4317_v27 = vsel %vm513_vm3, %v4263_v57, %v4316_v33 }
 0x663   :  { %v10228_v10 = vpop.permute.xlu0 %4214  ;;  %v3066_v35 = vsel %vm513_vm3, %v3012_v60, %v3065_v2 }
 0x664   :  { %v10222_v59 = vpop.permute.xlu1 %2963  ;;  %v4267_v58 = vrot.slane %v10228_v10, %v9951_v42 }
 0x665   :  { %v3016_v6 = vrot.slane %v10222_v59, %v9951_v42 }
 0x666   :  { %v4318_v14 = vsel %vm516_vm4, %v4267_v58, %v4317_v27 }
 0x667   :  { %v10234_v39 = vpop.permute.xlu0 %4217  ;;  %v3067_v12 = vsel %vm516_vm4, %v3016_v6, %v3066_v35  ;;  %v8528_v35 = vunpack.i.h.bf16 %v10048_v15  ;;  %v8533_v15 = vunpack.i.h.bf16 %v10038_v25 }
 0x668   :  { %v10226_v29 = vpop.permute.xlu1 %2966  ;;  %v4271_v40 = vrot.slane %v10234_v39, %v9951_v42 }
 0x669   :  { %v3020_v31 = vrot.slane %v10226_v29, %v9951_v42 }
 0x66a   :  { %v4319_v30 = vsel %vm519_vm5, %v4271_v40, %v4318_v14  ;;  %v4417_v40 = vrot.slane %v8528_v35, %v9951_v42 }
 0x66b   :  { %v10258_v23 = vpop.permute.xlu0 %4220  ;;  %v3068_v20 = vsel %vm519_vm5, %v3020_v31, %v3067_v12 }
 0x66c   :  { %v10230_v4 = vpop.permute.xlu1 %2969  ;;  %v4275_v54 = vrot.slane %v10258_v23, %v9951_v42 }
 0x66d   :  { %v3024_v62 = vrot.slane %v10230_v4, %v9951_v42 }
 0x66e   :  { %v4320_v48 = vsel %vm522_vm6, %v4275_v54, %v4319_v30 }
 0x66f   :  { %v3069_v49 = vsel %vm522_vm6, %v3024_v62, %v3068_v20 }
 0x670   :  { %v10232_v0 = vpop.permute.xlu1 %2972 }
 0x671   :  { %v3028_v5 = vrot.slane %v10232_v0, %v9951_v42 }
 0x673   :  { %v3070_v26 = vsel %vm525_vm7, %v3028_v5, %v3069_v49 }
 0x674   :  { %v10244_v9 = vpop.permute.xlu1 %4223 }
 0x675   :  { %v4279_v38 = vrot.slane %v10244_v9, %v9951_v42 }
 0x677   :  { %v10281_v21 = vpop.permute.xlu0 %2978  ;;  %v4321_v46 = vsel %vm525_vm7, %v4279_v38, %v4320_v48  ;;  %v8542_v48 = vunpack.i.l.bf16 %v10208_v24 }
 0x678   :  { %v10265_v63 = vpop.permute.xlu1 %2975  ;;  %v3036_v62 = vrot.slane %v10281_v21, %v9951_v42 }
 0x679   :  { %v3032_v44 = vrot.slane %v10265_v63, %v9951_v42 }
 0x67b   :  { %v3071_v13 = vsel %vm528_vm8, %v3032_v44, %v3070_v26  ;;  %v10292_v37 = vpop.permute.xlu0 %4232 }
 0x67c   :  { %v10283_v7 = vpop.permute.xlu1 %4226  ;;  %v3081_v3 = vsel %vm2784_vm11, %v3071_v13, 0.0  ;;  %v4468_v13 = vsel %vm516_vm4, %v4417_v40, %v10030_v28  ;;  %v8543_v40 = vunpack.i.h.bf16 %v10208_v24 }
 0x67d   :  { %v4283_v55 = vrot.slane %v10283_v7, %v9951_v42  ;;  %3082 = vadd.xlane.f32.xlu1 %v3081_v3  ;;  %v4291_v3 = vrot.slane %v10292_v37, %v9951_v42 }
 0x67f   :  { %v4322_v19 = vsel %vm528_vm8, %v4283_v55, %v4321_v46  ;;  %v10298_v43 = vpop.permute.xlu0 %2984  ;;  %v4421_v55 = vrot.slane %v8533_v15, %v9951_v42  ;;  %v3190_v15 = vrot.slane %v8542_v48, %v9951_v42 }
 0x680   :  { %v10294_v45 = vpop.permute.xlu1 %2981  ;;  %v4332_v1 = vsel %vm2784_vm11, %v4322_v19, 0.0  ;;  %v3044_v57 = vrot.slane %v10298_v43, %v9951_v42  ;;  %v8538_v19 = vunpack.i.h.bf16 %v10123_v8  ;;  %v8547_v8 = vunpack.i.l.bf16 %v10210_v52 }
 0x681   :  { %4333 = vadd.xlane.f32.xlu0 %v4332_v1  ;;  %v3040_v50 = vrot.slane %v10294_v45, %v9951_v42  ;;  %v8548_v1 = vunpack.i.h.bf16 %v10210_v52 }
 0x683   :  { %v10302_v51 = vpop.permute.xlu0 %4235  ;;  %v3072_v5 = vsel %vm510_vm2, %v3040_v50, %v3036_v62 }
 0x684   :  { %v10300_v11 = vpop.permute.xlu1 %4229  ;;  %v3073_v44 = vsel %vm513_vm3, %v3044_v57, %v3072_v5  ;;  %v4295_v50 = vrot.slane %v10302_v51, %v9951_v42 }
 0x685   :  { %v4287_v26 = vrot.slane %v10300_v11, %v9951_v42 }
 0x687   :  { %v10306_v17 = vpop.permute.xlu0 %2987  ;;  %v4323_v35 = vsel %vm510_vm2, %v4291_v3, %v4287_v26  ;;  %v3186_v26 = vrot.slane %v8538_v19, %v9951_v42 }
 0x688   :  { %v10304_v56 = vpop.permute.xlu1 %2990  ;;  %v3048_v12 = vrot.slane %v10306_v17, %v9951_v42  ;;  %v4324_v24 = vsel %vm513_vm3, %v4295_v50, %v4323_v35  ;;  %v4425_v35 = vrot.slane %v8543_v40, %v9951_v42 }
 0x689   :  { %v3052_v33 = vrot.slane %v10304_v56, %v9951_v42 }
 0x68a   :  { %v3074_v49 = vsel %vm516_vm4, %v3048_v12, %v3073_v44 }
 0x68b   :  { %v10310_v60 = vpop.permute.xlu0 %4238  ;;  %v3075_v25 = vsel %vm519_vm5, %v3052_v33, %v3074_v49 }
 0x68c   :  { %v10308_v22 = vpop.permute.xlu1 %2993  ;;  %v4299_v57 = vrot.slane %v10310_v60, %v9951_v42 }
 0x68d   :  { %v3056_v54 = vrot.slane %v10308_v22, %v9951_v42 }
 0x68f   :  { %v10314_v31 = vpop.permute.xlu0 %4241  ;;  %v3076_v46 = vsel %vm522_vm6, %v3056_v54, %v3075_v25 }
 0x690   :  { %v10312_v6 = vpop.permute.xlu1 %2996  ;;  %v4303_v44 = vrot.slane %v10314_v31, %v9951_v42 }
 0x691   :  { %v3060_v27 = vrot.slane %v10312_v6, %v9951_v42 }
 0x693   :  { %v10320_v41 = vpop.permute.xlu0 %4244  ;;  %v3077_v28 = vsel %vm525_vm7, %v3060_v27, %v3076_v46  ;;  %v4325_v46 = vsel %vm516_vm4, %v4299_v57, %v4324_v24 }
 0x694   :  { %v10316_v2 = vpop.permute.xlu1 %2999  ;;  %v4307_v49 = vrot.slane %v10320_v41, %v9951_v42  ;;  %v4326_v19 = vsel %vm519_vm5, %v4303_v44, %v4325_v46 }
 0x695   :  { %v3064_v14 = vrot.slane %v10316_v2, %v9951_v42 }
 0x697   :  { %v10330_v20 = vpop.permute.xlu0 %4247  ;;  %v3078_v12 = vsel %vm528_vm8, %v3064_v14, %v3077_v28  ;;  %v4441_v14 = vrot.slane %v8548_v1, %v9951_v42 }
 0x698   :  { %v8551_v58 = vpop.permute.xlu1 %8550  ;;  %v3084_v33 = vsel %vm2784_vm11, %v3078_v12, 0.0  ;;  %v4311_v52 = vrot.slane %v10330_v20, %v9951_v42  ;;  %v4437_v12 = vrot.slane %v8547_v8, %v9951_v42 }
 0x699   :  { %v8552_v5 = vunpack.i.l.bf16 %v8551_v58  ;;  %v8553_v54 = vunpack.i.h.bf16 %v8551_v58  ;;  %3085 = vadd.xlane.f32.xlu0 %v3084_v33  ;;  %v4327_v33 = vsel %vm522_vm6, %v4307_v49, %v4326_v19 }
 0x69a   :  { %v4473_v49 = vsel %vm510_vm2, %v4441_v14, %v4437_v12 }
 0x69b   :  { %v10342_v38 = vpop.permute.xlu0 %4250  ;;  %v3178_v48 = vrot.slane %v8552_v5, %v9951_v42  ;;  %v3194_v16 = vrot.slane %v8553_v54, %v9951_v42  ;;  %v4469_v5 = vsel %vm519_vm5, %v4421_v55, %v4468_v13 }
 0x69c   :  { %12872 = vst [vmem:[#allocation61_spill] sm:$0xff] %v10342_v38  ;;  %v8561_v30 = vpop.permute.xlu1 %8560  ;;  %v4315_v58 = vrot.slane %v10342_v38, %v9951_v42  ;;  %v4328_v38 = vsel %vm525_vm7, %v4311_v52, %v4327_v33 }
 0x69d   :  { %v8562_v27 = vunpack.i.l.bf16 %v8561_v30  ;;  %v8563_v28 = vunpack.i.h.bf16 %v8561_v30  ;;  %v3222_v30 = vsel %vm510_vm2, %v3190_v15, %v3186_v26  ;;  %v3220_v40 = vsel %vm525_vm7, %v3178_v48, %v10155_v53 }
 0x69e   :  { %v3223_v54 = vsel %vm513_vm3, %v3194_v16, %v3222_v30 }
 0x69f   :  { %v8556_v62 = vpop.permute.xlu0 %8555  ;;  %v3182_v1 = vrot.slane %v8562_v27, %v9951_v42  ;;  %v3198_v44 = vrot.slane %v8563_v28, %v9951_v42  ;;  %v4329_v27 = vsel %vm528_vm8, %v4315_v58, %v4328_v38  ;;  %v4470_v38 = vsel %vm522_vm6, %v4425_v35, %v4469_v5 }
 0x6a0   :  { %v8571_v25 = vpop.permute.xlu1 %8570  ;;  %v8558_v50 = vunpack.i.h.bf16 %v8556_v62  ;;  %v8557_v57 = vunpack.i.l.bf16 %v8556_v62  ;;  %v4335_v13 = vsel %vm2784_vm11, %v4329_v27, 0.0 }
 0x6a1   :  { %v8572_v24 = vunpack.i.l.bf16 %v8571_v25  ;;  %v8573_v46 = vunpack.i.h.bf16 %v8571_v25  ;;  %v3221_v55 = vsel %vm528_vm8, %v3182_v1, %v3220_v40  ;;  %4336 = vadd.xlane.f32.xlu1 %v4335_v13  ;;  %v3224_v58 = vsel %vm516_vm4, %v3198_v44, %v3223_v54 }
 0x6a2   :  { %v4445_v62 = vrot.slane %v8558_v50, %v9951_v42  ;;  %v4429_v26 = vrot.slane %v8557_v57, %v9951_v42  ;;  %v3231_v52 = vsel %vm2784_vm11, %v3221_v55, 0.0 }
 0x6a3   :  { %v8566_v3 = vpop.permute.xlu0 %8565  ;;  %v3202_v53 = vrot.slane %v8572_v24, %v9951_v42  ;;  %3232 = vadd.xlane.f32.xlu0 %v3231_v52  ;;  %v4453_v12 = vrot.slane %v8573_v46, %v9951_v42 }
 0x6a4   :  { %v8581_v15 = vpop.permute.xlu1 %8580  ;;  %v8568_v14 = vunpack.i.h.bf16 %v8566_v3  ;;  %v8567_v25 = vunpack.i.l.bf16 %v8566_v3  ;;  %v4474_v1 = vsel %vm513_vm3, %v4445_v62, %v4473_v49  ;;  %v4471_v3 = vsel %vm525_vm7, %v4429_v26, %v4470_v38 }
 0x6a5   :  { %v8582_v19 = vunpack.i.l.bf16 %v8581_v15  ;;  %v8583_v50 = vunpack.i.h.bf16 %v8581_v15  ;;  %v3225_v24 = vsel %vm519_vm5, %v3202_v53, %v3224_v58 }
 0x6a6   :  { %v4449_v33 = vrot.slane %v8568_v14, %v9951_v42  ;;  %v4433_v35 = vrot.slane %v8567_v25, %v9951_v42 }
 0x6a7   :  { %v8576_v8 = vpop.permute.xlu0 %8575  ;;  %v3210_v27 = vrot.slane %v8582_v19, %v9951_v42  ;;  %v4461_v13 = vrot.slane %v8583_v50, %v9951_v42 }
 0x6a8   :  { %v8578_v48 = vunpack.i.h.bf16 %v8576_v8  ;;  %v8577_v16 = vunpack.i.l.bf16 %v8576_v8  ;;  %v4475_v44 = vsel %vm516_vm4, %v4449_v33, %v4474_v1  ;;  %v4472_v8 = vsel %vm528_vm8, %v4433_v35, %v4471_v3  ;;  %v12875_v35 = vld [vmem:[#allocation8_spill] sm:$0xff] }
 0x6a9   :  { %v4482_v40 = vsel %vm2784_vm11, %v4472_v8, 0.0  ;;  %v4476_v15 = vsel %vm519_vm5, %v4453_v12, %v4475_v44 }
 0x6aa   :  { %v4457_v57 = vrot.slane %v8578_v48, %v9951_v42  ;;  %v3206_v5 = vrot.slane %v8577_v16, %v9951_v42  ;;  %4483 = vadd.xlane.f32.xlu1 %v4482_v40  ;;  %v12873_v48 = vld [vmem:[#allocation7_spill] sm:$0xff]  ;;  %v12876_v40 = vld [vmem:[#allocation9_spill] sm:$0xff] }
 0x6ab   :  { %v8586_v28 = vpop.permute.xlu0 %8585  ;;  %v4510_v50 = vmul.f32 %v10216_v47, %v12873_v48 }
 0x6ac   :  { %v8588_v30 = vunpack.i.h.bf16 %v8586_v28  ;;  %v8587_v46 = vunpack.i.l.bf16 %v8586_v28  ;;  %v3226_v62 = vsel %vm522_vm6, %v3206_v5, %v3225_v24  ;;  %v4477_v26 = vsel %vm522_vm6, %v4457_v57, %v4476_v15  ;;  %v12874_v28 = vld [vmem:[#allocation6_spill] sm:$0xff] }
 0x6ad   :  { %v3227_v54 = vsel %vm525_vm7, %v3210_v27, %v3226_v62  ;;  %v4478_v38 = vsel %vm525_vm7, %v4461_v13, %v4477_v26  ;;  %v3260_v58 = vmul.f32 %v10212_v36, %v12874_v28  ;;  %v4511_v1 = vmul.f32 %v10218_v18, %v12874_v28 }
 0x6ae   :  { %v4465_v49 = vrot.slane %v8588_v30, %v9951_v42  ;;  %v3214_v55 = vrot.slane %v8587_v46, %v9951_v42  ;;  %v3259_v42 = vmul.f32 %v10214_v34, %v12873_v48  ;;  %v3261_v57 = vmul.f32 %v10220_v32, %v12875_v35 }
 0x6af   :  { %v3283_v19 = vsel %vm3275_vm12, %v3260_v58, 0.0  ;;  %v4512_v34 = vmul.f32 %v10224_v61, %v12875_v35  ;;  %v4533_v36 = vsel %vm3275_vm12, %v4511_v1, 0.0  ;;  %v4526_v3 = vsel %vm3275_vm12, %v4510_v50, 0.0  ;;  %v12879_v50 = vld [vmem:[#allocation12_spill] sm:$0xff] }
 0x6b0   :  { %v3228_v52 = vsel %vm528_vm8, %v3214_v55, %v3227_v54  ;;  %v4479_v14 = vsel %vm528_vm8, %v4465_v49, %v4478_v38  ;;  %v3276_v12 = vsel %vm3275_vm12, %v3259_v42, 0.0  ;;  %v3284_v33 = vrot.slane %v3283_v19, 4 }
 0x6b1   :  { %v3234_v53 = vsel %vm2784_vm11, %v3228_v52, 0.0  ;;  %v4485_v25 = vsel %vm2784_vm11, %v4479_v14, 0.0  ;;  %v3277_v16 = vrot.slane %v3276_v12, 4  ;;  %v3290_v24 = vsel %vm3275_vm12, %v3261_v57, 0.0  ;;  %v12877_v14 = vld [vmem:[#allocation10_spill] sm:$0xff] }
 0x6b2   :  { %3235 = vadd.xlane.f32.xlu0 %v3234_v53  ;;  %4486 = vadd.xlane.f32.xlu1 %v4485_v25  ;;  %v3285_v30 = vadd.f32 %v3284_v33, %v3283_v19  ;;  %v4540_v18 = vsel %vm3275_vm12, %v4512_v34, 0.0  ;;  %v4534_v8 = vrot.slane %v4533_v36, 4  ;;  %v4527_v47 = vrot.slane %v4526_v3, 4 }
 0x6b3   :  { %v3278_v5 = vadd.f32 %v3277_v16, %v3276_v12  ;;  %v3291_v46 = vrot.slane %v3290_v24, 4  ;;  %v4541_v27 = vrot.slane %v4540_v18, 4  ;;  %v3262_v32 = vmul.f32 %v10222_v59, %v12876_v40 }
 0x6b4   :  { %v3286_v49 = vrot.slane %v3285_v30, 2  ;;  %v4535_v62 = vadd.f32 %v4534_v8, %v4533_v36  ;;  %v4528_v13 = vadd.f32 %v4527_v47, %v4526_v3  ;;  %v4513_v55 = vmul.f32 %v10228_v10, %v12876_v40  ;;  %v12878_v10 = vld [vmem:[#allocation11_spill] sm:$0xff]  ;;  %v12881_v47 = vld [vmem:[#allocation17_spill] sm:$0xff] }
 0x6b5   :  { %v3279_v44 = vrot.slane %v3278_v5, 2  ;;  %v3292_v15 = vadd.f32 %v3291_v46, %v3290_v24  ;;  %v4542_v54 = vadd.f32 %v4541_v27, %v4540_v18  ;;  %v3297_v26 = vsel %vm3275_vm12, %v3262_v32, 0.0 }
 0x6b6   :  { %v3287_v52 = vadd.f32 %v3286_v49, %v3285_v30  ;;  %v4536_v53 = vrot.slane %v4535_v62, 2  ;;  %v3263_v25 = vmul.f32 %v10226_v29, %v12877_v14  ;;  %v4529_v48 = vrot.slane %v4528_v13, 2 }
 0x6b7   :  { %v3280_v61 = vadd.f32 %v3279_v44, %v3278_v5  ;;  %v3298_v42 = vrot.slane %v3297_v26, 4  ;;  %v4547_v59 = vsel %vm3275_vm12, %v4513_v55, 0.0  ;;  %v4514_v28 = vmul.f32 %v10234_v39, %v12877_v14  ;;  %v12880_v44 = vld [vmem:[#allocation14_spill] sm:$0xff] }
 0x6b8   :  { %v3293_v58 = vrot.slane %v3292_v15, 2  ;;  %v4543_v12 = vrot.slane %v4542_v54, 2  ;;  %v3264_v19 = vmul.f32 %v10230_v4, %v12878_v10  ;;  %v4515_v16 = vmul.f32 %v10258_v23, %v12878_v10 }
 0x6b9   :  { %v3281_v38 = vrot.slane %v3280_v61, 1  ;;  %v3288_v1 = vrot.slane %v3287_v52, 1  ;;  %v3265_v33 = vmul.f32 %v10232_v0, %v12879_v50  ;;  %v4548_v35 = vrot.slane %v4547_v59, 4 }
 0x6ba   :  { %v3304_v57 = vsel %vm3275_vm12, %v3263_v25, 0.0  ;;  %v4516_v39 = vmul.f32 %v10244_v9, %v12879_v50  ;;  %v4530_v34 = vadd.f32 %v4529_v48, %v4528_v13  ;;  %v4537_v5 = vadd.f32 %v4536_v53, %v4535_v62 }
 0x6bb   :  { %v10463_v29 = vadd.f32 %v3281_v38, %v3280_v61  ;;  %v3299_v36 = vadd.f32 %v3298_v42, %v3297_v26  ;;  %v4554_v4 = vsel %vm3275_vm12, %v4514_v28, 0.0  ;;  %v3294_v3 = vadd.f32 %v3293_v58, %v3292_v15  ;;  %v12882_v28 = vld [vmem:[#allocation13_spill] sm:$0xff] }
 0x6bc   :  { %v4544_v30 = vadd.f32 %v4543_v12, %v4542_v54  ;;  %v3311_v23 = vsel %vm3275_vm12, %v3264_v19, 0.0  ;;  %v4561_v24 = vsel %vm3275_vm12, %v4515_v16, 0.0  ;;  %v3305_v0 = vrot.slane %v3304_v57, 4 }
 0x6bd   :  { %v3318_v18 = vsel %vm3275_vm12, %v3265_v33, 0.0  ;;  %v3266_v8 = vmul.f32 %v10265_v63, %v12880_v44  ;;  %v3267_v9 = vmul.f32 %v10281_v21, %v12881_v47  ;;  %v4549_v46 = vadd.f32 %v4548_v35, %v4547_v59 }
 0x6be   :  { %v4555_v27 = vrot.slane %v4554_v4, 4  ;;  %v4568_v40 = vsel %vm3275_vm12, %v4516_v39, 0.0  ;;  %v4517_v32 = vmul.f32 %v10283_v7, %v12880_v44  ;;  %v10479_v49 = vadd.f32 %v3288_v1, %v3287_v52 }
 0x6bf   :  { %v3300_v61 = vrot.slane %v3299_v36, 2  ;;  %v3312_v62 = vrot.slane %v3311_v23, 4  ;;  %v4562_v13 = vrot.slane %v4561_v24, 4  ;;  %v4531_v55 = vrot.slane %v4530_v34, 1 }
 0x6c0   :  { %v4538_v15 = vrot.slane %v4537_v5, 1  ;;  %v4545_v54 = vrot.slane %v4544_v30, 1  ;;  %v3319_v26 = vrot.slane %v3318_v18, 4  ;;  %v3306_v63 = vadd.f32 %v3305_v0, %v3304_v57 }
 0x6c1   :  { %v4569_v38 = vrot.slane %v4568_v40, 4  ;;  %v3325_v21 = vsel %vm3275_vm12, %v3266_v8, 0.0  ;;  %v3332_v53 = vsel %vm3275_vm12, %v3267_v9, 0.0  ;;  %v3295_v14 = vrot.slane %v3294_v3, 1 }
 0x6c2   :  { %v4550_v25 = vrot.slane %v4549_v46, 2  ;;  %v4556_v48 = vadd.f32 %v4555_v27, %v4554_v4  ;;  %v4575_v7 = vsel %vm3275_vm12, %v4517_v32, 0.0  ;;  %v3301_v52 = vadd.f32 %v3300_v61, %v3299_v36 }
 0x6c3   :  { %v3313_v42 = vadd.f32 %v3312_v62, %v3311_v23  ;;  %v4563_v59 = vadd.f32 %v4562_v13, %v4561_v24  ;;  %v4519_v58 = vmul.f32 %v10292_v37, %v12882_v28  ;;  %v10486_v12 = vadd.f32 %v4538_v15, %v4537_v5 }
 0x6c4   :  { %v3320_v10 = vadd.f32 %v3319_v26, %v3318_v18  ;;  %v3326_v19 = vrot.slane %v3325_v21, 4  ;;  %v3333_v16 = vrot.slane %v3332_v53, 4  ;;  %v10488_v1 = vadd.f32 %v4531_v55, %v4530_v34 }
 0x6c5   :  { %v3307_v50 = vrot.slane %v3306_v63, 2  ;;  %v4570_v33 = vadd.f32 %v4569_v38, %v4568_v40  ;;  %v4576_v35 = vrot.slane %v4575_v7, 4  ;;  %v10490_v57 = vadd.f32 %v3295_v14, %v3294_v3  ;;  %v12883_v3 = vld [vmem:[#allocation15_spill] sm:$0xff] }
 0x6c6   :  { %v10492_v39 = vadd.f32 %v4545_v54, %v4544_v30  ;;  %v4551_v36 = vadd.f32 %v4550_v25, %v4549_v46  ;;  %v4557_v4 = vrot.slane %v4556_v48, 2  ;;  %v3302_v23 = vrot.slane %v3301_v52, 1 }
 0x6c7   :  { %v3314_v24 = vrot.slane %v3313_v42, 2  ;;  %v4564_v0 = vrot.slane %v4563_v59, 2  ;;  %v4589_v37 = vsel %vm3275_vm12, %v4519_v58, 0.0  ;;  %v3321_v5 = vrot.slane %v3320_v10, 2 }
 0x6c8   :  { %v3327_v18 = vadd.f32 %v3326_v19, %v3325_v21  ;;  %v3334_v44 = vadd.f32 %v3333_v16, %v3332_v53  ;;  %v3268_v34 = vmul.f32 %v10294_v45, %v12882_v28  ;;  %v3308_v8 = vadd.f32 %v3307_v50, %v3306_v63 }
 0x6c9   :  { %v4571_v9 = vrot.slane %v4570_v33, 2  ;;  %v4577_v27 = vadd.f32 %v4576_v35, %v4575_v7  ;;  %v3269_v30 = vmul.f32 %v10298_v43, %v12883_v3  ;;  %v4552_v40 = vrot.slane %v4551_v36, 1 }
 0x6ca   :  { %v4558_v46 = vadd.f32 %v4557_v4, %v4556_v48  ;;  %v4590_v32 = vrot.slane %v4589_v37, 4  ;;  %v4518_v61 = vmul.f32 %v10300_v11, %v12881_v47  ;;  %v10501_v62 = vadd.f32 %v3302_v23, %v3301_v52  ;;  %v12884_v4 = vld [vmem:[#allocation18_spill] sm:$0xff] }
 0x6cb   :  { %v3315_v13 = vadd.f32 %v3314_v24, %v3313_v42  ;;  %v4565_v55 = vadd.f32 %v4564_v0, %v4563_v59  ;;  %v4520_v15 = vmul.f32 %v10302_v51, %v12883_v3  ;;  %v3322_v45 = vadd.f32 %v3321_v5, %v3320_v10  ;;  %v12885_v5 = vld [vmem:[#allocation16_spill] sm:$0xff] }
 0x6cc   :  { %v3328_v54 = vrot.slane %v3327_v18, 2  ;;  %v3335_v26 = vrot.slane %v3334_v44, 2  ;;  %v3339_v63 = vsel %vm3275_vm12, %v3268_v34, 0.0  ;;  %v3309_v38 = vrot.slane %v3308_v8, 1 }
 0x6cd   :  { %v4572_v43 = vadd.f32 %v4571_v9, %v4570_v33  ;;  %v4578_v21 = vrot.slane %v4577_v27, 2  ;;  %v3346_v53 = vsel %vm3275_vm12, %v3269_v30, 0.0  ;;  %v10507_v14 = vadd.f32 %v4552_v40, %v4551_v36 }
 0x6ce   :  { %v4559_v11 = vrot.slane %v4558_v46, 1  ;;  %v4591_v47 = vadd.f32 %v4590_v32, %v4589_v37  ;;  %v4582_v25 = vsel %vm3275_vm12, %v4518_v61, 0.0  ;;  %v3316_v48 = vrot.slane %v3315_v13, 1 }
 0x6cf   :  { %v4566_v7 = vrot.slane %v4565_v55, 1  ;;  %v3340_v52 = vrot.slane %v3339_v63, 4  ;;  %v4596_v51 = vsel %vm3275_vm12, %v4520_v15, 0.0  ;;  %v3323_v42 = vrot.slane %v3322_v45, 1 }
 0x6d0   :  { %v3329_v59 = vadd.f32 %v3328_v54, %v3327_v18  ;;  %v3336_v28 = vadd.f32 %v3335_v26, %v3334_v44  ;;  %v3347_v58 = vrot.slane %v3346_v53, 4  ;;  %v10511_v10 = vadd.f32 %v3309_v38, %v3308_v8 }
 0x6d1   :  { %v4573_v19 = vrot.slane %v4572_v43, 1  ;;  %v4579_v16 = vadd.f32 %v4578_v21, %v4577_v27  ;;  %v4583_v50 = vrot.slane %v4582_v25, 4  ;;  %v10513_v33 = vadd.f32 %v4559_v11, %v4558_v46  ;;  %v12886_v46 = vld [vmem:[#allocation19_spill] sm:$0xff] }
 0x6d2   :  { %v4592_v35 = vrot.slane %v4591_v47, 2  ;;  %v4597_v36 = vrot.slane %v4596_v51, 4  ;;  %v3271_v23 = vmul.f32 %v10304_v56, %v12884_v4  ;;  %v10517_v24 = vadd.f32 %v3316_v48, %v3315_v13 }
 0x6d3   :  { %v10519_v0 = vadd.f32 %v4566_v7, %v4565_v55  ;;  %v3341_v37 = vadd.f32 %v3340_v52, %v3339_v63  ;;  %v3270_v18 = vmul.f32 %v10306_v17, %v12885_v5  ;;  %v10523_v44 = vadd.f32 %v3323_v42, %v3322_v45  ;;  %v12887_v45 = vld [vmem:[#allocation20_spill] sm:$0xff] }
 0x6d4   :  { %v3330_v34 = vrot.slane %v3329_v59, 1  ;;  %v3337_v8 = vrot.slane %v3336_v28, 1  ;;  %v3348_v9 = vadd.f32 %v3347_v58, %v3346_v53  ;;  %v10525_v3 = vadd.f32 %v4573_v19, %v4572_v43  ;;  %v12888_v43 = vld [vmem:[#allocation21_spill] sm:$0xff] }
 0x6d5   :  { %v4580_v30 = vrot.slane %v4579_v16, 1  ;;  %v4584_v40 = vadd.f32 %v4583_v50, %v4582_v25  ;;  %v3272_v56 = vmul.f32 %v10308_v22, %v12886_v46  ;;  %v10529_v32 = vadd.f32 %v4592_v35, %v4591_v47 }
 0x6d6   :  { %v4598_v61 = vadd.f32 %v4597_v36, %v4596_v51  ;;  %v3360_v13 = vsel %vm3275_vm12, %v3271_v23, 0.0  ;;  %v4521_v17 = vmul.f32 %v10310_v60, %v12885_v5  ;;  %v3342_v55 = vrot.slane %v3341_v37, 2 }
 0x6d7   :  { %v3353_v15 = vsel %vm3275_vm12, %v3270_v18, 0.0  ;;  %v3273_v54 = vmul.f32 %v10312_v6, %v12887_v45  ;;  %v10539_v63 = vadd.f32 %v3330_v34, %v3329_v59  ;;  %v10541_v38 = vadd.f32 %v3337_v8, %v3336_v28 }
 0x6d8   :  { %v3349_v22 = vrot.slane %v3348_v9, 2  ;;  %v3274_v21 = vmul.f32 %v10316_v2, %v12888_v43  ;;  %v10545_v11 = vadd.f32 %v4580_v30, %v4579_v16  ;;  %v4585_v60 = vrot.slane %v4584_v40, 2 }
 0x6d9   :  { %v3361_v47 = vrot.slane %v3360_v13, 4  ;;  %v3367_v25 = vsel %vm3275_vm12, %v3272_v56, 0.0  ;;  %v4594_v48 = vrot.slane %v10529_v32, 1  ;;  %v4599_v6 = vrot.slane %v4598_v61, 2 }
 0x6da   :  { %v3354_v7 = vrot.slane %v3353_v15, 4  ;;  %v4603_v52 = vsel %vm3275_vm12, %v4521_v17, 0.0  ;;  %v10550_v51 = vadd.f32 %v3342_v55, %v3341_v37  ;;  %v3374_v42 = vsel %vm3275_vm12, %v3273_v54, 0.0 }
 0x6db   :  { %v10556_v28 = vadd.f32 %v3349_v22, %v3348_v9  ;;  %v3368_v58 = vrot.slane %v3367_v25, 4  ;;  %v3381_v19 = vsel %vm3275_vm12, %v3274_v21, 0.0  ;;  %v10560_v50 = vadd.f32 %v4585_v60, %v4584_v40 }
 0x6dc   :  { %v3362_v35 = vadd.f32 %v3361_v47, %v3360_v13  ;;  %v4604_v36 = vrot.slane %v4603_v52, 4  ;;  %v10563_v37 = vadd.f32 %v4599_v6, %v4598_v61  ;;  %v3355_v5 = vadd.f32 %v3354_v7, %v3353_v15 }
 0x6dd   :  { %v3375_v18 = vrot.slane %v3374_v42, 4  ;;  %v4522_v34 = vmul.f32 %v10314_v31, %v12884_v4  ;;  %v3382_v8 = vrot.slane %v3381_v19, 4  ;;  %v4523_v30 = vmul.f32 %v10320_v41, %v12886_v46 }
 0x6de   :  { %v3363_v56 = vrot.slane %v3362_v35, 2  ;;  %v4605_v61 = vadd.f32 %v4604_v36, %v4603_v52  ;;  %v3356_v17 = vrot.slane %v3355_v5, 2 }
 0x6df   :  { %v3376_v55 = vadd.f32 %v3375_v18, %v3374_v42  ;;  %v4610_v4 = vsel %vm3275_vm12, %v4522_v34, 0.0  ;;  %v3383_v15 = vadd.f32 %v3382_v8, %v3381_v19  ;;  %v4617_v54 = vsel %vm3275_vm12, %v4523_v30, 0.0 }
 0x6e0   :  { %v4606_v21 = vrot.slane %v4605_v61, 2  ;;  %v4618_v52 = vrot.slane %v4617_v54, 4  ;;  %v3344_v30 = vrot.slane %v10550_v51, 1 }
 0x6e1   :  { %v3377_v47 = vrot.slane %v3376_v55, 2  ;;  %v3384_v7 = vrot.slane %v3383_v15, 2 }
 0x6e3   :  { %v3378_v8 = vadd.f32 %v3377_v47, %v3376_v55 }
 0x706   :  { %v3083_v27 = vpop.xlane.xlu1 %3082 }
 0x707   :  { %v10537_v26 = vmax.f32 %v3083_v27, 1e-30  ;;  %v3369_v27 = vadd.f32 %v3368_v58, %v3367_v25  ;;  %v4611_v25 = vrot.slane %v4610_v4, 4  ;;  %v3357_v58 = vadd.f32 %v3356_v17, %v3355_v5 }
 0x709   :  { %v3392_v59 = vrot.slane %v10537_v26, 1  ;;  %v3393_v16 = vrot.slane %v10537_v26, 2  ;;  %v3394_v23 = vrot.slane %v10537_v26, 3  ;;  %8655 = vrcp.f32 %v10537_v26 }
 0x70a   :  { %v4334_v53 = vpop.xlane.xlu0 %4333  ;;  %v3395_v31 = vrot.slane %v10537_v26, 4  ;;  %v3396_v41 = vrot.slane %v10537_v26, 5  ;;  %v3370_v46 = vrot.slane %v3369_v27, 2  ;;  %v3397_v22 = vrot.slane %v10537_v26, 6 }
 0x70b   :  { %v10554_v2 = vmax.f32 %v4334_v53, 1e-30  ;;  %8657 = vrcp.f32 %v3392_v59  ;;  %v4524_v53 = vmul.f32 %v10330_v20, %v12887_v45  ;;  %v3398_v60 = vrot.slane %v10537_v26, 7 }
 0x70c   :  { %8659 = vrcp.f32 %v3393_v16  ;;  %v3364_v59 = vadd.f32 %v3363_v56, %v3362_v35  ;;  %v3371_v16 = vadd.f32 %v3370_v46, %v3369_v27  ;;  %v4607_v26 = vadd.f32 %v4606_v21, %v4605_v61 }
 0x70d   :  { %v4642_v9 = vrot.slane %v10554_v2, 1  ;;  %v4643_v40 = vrot.slane %v10554_v2, 2  ;;  %8661 = vrcp.f32 %v3394_v23  ;;  %v4644_v13 = vrot.slane %v10554_v2, 3  ;;  %v12889_v23 = vld [vmem:[#allocation61_spill] sm:$0xff] }
 0x70e   :  { %8663 = vrcp.f32 %v10554_v2  ;;  %v4645_v6 = vrot.slane %v10554_v2, 4  ;;  %v4646_v42 = vrot.slane %v10554_v2, 5  ;;  %v4647_v19 = vrot.slane %v10554_v2, 6 }
 0x70f   :  { %8665 = vrcp.f32 %v4642_v9  ;;  %v4624_v20 = vsel %vm3275_vm12, %v4524_v53, 0.0  ;;  %v4648_v45 = vrot.slane %v10554_v2, 7  ;;  %v4612_v36 = vadd.f32 %v4611_v25, %v4610_v4 }
 0x710   :  { %8667 = vrcp.f32 %v4643_v40  ;;  %v4525_v18 = vmul.f32 %v12889_v23, %v12888_v43  ;;  %v3385_v9 = vadd.f32 %v3384_v7, %v3383_v15  ;;  %v4619_v35 = vadd.f32 %v4618_v52, %v4617_v54 }
 0x711   :  { %8669 = vrcp.f32 %v4644_v13  ;;  %v3351_v27 = vrot.slane %v10556_v28, 1  ;;  %v4625_v40 = vrot.slane %v4624_v20, 4  ;;  %v4587_v2 = vrot.slane %v10560_v50, 1 }
 0x712   :  { %8671 = vrcp.f32 %v3395_v31  ;;  %v4601_v61 = vrot.slane %v10563_v37, 1  ;;  %v3365_v13 = vrot.slane %v3364_v59, 1  ;;  %v3358_v17 = vrot.slane %v3357_v58, 1 }
 0x713   :  { %8673 = vrcp.f32 %v3396_v41  ;;  %v3372_v55 = vrot.slane %v3371_v16, 1  ;;  %v4608_v31 = vrot.slane %v4607_v26, 1  ;;  %v4631_v4 = vsel %vm3275_vm12, %v4525_v18, 0.0 }
 0x714   :  { %8675 = vrcp.f32 %v3397_v22  ;;  %v3379_v41 = vrot.slane %v3378_v8, 1  ;;  %v4613_v46 = vrot.slane %v4612_v36, 2  ;;  %v3386_v54 = vrot.slane %v3385_v9, 1 }
 0x715   :  { %8677 = vrcp.f32 %v3398_v60  ;;  %v4620_v22 = vrot.slane %v4619_v35, 2  ;;  %v10597_v53 = vadd.f32 %v4594_v48, %v10529_v32  ;;  %v10600_v60 = vadd.f32 %v3344_v30, %v10550_v51 }
 0x716   :  { %8679 = vrcp.f32 %v4645_v6  ;;  %v8656_v34 = vpop.eup %8655  ;;  %v10603_v47 = vadd.f32 %v3351_v27, %v10556_v28  ;;  %v10605_v25 = vadd.f32 %v4625_v40, %v4624_v20  ;;  %v10608_v7 = vadd.f32 %v4587_v2, %v10560_v50 }
 0x717   :  { %8681 = vrcp.f32 %v4646_v42  ;;  %v10611_v52 = vadd.f32 %v4601_v61, %v10563_v37  ;;  %v10613_v42 = vadd.f32 %v3365_v13, %v3364_v59  ;;  %v10617_v51 = vadd.f32 %v3372_v55, %v3371_v16 }
 0x718   :  { %v8658_v5 = vpop.eup %8657  ;;  %8683 = vrcp.f32 %v4647_v19  ;;  %v4632_v19 = vrot.slane %v4631_v4, 4  ;;  %v10619_v28 = vadd.f32 %v4608_v31, %v4607_v26  ;;  %v10621_v18 = vadd.f32 %v3379_v41, %v3378_v8 }
 0x719   :  { %v8660_v56 = vpop.eup %8659  ;;  %8685 = vrcp.f32 %v4648_v45  ;;  %v10615_v45 = vadd.f32 %v3358_v17, %v3357_v58  ;;  %v10623_v50 = vadd.f32 %v4613_v46, %v4612_v36  ;;  %v10625_v30 = vadd.f32 %v3386_v54, %v3385_v9 }
 0x71a   :  { %v8662_v43 = vpop.eup %8661  ;;  %v10627_v37 = vadd.f32 %v4620_v22, %v4619_v35  ;;  %v4627_v27 = vrot.slane %v10605_v25, 2  ;;  %v10630_v61 = vadd.f32 %v4632_v19, %v4631_v4  ;;  %v3423_v26 = vmul.f32 %v8656_v34, %v10463_v29 }
 0x71b   :  { %v8664_v15 = vpop.eup %8663  ;;  %v3425_v36 = vmul.f32 %v8658_v5, %v10479_v49  ;;  %v3427_v9 = vmul.f32 %v8660_v56, %v10490_v57  ;;  %v3429_v55 = vmul.f32 %v8662_v43, %v10501_v62 }
 0x71c   :  { %v8666_v21 = vpop.eup %8665  ;;  %v10637_v31 = vmul.f32 %v8664_v15, %v10488_v1 }
 0x71d   :  { %v8668_v6 = vpop.eup %8667  ;;  %v10640_v29 = vmul.f32 %v8666_v21, %v10486_v12 }
 0x71e   :  { %v8670_v48 = vpop.eup %8669  ;;  %v10643_v34 = vmul.f32 %v8668_v6, %v10492_v39 }
 0x71f   :  { %v8672_v23 = vpop.eup %8671  ;;  %v10646_v49 = vmul.f32 %v8670_v48, %v10507_v14 }
 0x720   :  { %v8674_v59 = vpop.eup %8673  ;;  %v3431_v56 = vmul.f32 %v8672_v23, %v10511_v10 }
 0x721   :  { %v8676_v16 = vpop.eup %8675  ;;  %v3433_v62 = vmul.f32 %v8674_v59, %v10517_v24 }
 0x722   :  { %v3086_v32 = vpop.xlane.xlu0 %3085  ;;  %v8678_v13 = vpop.eup %8677  ;;  %v3435_v12 = vmul.f32 %v8676_v16, %v10523_v44  ;;  %v12890_v44 = vmov 0.0  }
 0x723   :  { %v3389_v20 = vmax.f32 %v3086_v32, 1e-30  ;;  %v8680_v17 = vpop.eup %8679  ;;  %v3437_v39 = vmul.f32 %v8678_v13, %v10539_v63 }
 0x724   :  { %v8682_v41 = vpop.eup %8681  ;;  %v10655_v14 = vmul.f32 %v8680_v17, %v10513_v33 }
 0x725   :  { %v3399_v40 = vrot.slane %v3389_v20, 1  ;;  %v3400_v58 = vrot.slane %v3389_v20, 2  ;;  %v3401_v2 = vrot.slane %v3389_v20, 3  ;;  %8687 = vrcp.f32 %v3389_v20  ;;  %v8684_v57 = vpop.eup %8683 }
 0x726   :  { %v3402_v8 = vrot.slane %v3389_v20, 4  ;;  %v3403_v35 = vrot.slane %v3389_v20, 5  ;;  %v3404_v4 = vrot.slane %v3389_v20, 6  ;;  %v3405_v1 = vrot.slane %v3389_v20, 7  ;;  %v8686_v43 = vpop.eup %8685 }
 0x727   :  { %8689 = vrcp.f32 %v3399_v40  ;;  %v10658_v54 = vmul.f32 %v8682_v41, %v10519_v0  ;;  %v10668_v63 = vmul.f32 %v8684_v57, %v10525_v3  ;;  %v10671_v33 = vmul.f32 %v8686_v43, %v10545_v11 }
 0x728   :  { %8691 = vrcp.f32 %v3400_v58 }
 0x729   :  { %8693 = vrcp.f32 %v3401_v2 }
 0x72a   :  { %v4337_v5 = vpop.xlane.xlu1 %4336  ;;  %8695 = vrcp.f32 %v3402_v8 }
 0x72b   :  { %v10650_v15 = vmax.f32 %v4337_v5, 1e-30  ;;  %8697 = vrcp.f32 %v3403_v35 }
 0x72c   :  { %v3233_v46 = vpop.xlane.xlu0 %3232  ;;  %8699 = vrcp.f32 %v3404_v4 }
 0x72d   :  { %vm3237_vm13 = vcmp.gt.f32.partialorder %v3233_v46, 0.0  ;;  %v4649_v10 = vrot.slane %v10650_v15, 1  ;;  %v4650_v24 = vrot.slane %v10650_v15, 2  ;;  %v4651_v22 = vrot.slane %v10650_v15, 3 }
 0x72e   :  { %8701 = vrcp.f32 %v10650_v15  ;;  %v10665_v21 = vsel %vm3237_vm13, 1.0, %v12890_v44  ;;  %v4652_v59 = vrot.slane %v10650_v15, 4 }
 0x72f   :  { %8703 = vrcp.f32 %v3405_v1  ;;  %v3456_v0 = vrot.slane %v10665_v21, 1  ;;  %v3457_v6 = vrot.slane %v10665_v21, 2  ;;  %v3458_v19 = vrot.slane %v10665_v21, 3 }
 0x730   :  { %8705 = vrcp.f32 %v4649_v10  ;;  %v3459_v32 = vrot.slane %v10665_v21, 4  ;;  %v3460_v48 = vrot.slane %v10665_v21, 5  ;;  %v3461_v20 = vrot.slane %v10665_v21, 6 }
 0x731   :  { %8707 = vrcp.f32 %v4650_v24  ;;  %v3462_v11 = vrot.slane %v10665_v21, 7  ;;  %v3487_v23 = vmul.f32 %v3456_v0, %v3425_v36  ;;  %v3488_v40 = vmul.f32 %v3457_v6, %v3427_v9 }
 0x732   :  { %8709 = vrcp.f32 %v4651_v22  ;;  %v3489_v58 = vmul.f32 %v3458_v19, %v3429_v55  ;;  %v3490_v2 = vmul.f32 %v3459_v32, %v3431_v56  ;;  %v8688_v16 = vpop.eup %8687  ;;  %v3486_v13 = vmul.f32 %v10665_v21, %v3423_v26 }
 0x733   :  { %v4484_v3 = vpop.xlane.xlu1 %4483  ;;  %v3491_v35 = vmul.f32 %v3460_v48, %v3433_v62  ;;  %v3492_v17 = vmul.f32 %v3461_v20, %v3435_v12  ;;  %v3493_v57 = vmul.f32 %v3462_v11, %v3437_v39  ;;  %v4768_v5 = vrot.slane %v3487_v23, 7 }
 0x734   :  { %vm4488_vm14 = vcmp.gt.f32.partialorder %v4484_v3, 0.0  ;;  %v8690_v4 = vpop.eup %8689  ;;  %v4770_v36 = vrot.slane %v3488_v40, 6  ;;  %v4772_v43 = vrot.slane %v3489_v58, 5  ;;  %v4774_v46 = vrot.slane %v3490_v2, 4 }
 0x735   :  { %v10682_v8 = vsel %vm4488_vm14, 1.0, %v12890_v44  ;;  %v8692_v1 = vpop.eup %8691  ;;  %v4776_v9 = vrot.slane %v3491_v35, 3  ;;  %v4778_v55 = vrot.slane %v3492_v17, 2  ;;  %v4769_v24 = vsel %vm510_vm2, %v4768_v5, %v3486_v13 }
 0x736   :  { %v4706_v41 = vrot.slane %v10682_v8, 1  ;;  %v8694_v10 = vpop.eup %8693  ;;  %v4707_v26 = vrot.slane %v10682_v8, 2  ;;  %v4708_v62 = vrot.slane %v10682_v8, 3  ;;  %v4771_v39 = vsel %vm513_vm3, %v4770_v36, %v4769_v24 }
 0x737   :  { %v8696_v12 = vpop.eup %8695  ;;  %v4709_v6 = vrot.slane %v10682_v8, 4  ;;  %v4773_v32 = vsel %vm516_vm4, %v4772_v43, %v4771_v39  ;;  %v4780_v48 = vrot.slane %v3493_v57, 1  ;;  %v4710_v3 = vrot.slane %v10682_v8, 5 }
 0x738   :  { %v8698_v19 = vpop.eup %8697  ;;  %v4775_v23 = vsel %vm519_vm5, %v4774_v46, %v4773_v32  ;;  %v4711_v58 = vrot.slane %v10682_v8, 6  ;;  %v4712_v2 = vrot.slane %v10682_v8, 7  ;;  %v4736_v17 = vmul.f32 %v10682_v8, %v10637_v31 }
 0x739   :  { %v8700_v11 = vpop.eup %8699  ;;  %v4777_v35 = vsel %vm522_vm6, %v4776_v9, %v4775_v23  ;;  %v4737_v57 = vmul.f32 %v4706_v41, %v10640_v29  ;;  %v4738_v5 = vmul.f32 %v4707_v26, %v10643_v34  ;;  %v4739_v46 = vmul.f32 %v4708_v62, %v10646_v49 }
 0x73a   :  { %v4779_v43 = vsel %vm525_vm7, %v4778_v55, %v4777_v35  ;;  %v4741_v24 = vmul.f32 %v4710_v3, %v10658_v54  ;;  %v4742_v39 = vmul.f32 %v4711_v58, %v10668_v63  ;;  %v4743_v31 = vmul.f32 %v4712_v2, %v10671_v33 }
 0x73b   :  { %v3236_v56 = vpop.xlane.xlu0 %3235  ;;  %v4487_v22 = vpop.xlane.xlu1 %4486  ;;  %v4781_v9 = vsel %vm528_vm8, %v4780_v48, %v4779_v43  ;;  %v4818_v29 = vrot.slane %v4737_v57, 7  ;;  %v4820_v34 = vrot.slane %v4738_v5, 6  ;;  %v4822_v55 = vrot.slane %v4739_v46, 5 }
 0x73c   :  { %vm3238_vm15 = vcmp.gt.f32.partialorder %v3236_v56, 0.0  ;;  %vm4489_vm0 = vcmp.gt.f32.partialorder %v4487_v22, 0.0  ;;  %v10703_v13 = vpop.eup %8701  ;;  %v4740_v56 = vmul.f32 %v4709_v6, %v10655_v14  ;;  %4796 = vrot.lane.b32.xlu0 %v4781_v9, %s8762_s27  ;;  %v4826_v26 = vrot.slane %v4741_v24, 3 }
 0x73d   :  { %v10691_v0 = vsel %vm3238_vm15, 1.0, %v12890_v44  ;;  %v10699_v40 = vsel %vm4489_vm0, 1.0, %v12890_v44  ;;  %v8704_v36 = vpop.eup %8703  ;;  %v4819_v54 = vsel %vm510_vm2, %v4818_v29, %v4736_v17  ;;  %v4828_v62 = vrot.slane %v4742_v39, 2 }
 0x73e   :  { %v3463_v20 = vrot.slane %v10691_v0, 1  ;;  %v10714_v22 = vpop.eup %8705  ;;  %v4824_v49 = vrot.slane %v4740_v56, 4  ;;  %v4830_v6 = vrot.slane %v4743_v31, 1  ;;  %v3439_v32 = vmul.f32 %v8688_v16, %v10541_v38 }
 0x73f   :  { %v10719_v41 = vpop.eup %8707  ;;  %v4821_v63 = vsel %vm513_vm3, %v4820_v34, %v4819_v54  ;;  %v3441_v33 = vmul.f32 %v8690_v4, %v10600_v60  ;;  %v3443_v48 = vmul.f32 %v8692_v1, %v10603_v47  ;;  %v3445_v3 = vmul.f32 %v8694_v10, %v10615_v45 }
 0x740   :  { %v8710_v14 = vpop.eup %8709  ;;  %v4823_v23 = vsel %vm516_vm4, %v4822_v55, %v4821_v63  ;;  %v3447_v58 = vmul.f32 %v8696_v12, %v10613_v42  ;;  %v3449_v2 = vmul.f32 %v8698_v19, %v10617_v51  ;;  %v3451_v35 = vmul.f32 %v8700_v11, %v10621_v18 }
 0x741   :  { %v4825_v17 = vsel %vm519_vm5, %v4824_v49, %v4823_v23  ;;  %v3453_v38 = vmul.f32 %v8704_v36, %v10625_v30  ;;  %v3464_v16 = vrot.slane %v10691_v0, 2  ;;  %v3465_v60 = vrot.slane %v10691_v0, 3  ;;  %v4865_v23 = vld [vmem:[%s12470_s3 + $0x28] sm:$0x3f] }
 0x742   :  { %v4827_v47 = vsel %vm522_vm6, %v4826_v26, %v4825_v17  ;;  %v3466_v45 = vrot.slane %v10691_v0, 4  ;;  %v3467_v4 = vrot.slane %v10691_v0, 5  ;;  %v3468_v42 = vrot.slane %v10691_v0, 6 }
 0x743   :  { %v4829_v51 = vsel %vm525_vm7, %v4828_v62, %v4827_v47  ;;  %v3469_v18 = vrot.slane %v10691_v0, 7  ;;  %v3494_v1 = vmul.f32 %v10691_v0, %v3439_v32  ;;  %v3495_v10 = vmul.f32 %v3463_v20, %v3441_v33 }
 0x744   :  { %v4831_v30 = vsel %vm528_vm8, %v4830_v6, %v4829_v51  ;;  %v3496_v12 = vmul.f32 %v3464_v16, %v3443_v48  ;;  %v3497_v19 = vmul.f32 %v3465_v60, %v3445_v3  ;;  %v3498_v11 = vmul.f32 %v3466_v45, %v3447_v58 }
 0x745   :  { %4846 = vrot.lane.b32.xlu1 %v4831_v30, %s8771_s0  ;;  %v3499_v57 = vmul.f32 %v3467_v4, %v3449_v2  ;;  %v3500_v5 = vmul.f32 %v3468_v42, %v3451_v35  ;;  %v3501_v36 = vmul.f32 %v3469_v18, %v3453_v38  ;;  %v4782_v43 = vrot.slane %v3495_v10, 7 }
 0x746   :  { %v10748_v46 = vadd.f32 %v4627_v27, %v10605_v25  ;;  %v4634_v56 = vrot.slane %v10630_v61, 2  ;;  %v4784_v20 = vrot.slane %v3496_v12, 6  ;;  %v4653_v24 = vrot.slane %v10650_v15, 5 }
 0x747   :  { %v4713_v9 = vrot.slane %v10699_v40, 1  ;;  %v4783_v39 = vsel %vm510_vm2, %v4782_v43, %v3494_v1  ;;  %v4786_v31 = vrot.slane %v3497_v19, 5  ;;  %v4654_v29 = vrot.slane %v10650_v15, 6 }
 0x748   :  { %v4785_v34 = vsel %vm513_vm3, %v4784_v20, %v4783_v39  ;;  %v4788_v55 = vrot.slane %v3498_v11, 4  ;;  %v4790_v49 = vrot.slane %v3499_v57, 3  ;;  %v4655_v26 = vrot.slane %v10650_v15, 7 }
 0x749   :  { %v4787_v25 = vsel %vm516_vm4, %v4786_v31, %v4785_v34  ;;  %v4792_v27 = vrot.slane %v3500_v5, 2  ;;  %v4794_v54 = vrot.slane %v3501_v36, 1  ;;  %8711 = vrcp.f32 %v4652_v59 }
 0x74a   :  { %v4789_v62 = vsel %vm519_vm5, %v4788_v55, %v4787_v25  ;;  %8713 = vrcp.f32 %v4653_v24  ;;  %v4714_v6 = vrot.slane %v10699_v40, 2  ;;  %v4715_v32 = vrot.slane %v10699_v40, 3 }
 0x74b   :  { %v4791_v63 = vsel %vm522_vm6, %v4790_v49, %v4789_v62  ;;  %v4691_v33 = vmul.f32 %v10714_v22, %v10597_v53  ;;  %v4693_v48 = vmul.f32 %v10719_v41, %v10611_v52  ;;  %8715 = vrcp.f32 %v4654_v29  ;;  %v4864_v53 = vld [vmem:[%s12470_s3 + $0x20] sm:$0x3f] }
 0x74c   :  { %v4793_v3 = vsel %vm525_vm7, %v4792_v27, %v4791_v63  ;;  %v4689_v15 = vmul.f32 %v10703_v13, %v10608_v7  ;;  %v4695_v59 = vmul.f32 %v8710_v14, %v10619_v28  ;;  %8717 = vrcp.f32 %v4655_v26  ;;  %v4861_v7 = vld [vmem:[%s12470_s3 + $0x8] sm:$0xff] }
 0x74d   :  { %v4635_v22 = vadd.f32 %v4634_v56, %v10630_v61  ;;  %v4795_v52 = vsel %vm528_vm8, %v4794_v54, %v4793_v3  ;;  %v4745_v41 = vmul.f32 %v4713_v9, %v4691_v33  ;;  %v4746_v58 = vmul.f32 %v4714_v6, %v4693_v48  ;;  %v4860_v61 = vld [vmem:[%s12470_s3] sm:$0xff] }
 0x74e   :  { %v4615_v28 = vrot.slane %v10623_v50, 1  ;;  %v4622_v13 = vrot.slane %v10627_v37, 1  ;;  %4798 = vrot.lane.b32.xlu1 %v4795_v52, %s8762_s27  ;;  %v4744_v14 = vmul.f32 %v10699_v40, %v4689_v15  ;;  %v4747_v2 = vmul.f32 %v4715_v32, %v4695_v59 }
 0x74f   :  { %v4832_v35 = vrot.slane %v4745_v41, 7  ;;  %v4834_v17 = vrot.slane %v4746_v58, 6  ;;  %v4879_v38 = vsel %vm553_vm1, %v4865_v23, 0  ;;  %v4876_v16 = vsel %vm553_vm1, %v4864_v53, 0 }
 0x750   :  { %v4629_v60 = vrot.slane %v10748_v46, 1  ;;  %v10793_v47 = vand.u32 4294901760, %v4879_v38  ;;  %v10795_v45 = vand.u32 4294901760, %v4876_v16  ;;  %v10797_v4 = vand.u32 4294901760, %v4861_v7 }
 0x751   :  { %v4636_v42 = vrot.slane %v4635_v22, 1  ;;  %v4833_v51 = vsel %vm510_vm2, %v4832_v35, %v4744_v14  ;;  %v4836_v18 = vrot.slane %v4747_v2, 5  ;;  %v10800_v1 = vand.u32 4294901760, %v4860_v61 }
 0x752   :  { %v4835_v10 = vsel %vm513_vm3, %v4834_v17, %v4833_v51  ;;  %v10804_v30 = vsub.f32 %v4879_v38, %v10793_v47  ;;  %v10807_v12 = vsub.f32 %v4876_v16, %v10795_v45  ;;  %v10810_v19 = vsub.f32 %v4861_v7, %v10797_v4  ;;  %4916 = vmatprep.subr.mxu0 %v10793_v47 }
 0x753   :  { %v4616_v11 = vadd.f32 %v4615_v28, %v10623_v50  ;;  %v4837_v57 = vsel %vm516_vm4, %v4836_v18, %v4835_v10  ;;  %v10816_v5 = vsub.f32 %v4860_v61, %v10800_v1  ;;  %4918 = vmatpush1.msra.mxu0 %v10795_v45  ;;  %v4623_v36 = vadd.f32 %v4622_v13, %v10627_v37  ;;  %v4867_v10 = vld [vmem:[%s12470_s3 + $0x38] sm:$0x3f] }
 0x754   :  { %v5008_v43 = vand.u32 4294901760, %v10804_v30  ;;  %v5014_v56 = vand.u32 4294901760, %v10807_v12  ;;  %v5020_v20 = vand.u32 4294901760, %v10810_v19  ;;  %4920 = vmatprep.subr.mxu0 %v10797_v4  ;;  %v4630_v24 = vadd.f32 %v4629_v60, %v10748_v46 }
 0x755   :  { %v4637_v50 = vadd.f32 %v4636_v42, %v4635_v22  ;;  %v4716_v9 = vrot.slane %v10699_v40, 4  ;;  %v5026_v39 = vand.u32 4294901760, %v10816_v5  ;;  %4922 = vmatpush1.msra.mxu0 %v10800_v1  ;;  %v4717_v37 = vrot.slane %v10699_v40, 5 }
 0x756   :  { %v8712_v31 = vpop.eup %8711  ;;  %v5009_v29 = vsub.f32 %v10804_v30, %v5008_v43  ;;  %v5015_v34 = vsub.f32 %v10807_v12, %v5014_v56  ;;  %v5021_v46 = vsub.f32 %v10810_v19, %v5020_v20  ;;  %5107 = vmatprep.subr.mxu0 %v10804_v30  ;;  %v4718_v26 = vrot.slane %v10699_v40, 6 }
 0x757   :  { %v8714_v55 = vpop.eup %8713  ;;  %v4697_v49 = vmul.f32 %v8712_v31, %v4616_v11  ;;  %v4719_v25 = vrot.slane %v10699_v40, 7  ;;  %v5027_v27 = vsub.f32 %v10816_v5, %v5026_v39  ;;  %vm4854_vm2 = vcmask 97280   ;;  %v4866_v11 = vld [vmem:[%s12470_s3 + $0x30] sm:$0x3f] }
 0x758   :  { %v8716_v54 = vpop.eup %8715  ;;  %v4699_v62 = vmul.f32 %v8714_v55, %v4623_v36  ;;  %v5010_v6 = vand.u32 4294901760, %v5009_v29  ;;  %v5016_v32 = vand.u32 4294901760, %v5015_v34  ;;  %v5022_v63 = vand.u32 4294901760, %v5021_v46  ;;  %v4862_v29 = vld [vmem:[%s12470_s3 + $0x10] sm:$0xff] }
 0x759   :  { %v8718_v33 = vpop.eup %8717  ;;  %v4701_v48 = vmul.f32 %v8716_v54, %v4630_v24  ;;  %v4748_v3 = vmul.f32 %v4716_v9, %v4697_v49  ;;  %v5028_v15 = vand.u32 4294901760, %v5027_v27  ;;  %vm4857_vm3 = vcmask 105472  }
 0x75a   :  { %v4703_v59 = vmul.f32 %v8718_v33, %v4637_v50  ;;  %v4749_v23 = vmul.f32 %v4717_v37, %v4699_v62  ;;  %5011 = vmatprep.subr.mxu1 %v5010_v6  ;;  %vm4868_vm4 = vcmask 113664   ;;  %v4882_v24 = vsel %vm553_vm1, %v4866_v11, 0  ;;  %v6002_v11 = vld [vmem:[%s12471_s4 + $0xd8] sm:$0xff] }
 0x75b   :  { %v4750_v53 = vmul.f32 %v4718_v26, %v4701_v48  ;;  %v4838_v22 = vrot.slane %v4748_v3, 4  ;;  %5017 = vmatpush1.msra.mxu1 %v5016_v32  ;;  %v10900_v37 = vand.u32 4294901760, %v4882_v24 }
 0x75c   :  { %v4751_v52 = vmul.f32 %v4719_v25, %v4703_v59  ;;  %v4840_v41 = vrot.slane %v4749_v23, 3  ;;  %5023 = vmatprep.subr.mxu1 %v5022_v63  ;;  %v10913_v25 = vand.u32 4294901760, %v4862_v29 }
 0x75d   :  { %v4839_v58 = vsel %vm519_vm5, %v4838_v22, %v4837_v57  ;;  %v4842_v7 = vrot.slane %v4750_v53, 2  ;;  %5029 = vmatpush1.msra.mxu1 %v5028_v15  ;;  %v5990_v22 = vld [vmem:[%s12471_s4 + $0x78] sm:$0xff] }
 0x75e   :  { %v4841_v28 = vsel %vm522_vm6, %v4840_v41, %v4839_v58  ;;  %v4844_v13 = vrot.slane %v4751_v52, 1  ;;  %5195 = vmatprep.subr.mxu1 %v10793_v47  ;;  %v10933_v6 = vsub.f32 %v4862_v29, %v10913_v25  ;;  %v11036_v52 = vand.u32 4294901760, %v5990_v22  ;;  %v6005_v41 = vld [vmem:[%s12471_s4 + $0xf0] sm:$0xff] }
 0x75f   :  { %v4843_v14 = vsel %vm525_vm7, %v4842_v7, %v4841_v28  ;;  %v11041_v58 = vand.u32 4294901760, %v6005_v41  ;;  %v6001_v29 = vld [vmem:[%s12471_s4 + $0xd0] sm:$0xff] }
 0x760   :  { %v4845_v2 = vsel %vm528_vm8, %v4844_v13, %v4843_v14  ;;  %v5566_v15 = vand.u32 4294901760, %v10933_v6  ;;  %v11047_v7 = vsub.f32 %v5990_v22, %v11036_v52  ;;  %v6004_v13 = vld [vmem:[%s12471_s4 + $0xe8] sm:$0xff] }
 0x761   :  { %4848 = vrot.lane.b32.xlu0 %v4845_v2, %s8771_s0  ;;  %v11056_v14 = vsub.f32 %v6005_v41, %v11041_v58  ;;  %v11058_v2 = vand.u32 4294901760, %v6004_v13 }
 0x7ae   :  { %v4797_v61 = vpop.permute.xlu0 %4796 }
 0x7b7   :  { %v4847_v35 = vpop.permute.xlu1 %4846 }
 0x7b8   :  { %v4852_v17 = vsel %vm548_vm9, %v4797_v61, %v4847_v35  ;;  %v5988_v61 = vld [vmem:[%s12471_s4 + $0x68] sm:$0xff]  ;;  %v12582_v35 = vand.u32 4294901760, %v11047_v7 }
 0x7b9   :  { %v4855_v38 = vsel %vm4854_vm2, %v4852_v17, %v10665_v21 }
 0x7ba   :  { %v4858_v16 = vsel %vm4857_vm3, %v4855_v38, %v10682_v8  ;;  %v11068_v38 = vand.u32 4294901760, %v5988_v61 }
 0x7bb   :  { %v4870_v60 = vsel %vm4868_vm4, %v4858_v16, 0  ;;  %v6003_v16 = vld [vmem:[%s12471_s4 + $0xe0] sm:$0xff] }
 0x7bc   :  { %v10856_v42 = vand.u32 4294901760, %v4870_v60 }
 0x7be   :  { %v10859_v51 = vsub.f32 %v4870_v60, %v10856_v42  ;;  %5064 = vmatmul.mubr.f32.vlgmr.msra.gmra.mxu1 %v10856_v42  ;;  %v12580_v60 = vand.u32 4294901760, %v11056_v14 }
 0x7bf   :  { %5069 = vmatprep.mubr.f32.mxu1 %v12890_v44  ;;  %5197 = vmatpush1.msra.mxu1 %v10795_v45 }
 0x7c0   :  { %v10865_v18 = vand.u32 4294901760, %v10859_v51  ;;  %5199 = vmatprep.subr.mxu1 %v10797_v4  ;;  %v4799_v36 = vpop.permute.xlu1 %4798 }
 0x7c1   :  { %5201 = vmatpush1.msra.mxu1 %v10800_v1 }
 0x7c2   :  { %v4959_v21 = vsub.f32 %v10859_v51, %v10865_v18  ;;  %5373 = vmatprep.subr.mxu1 %v10793_v47  ;;  %v4885_v47 = vsel %vm553_vm1, %v4867_v10, 0  ;;  %v11089_v10 = vsub.f32 %v5988_v61, %v11068_v38 }
 0x7c3   :  { %v10888_v57 = vand.u32 4294901760, %v4885_v47 }
 0x7c4   :  { %v10872_v8 = vand.u32 4294901760, %v4959_v21  ;;  %v6177_v21 = vsub.f32 %v11047_v7, %v12582_v35 }
 0x7c5   :  { %v10893_v30 = vsub.f32 %v4885_v47, %v10888_v57 }
 0x7c6   :  { %4961 = vmatmul.mubr.f32.vlgmr.msra.gmra.mxu0 %v10872_v8 }
 0x7c7   :  { %5110 = vmatpush1.msra.mxu0 %v10807_v12  ;;  %4966 = vmatprep.mubr.f32.mxu0 %v12890_v44  ;;  %v5548_v26 = vand.u32 4294901760, %v10893_v30  ;;  %v6006_v12 = vld [vmem:[%s12471_s4 + $0xf8] sm:$0xff] }
 0x7c8   :  { %5113 = vmatprep.subr.mxu0 %v10810_v19  ;;  %v11015_v19 = vand.u32 4294901760, %v6006_v12 }
 0x7c9   :  { %5116 = vmatpush1.msra.mxu0 %v10816_v5  ;;  %v5549_v62 = vsub.f32 %v10893_v30, %v5548_v26 }
 0x7ca   :  { %5284 = vmatprep.subr.mxu0 %v5008_v43  ;;  %v4863_v43 = vld [vmem:[%s12470_s3 + $0x18] sm:$0xff]  ;;  %12891 = vst [vmem:[#allocation46_spill] sm:$0xff] %v11015_v19  ;;  %v11023_v5 = vsub.f32 %v6006_v12, %v11015_v19  ;;  %v5983_v12 = vld [vmem:[%s12471_s4 + $0x40] sm:$0xff] }
 0x7cb   :  { %v10908_v55 = vand.u32 4294901760, %v4863_v43  ;;  %v5550_v3 = vand.u32 4294901760, %v5549_v62 }
 0x7cc   :  { %12892 = vst [vmem:[#allocation44_spill] sm:$0xff] %v11023_v5 }
 0x7d3   :  { %v4849_v50 = vpop.permute.xlu0 %4848 }
 0x7d4   :  { %v4853_v9 = vsel %vm548_vm9, %v4799_v36, %v4849_v50  ;;  %v11104_v50 = vand.u32 4294901760, %v6002_v11 }
 0x7d5   :  { %v4856_v31 = vsel %vm4854_vm2, %v4853_v9, %v10691_v0  ;;  %v10916_v0 = vsub.f32 %v4882_v24, %v10900_v37  ;;  %v5986_v9 = vld [vmem:[%s12471_s4 + $0x58] sm:$0xff] }
 0x7d6   :  { %v4859_v34 = vsel %vm4857_vm3, %v4856_v31, %v10699_v40  ;;  %v10924_v40 = vsub.f32 %v4863_v43, %v10908_v55  ;;  %v12576_v31 = vand.u32 4294901760, %v11089_v10 }
 0x7d7   :  { %v4873_v46 = vsel %vm4868_vm4, %v4859_v34, 0  ;;  %v5554_v32 = vand.u32 4294901760, %v10916_v0 }
 0x7d8   :  { %v10910_v49 = vand.u32 4294901760, %v4873_v46  ;;  %v5560_v33 = vand.u32 4294901760, %v10924_v40 }
 0x7d9   :  { %v5555_v59 = vsub.f32 %v10916_v0, %v5554_v32 }
 0x7da   :  { %v10919_v27 = vsub.f32 %v4873_v46, %v10910_v49  ;;  %5071 = vmatmul.mubr.f32.gmra.mxu1 %v10910_v49 }
 0x7db   :  { %5234 = vmatprep.mubr.f32.mxu1 %v12890_v44 }
 0x7dc   :  { %v10927_v54 = vand.u32 4294901760, %v10919_v27 }
 0x7de   :  { %5238 = vmatmul.mubr.f32.vlgmr.msra.gmra.mxu1 %v10865_v18  ;;  %v4970_v63 = vsub.f32 %v10919_v27, %v10927_v54 }
 0x7df   :  { %5243 = vmatprep.mubr.f32.mxu1 %v12890_v44  ;;  %5375 = vmatpush1.msra.mxu1 %v10795_v45  ;;  %v5561_v45 = vsub.f32 %v10924_v40, %v5560_v33 }
 0x7e0   :  { %v4971_v48 = vand.u32 4294901760, %v4970_v63  ;;  %5377 = vmatprep.subr.mxu1 %v10797_v4  ;;  %v5567_v4 = vsub.f32 %v10933_v6, %v5566_v15  ;;  %v11145_v63 = vand.u32 4294901760, %v6001_v29 }
 0x7e1   :  { %5379 = vmatpush1.msra.mxu1 %v10800_v1  ;;  %v5556_v1 = vand.u32 4294901760, %v5555_v59  ;;  %v5562_v23 = vand.u32 4294901760, %v5561_v45  ;;  %v5999_v45 = vld [vmem:[%s12471_s4 + $0xc0] sm:$0xff] }
 0x7e2   :  { %4972 = vmatmul.mubr.f32.gmra.mxu0 %v4971_v48  ;;  %5247 = vmatmul.mubr.f32.gmra.mxu1 %v10927_v54  ;;  %v5568_v53 = vand.u32 4294901760, %v5567_v4 }
 0x7e3   :  { %5149 = vmatprep.mubr.f32.mxu0 %v12890_v44  ;;  %5412 = vmatprep.mubr.f32.mxu1 %v12890_v44 }
 0x7e4   :  { %5551 = vmatprep.subr.mxu1 %v5550_v3 }
 0x7e6   :  { %5152 = vmatmul.mubr.f32.vlgmr.msra.gmra.mxu0 %v10859_v51  ;;  %5414 = vmatmul.mubr.f32.vlgmr.msra.gmra.mxu1 %v10856_v42 }
 0x7e7   :  { %5288 = vmatpush1.msra.mxu0 %v5014_v56  ;;  %5157 = vmatprep.mubr.f32.mxu0 %v12890_v44  ;;  %v12583_v56 = vand.u32 4294901760, %v11023_v5 }
 0x7e8   :  { %5292 = vmatprep.subr.mxu0 %v5020_v20  ;;  %5419 = vmatprep.mubr.f32.mxu1 %v12890_v44 }
 0x7e9   :  { %5296 = vmatpush1.msra.mxu0 %v5026_v39  ;;  %5557 = vmatpush1.msra.mxu1 %v5556_v1  ;;  %v6289_v20 = vsub.f32 %v11023_v5, %v12583_v56 }
 0x7ea   :  { %5160 = vmatmul.mubr.f32.gmra.mxu0 %v10919_v27  ;;  %5421 = vmatmul.mubr.f32.gmra.mxu1 %v10910_v49 }
 0x7eb   :  { %5563 = vmatprep.subr.mxu1 %v5562_v23  ;;  %5329 = vmatprep.mubr.f32.mxu0 %v12890_v44  ;;  %v6290_v39 = vand.u32 4294901760, %v6289_v20  ;;  %v11166_v23 = vsub.f32 %v6001_v29, %v11145_v63 }
 0x7ec   :  { %5569 = vmatpush1.msra.mxu1 %v5568_v53  ;;  %5602 = vmatprep.mubr.f32.mxu1 %v12890_v44 }
 0x7ed   :  { %5456 = vmatprep.subr.mxu0 %v10888_v57  ;;  %5735 = vmatprep.subr.mxu1 %v10888_v57  ;;  %v12569_v61 = vand.u32 4294901760, %v11166_v23 }
 0x7ee   :  { %5331 = vmatmul.mubr.f32.vlgmr.msra.gmra.mxu0 %v10856_v42  ;;  %5604 = vmatmul.mubr.f32.vlgmr.msra.gmra.mxu1 %v10856_v42 }
 0x7ef   :  { %5336 = vmatprep.mubr.f32.mxu0 %v12890_v44  ;;  %5609 = vmatprep.mubr.f32.mxu1 %v12890_v44 }
 0x7f0   :  { %5458 = vmatpush1.msra.mxu0 %v10900_v37  ;;  %5737 = vmatpush1.msra.mxu1 %v10900_v37 }
 0x7f1   :  { %5460 = vmatprep.subr.mxu0 %v10908_v55  ;;  %5739 = vmatprep.subr.mxu1 %v10908_v55 }
 0x7f2   :  { %5338 = vmatmul.mubr.f32.gmra.mxu0 %v10910_v49  ;;  %5611 = vmatmul.mubr.f32.gmra.mxu1 %v10910_v49 }
 0x7f3   :  { %5462 = vmatpush1.msra.mxu0 %v10913_v25  ;;  %5495 = vmatprep.mubr.f32.mxu0 %v12890_v44 }
 0x7f4   :  { %5741 = vmatpush1.msra.mxu1 %v10913_v25  ;;  %5774 = vmatprep.mubr.f32.mxu1 %v12890_v44 }
 0x7f5   :  { %5647 = vmatprep.subr.mxu0 %v10893_v30  ;;  %5913 = vmatprep.subr.mxu1 %v10888_v57  ;;  %v6296_v57 = vsub.f32 %v11056_v14, %v12580_v60  ;;  %v6178_v30 = vand.u32 4294901760, %v6177_v21 }
 0x7f6   :  { %5501 = vmatmul.mubr.f32.vlgmr.msra.gmra.mxu0 %v10872_v8  ;;  %5778 = vmatmul.mubr.f32.vlgmr.msra.gmra.mxu1 %v10865_v18  ;;  %v5987_v18 = vld [vmem:[%s12471_s4 + $0x60] sm:$0xff] }
 0x7f7   :  { %5506 = vmatprep.mubr.f32.mxu0 %v12890_v44  ;;  %5783 = vmatprep.mubr.f32.mxu1 %v12890_v44  ;;  %v11091_v47 = vand.u32 4294901760, %v5987_v18  ;;  %v6297_v34 = vand.u32 4294901760, %v6296_v57 }
 0x7f8   :  { %5650 = vmatpush1.msra.mxu0 %v10916_v0  ;;  %5915 = vmatpush1.msra.mxu1 %v10900_v37  ;;  %v6191_v0 = vsub.f32 %v11089_v10, %v12576_v31 }
 0x7f9   :  { %5653 = vmatprep.subr.mxu0 %v10924_v40  ;;  %5917 = vmatprep.subr.mxu1 %v10908_v55  ;;  %v11115_v37 = vsub.f32 %v5987_v18, %v11091_v47  ;;  %v11136_v40 = vand.u32 4294901760, %v5986_v9  ;;  %v11188_v18 = vand.u32 4294901760, %v5999_v45 }
 0x7fa   :  { %5512 = vmatmul.mubr.f32.gmra.mxu0 %v4971_v48  ;;  %5787 = vmatmul.mubr.f32.gmra.mxu1 %v10927_v54  ;;  %v6000_v54 = vld [vmem:[%s12471_s4 + $0xc8] sm:$0xff]  ;;  %v6192_v48 = vand.u32 4294901760, %v6191_v0 }
 0x7fb   :  { %5656 = vmatpush1.msra.mxu0 %v10933_v6  ;;  %5689 = vmatprep.mubr.f32.mxu0 %v12890_v44  ;;  %v11168_v53 = vand.u32 4294901760, %v6000_v54  ;;  %v11206_v29 = vsub.f32 %v5999_v45, %v11188_v18  ;;  %v5981_v45 = vld [vmem:[%s12471_s4 + $0x30] sm:$0xff] }
 0x7fc   :  { %5919 = vmatpush1.msra.mxu1 %v10913_v25  ;;  %5952 = vmatprep.mubr.f32.mxu1 %v12890_v44 }
 0x7fd   :  { %5824 = vmatprep.subr.mxu0 %v5548_v26  ;;  %8009 = vmatprep.subr.mxu1 %v6290_v39  ;;  %v5985_v26 = vld [vmem:[%s12471_s4 + $0x50] sm:$0xff]  ;;  %12895 = vst [vmem:[#allocation49_spill] sm:$0xff] %v11206_v29 }
 0x7fe   :  { %5692 = vmatmul.mubr.f32.vlgmr.msra.gmra.mxu0 %v10859_v51  ;;  %5954 = vmatmul.mubr.f32.vlgmr.msra.gmra.mxu1 %v10856_v42  ;;  %v11078_v51 = vand.u32 4294901760, %v6003_v16  ;;  %v11156_v59 = vand.u32 4294901760, %v5985_v26 }
 0x7ff   :  { %5697 = vmatprep.mubr.f32.mxu0 %v12890_v44  ;;  %5959 = vmatprep.mubr.f32.mxu1 %v12890_v44 }
 0x800   :  { %5828 = vmatpush1.msra.mxu0 %v5554_v32  ;;  %v11102_v24 = vsub.f32 %v6003_v16, %v11078_v51  ;;  %8010 = vmatpush3.msra.mxu1 %v6178_v30  ;;  %v11176_v22 = vsub.f32 %v5985_v26, %v11156_v59  ;;  %v11186_v16 = vsub.f32 %v6000_v54, %v11168_v53 }
 0x801   :  { %5832 = vmatprep.subr.mxu0 %v5560_v33  ;;  %8011 = vmatprep.subr.mxu1 %v6297_v34  ;;  %v5984_v33 = vld [vmem:[%s12471_s4 + $0x48] sm:$0xff]  ;;  %v6324_v30 = vsub.f32 %v11166_v23, %v12569_v61 }
 0x802   :  { %5700 = vmatmul.mubr.f32.gmra.mxu0 %v10919_v27  ;;  %5961 = vmatmul.mubr.f32.gmra.mxu1 %v10910_v49  ;;  %v12574_v55 = vand.u32 4294901760, %v11102_v24  ;;  %v12573_v27 = vand.u32 4294901760, %v11115_v37  ;;  %v11178_v41 = vand.u32 4294901760, %v5984_v33  ;;  %12893 = vst [vmem:[#allocation45_spill] sm:$0xff] %v11186_v16 }
 0x803   :  { %5836 = vmatpush1.msra.mxu0 %v5566_v15  ;;  %5869 = vmatprep.mubr.f32.mxu0 %v12890_v44  ;;  %v11154_v15 = vsub.f32 %v5986_v9, %v11136_v40  ;;  %v11198_v9 = vand.u32 4294901760, %v5983_v12 }
 0x804   :  { %7971 = vmatprep.subr.mxu0 %v11015_v19  ;;  %v6310_v6 = vsub.f32 %v11102_v24, %v12574_v55  ;;  %v6198_v3 = vsub.f32 %v11115_v37, %v12573_v27  ;;  %v11196_v57 = vsub.f32 %v5984_v33, %v11178_v41 }
 0x805   :  { %v12570_v39 = vand.u32 4294901760, %v11154_v15  ;;  %v11219_v54 = vsub.f32 %v5983_v12, %v11198_v9 }
 0x806   :  { %5871 = vmatmul.mubr.f32.vlgmr.msra.gmra.mxu0 %v10856_v42  ;;  %v11076_v42 = vsub.f32 %v6004_v13, %v11058_v2  ;;  %v6311_v4 = vand.u32 4294901760, %v6310_v6  ;;  %v6199_v20 = vand.u32 4294901760, %v6198_v3  ;;  %12894 = vst [vmem:[#allocation43_spill] sm:$0xff] %v11196_v57  ;;  %v12564_v0 = vand.u32 4294901760, %v11196_v57 }
 0x807   :  { %5876 = vmatprep.mubr.f32.mxu0 %v12890_v44  ;;  %v5989_v44 = vld [vmem:[%s12471_s4 + $0x70] sm:$0xff]  ;;  %7972 = vmatpush3.msra.mxu0 %v11036_v52  ;;  %v6205_v21 = vsub.f32 %v11154_v15, %v12570_v39  ;;  %12896 = vst [vmem:[#allocation54_spill] sm:$0xff] %v11219_v54  ;;  %v6325_v6 = vand.u32 4294901760, %v6324_v30  ;;  %v12568_v12 = vand.u32 4294901760, %v11219_v54 }
 0x808   :  { %v11049_v28 = vand.u32 4294901760, %v5989_v44  ;;  %7973 = vmatprep.subr.mxu0 %v11041_v58  ;;  %v12578_v36 = vand.u32 4294901760, %v11076_v42 }
 0x809   :  { %v6206_v26 = vand.u32 4294901760, %v6205_v21 }
 0x80a   :  { %5878 = vmatmul.mubr.f32.gmra.mxu0 %v10910_v49  ;;  %v11066_v17 = vsub.f32 %v5989_v44, %v11049_v28  ;;  %v6303_v46 = vsub.f32 %v11076_v42, %v12578_v36  ;;  %v11126_v49 = vsub.f32 %v6002_v11, %v11104_v50  ;;  %v5998_v44 = vld [vmem:[%s12471_s4 + $0xb8] sm:$0xff]  ;;  %v12567_v11 = vand.u32 4294901760, %v11176_v22 }
 0x80b   :  { %7974 = vmatpush3.msra.mxu0 %v11049_v28  ;;  %v11208_v34 = vand.u32 4294901760, %v5998_v44 }
 0x80c   :  { %7975 = vmatprep.subr.mxu0 %v11058_v2  ;;  %v12579_v8 = vand.u32 4294901760, %v11066_v17  ;;  %v6304_v62 = vand.u32 4294901760, %v6303_v46  ;;  %v12572_v32 = vand.u32 4294901760, %v11126_v49  ;;  %v5982_v46 = vld [vmem:[%s12471_s4 + $0x38] sm:$0xff] }
 0x80d   :  { %7976 = vmatpush3.msra.mxu0 %v11068_v38  ;;  %v11230_v3 = vsub.f32 %v5998_v44, %v11208_v34  ;;  %v5996_v44 = vld [vmem:[%s12471_s4 + $0xa8] sm:$0xff] }
 0x80e   :  { %7977 = vmatprep.subr.mxu0 %v11078_v51  ;;  %v6184_v43 = vsub.f32 %v11066_v17, %v12579_v8  ;;  %v6317_v1 = vsub.f32 %v11126_v49, %v12572_v32 }
 0x80f   :  { %7978 = vmatpush3.msra.mxu0 %v11091_v47  ;;  %12897 = vst [vmem:[#allocation53_spill] sm:$0xff] %v11230_v3  ;;  %v12571_v30 = vand.u32 4294901760, %v11230_v3 }
 0x810   :  { %7979 = vmatprep.subr.mxu0 %v11104_v50  ;;  %v6185_v25 = vand.u32 4294901760, %v6184_v43  ;;  %v6318_v13 = vand.u32 4294901760, %v6317_v1  ;;  %v12565_v43 = vand.u32 4294901760, %v11186_v16  ;;  %v6219_v1 = vsub.f32 %v11196_v57, %v12564_v0 }
 0x811   :  { %7980 = vmatpush3.msra.mxu0 %v11136_v40 }
 0x812   :  { %8012 = vmatpush3.msra.mxu1 %v6185_v25  ;;  %7981 = vmatprep.subr.mxu0 %v11145_v63  ;;  %v6212_v25 = vsub.f32 %v11176_v22, %v12567_v11  ;;  %v6331_v33 = vsub.f32 %v11186_v16, %v12565_v43  ;;  %v6220_v0 = vand.u32 4294901760, %v6219_v1  ;;  %v6226_v43 = vsub.f32 %v11219_v54, %v12568_v12  ;;  %v12945_v54 = vld [vmem:[#allocation33_spill] sm:$0xff] }
 0x813   :  { %8013 = vmatprep.subr.mxu1 %v6304_v62  ;;  %7982 = vmatpush3.msra.mxu0 %v11156_v59  ;;  %v5997_v62 = vld [vmem:[%s12471_s4 + $0xb0] sm:$0xff]  ;;  %v11272_v12 = vand.u32 4294901760, %v5996_v44 }
 0x814   :  { %8014 = vmatpush3.msra.mxu1 %v6192_v48  ;;  %7983 = vmatprep.subr.mxu0 %v11168_v53  ;;  %v12566_v48 = vand.u32 4294901760, %v11206_v29  ;;  %v6227_v61 = vand.u32 4294901760, %v6226_v43 }
 0x815   :  { %8015 = vmatprep.subr.mxu1 %v6311_v4  ;;  %7984 = vmatpush3.msra.mxu0 %v11178_v41  ;;  %v6213_v4 = vand.u32 4294901760, %v6212_v25  ;;  %v5980_v25 = vld [vmem:[%s12471_s4 + $0x28] sm:$0xff]  ;;  %12901 = vst [vmem:[#allocation62_spill] sm:$0xff] %v11272_v12 }
 0x816   :  { %8016 = vmatpush3.msra.mxu1 %v6199_v20  ;;  %7985 = vmatprep.subr.mxu0 %v11188_v18  ;;  %v11240_v20 = vand.u32 4294901760, %v5982_v46  ;;  %v6338_v21 = vsub.f32 %v11206_v29, %v12566_v48  ;;  %v5995_v48 = vld [vmem:[%s12471_s4 + $0xa0] sm:$0xff]  ;;  %v11282_v39 = vand.u32 4294901760, %v5980_v25 }
 0x817   :  { %8017 = vmatprep.subr.mxu1 %v6318_v13  ;;  %7986 = vmatpush3.msra.mxu0 %v11198_v9  ;;  %v6332_v13 = vand.u32 4294901760, %v6331_v33  ;;  %v11260_v33 = vand.u32 4294901760, %v5981_v45  ;;  %v11292_v43 = vand.u32 4294901760, %v5995_v48 }
 0x818   :  { %7987 = vmatprep.subr.mxu0 %v11208_v34  ;;  %8018 = vmatpush3.msra.mxu1 %v6206_v26  ;;  %v11249_v26 = vand.u32 4294901760, %v5997_v62  ;;  %v6339_v11 = vand.u32 4294901760, %v6338_v21  ;;  %12903 = vst [vmem:[#allocation65_spill] sm:$0xff] %v11282_v39  ;;  %v11300_v55 = vsub.f32 %v5980_v25, %v11282_v39  ;;  %v5978_v25 = vld [vmem:[%s12471_s4 + $0x18] sm:$0xff] }
 0x819   :  { %8019 = vmatprep.subr.mxu1 %v6325_v6  ;;  %v11258_v6 = vsub.f32 %v5982_v46, %v11240_v20  ;;  %12899 = vst [vmem:[#allocation48_spill] sm:$0xff] %v11260_v33  ;;  %7988 = vmatpush3.msra.mxu0 %v11240_v20  ;;  %v5979_v46 = vld [vmem:[%s12471_s4 + $0x20] sm:$0xff]  ;;  %v11280_v21 = vsub.f32 %v5981_v45, %v11260_v33  ;;  %12905 = vst [vmem:[#allocation50_spill] sm:$0xff] %v11292_v43 }
 0x81a   :  { %8020 = vmatpush3.msra.mxu1 %v6213_v4  ;;  %v6345_v4 = vsub.f32 %v11230_v3, %v12571_v30  ;;  %v11270_v1 = vsub.f32 %v5997_v62, %v11249_v26  ;;  %7989 = vmatprep.subr.mxu0 %v11249_v26  ;;  %v5994_v62 = vld [vmem:[%s12471_s4 + $0x98] sm:$0xff]  ;;  %12906 = vst [vmem:[#allocation68_spill] sm:$0xff] %v11300_v55  ;;  %v12943_v3 = vld [vmem:[#allocation37_spill] sm:$0xff] }
 0x81b   :  { %12898 = vst [vmem:[#allocation56_spill] sm:$0xff] %v11258_v6  ;;  %8021 = vmatprep.subr.mxu1 %v6332_v13  ;;  %v12575_v13 = vand.u32 4294901760, %v11258_v6  ;;  %12902 = vst [vmem:[#allocation47_spill] sm:$0xff] %v11280_v21  ;;  %7990 = vmatpush3.msra.mxu0 %v11260_v33  ;;  %v12581_v27 = vand.u32 4294901760, %v11280_v21 }
 0x81c   :  { %12900 = vst [vmem:[#allocation58_spill] sm:$0xff] %v11270_v1  ;;  %8022 = vmatpush3.msra.mxu1 %v6220_v0  ;;  %v6346_v30 = vand.u32 4294901760, %v6345_v4  ;;  %v12577_v32 = vand.u32 4294901760, %v11270_v1  ;;  %v11290_v0 = vsub.f32 %v5996_v44, %v11272_v12  ;;  %7991 = vmatprep.subr.mxu0 %v11272_v12  ;;  %v11310_v4 = vsub.f32 %v5995_v48, %v11292_v43  ;;  %v5993_v48 = vld [vmem:[%s12471_s4 + $0x90] sm:$0xff] }
 0x81d   :  { %8023 = vmatprep.subr.mxu1 %v6339_v11  ;;  %v6233_v45 = vsub.f32 %v11258_v6, %v12575_v13  ;;  %v11302_v11 = vand.u32 4294901760, %v5979_v46  ;;  %7992 = vmatpush3.msra.mxu0 %v11282_v39  ;;  %v11312_v13 = vand.u32 4294901760, %v5994_v62  ;;  %v12947_v39 = vld [vmem:[#allocation35_spill] sm:$0xff] }
 0x81e   :  { %12904 = vst [vmem:[#allocation70_spill] sm:$0xff] %v11290_v0  ;;  %8024 = vmatpush3.msra.mxu1 %v6227_v61  ;;  %v6352_v44 = vsub.f32 %v11270_v1, %v12577_v32  ;;  %v12584_v61 = vand.u32 4294901760, %v11290_v0  ;;  %12908 = vst [vmem:[#allocation52_spill] sm:$0xff] %v11310_v4  ;;  %7993 = vmatprep.subr.mxu0 %v11292_v43  ;;  %v12589_v32 = vand.u32 4294901760, %v11300_v55 }
 0x81f   :  { %12907 = vst [vmem:[#allocation76_spill] sm:$0xff] %v11302_v11  ;;  %8025 = vmatprep.subr.mxu1 %v6346_v30  ;;  %12909 = vst [vmem:[#allocation63_spill] sm:$0xff] %v11312_v13  ;;  %v6234_v31 = vand.u32 4294901760, %v6233_v45  ;;  %v6240_v30 = vsub.f32 %v11280_v21, %v12581_v27  ;;  %v11323_v36 = vsub.f32 %v5979_v46, %v11302_v11  ;;  %7994 = vmatpush3.msra.mxu0 %v11302_v11  ;;  %v5977_v46 = vld [vmem:[%s12471_s4 + $0x10] sm:$0xff] }
 0x820   :  { %v6353_v8 = vand.u32 4294901760, %v6352_v44  ;;  %v6359_v45 = vsub.f32 %v11290_v0, %v12584_v61  ;;  %v11334_v27 = vsub.f32 %v5994_v62, %v11312_v13  ;;  %7995 = vmatprep.subr.mxu0 %v11312_v13  ;;  %v6247_v44 = vsub.f32 %v11300_v55, %v12589_v32  ;;  %v5992_v62 = vld [vmem:[%s12471_s4 + $0x88] sm:$0xff] }
 0x821   :  { %12910 = vst [vmem:[#allocation78_spill] sm:$0xff] %v11323_v36  ;;  %8026 = vmatpush3.msra.mxu1 %v6234_v31  ;;  %v6241_v35 = vand.u32 4294901760, %v6240_v30  ;;  %v11344_v61 = vand.u32 4294901760, %v5978_v25  ;;  %v12913_v0 = vand.u32 4294901760, %v11310_v4  ;;  %v11353_v30 = vand.u32 4294901760, %v5993_v48  ;;  %v5976_v32 = vld [vmem:[%s12471_s4 + $0x8] sm:$0xff] }
 0x822   :  { %12911 = vst [vmem:[#allocation57_spill] sm:$0xff] %v11334_v27  ;;  %8027 = vmatprep.subr.mxu1 %v6353_v8  ;;  %v6360_v60 = vand.u32 4294901760, %v6359_v45  ;;  %v6248_v56 = vand.u32 4294901760, %v6247_v44  ;;  %v12915_v55 = vand.u32 4294901760, %v11323_v36  ;;  %v11364_v45 = vand.u32 4294901760, %v5977_v46 }
 0x823   :  { %12912 = vst [vmem:[#allocation73_spill] sm:$0xff] %v11344_v61  ;;  %v6366_v21 = vsub.f32 %v11310_v4, %v12913_v0  ;;  %12914 = vst [vmem:[#allocation77_spill] sm:$0xff] %v11353_v30  ;;  %8028 = vmatpush3.msra.mxu1 %v6241_v35  ;;  %v11362_v8 = vsub.f32 %v5978_v25, %v11344_v61  ;;  %v5991_v0 = vld [vmem:[%s12471_s4 + $0x80] sm:$0xff]  ;;  %7996 = vmatpush3.msra.mxu0 %v11344_v61  ;;  %v12918_v35 = vand.u32 4294901760, %v11334_v27 }
 0x824   :  { %v6254_v1 = vsub.f32 %v11323_v36, %v12915_v55  ;;  %12917 = vst [vmem:[#allocation79_spill] sm:$0xff] %v11364_v45  ;;  %8029 = vmatprep.subr.mxu1 %v6360_v60  ;;  %v11374_v4 = vsub.f32 %v5993_v48, %v11353_v30  ;;  %v11376_v55 = vand.u32 4294901760, %v5992_v62  ;;  %v5975_v25 = vld [vmem:[%s12471_s4] sm:$0xff]  ;;  %7997 = vmatprep.subr.mxu0 %v11353_v30  ;;  %v11386_v61 = vand.u32 4294901760, %v5976_v32 }
 0x825   :  { %12916 = vst [vmem:[#allocation51_spill] sm:$0xff] %v11362_v8  ;;  %v6367_v31 = vand.u32 4294901760, %v6366_v21  ;;  %v6373_v44 = vsub.f32 %v11334_v27, %v12918_v35  ;;  %8030 = vmatpush3.msra.mxu1 %v6248_v56  ;;  %v12604_v60 = vand.u32 4294901760, %v11362_v8  ;;  %v11384_v21 = vsub.f32 %v5977_v46, %v11364_v45  ;;  %7998 = vmatpush3.msra.mxu0 %v11364_v45 }
 0x826   :  { %12919 = vst [vmem:[#allocation55_spill] sm:$0xff] %v11374_v4  ;;  %12920 = vst [vmem:[#allocation59_spill] sm:$0xff] %v11376_v55  ;;  %v6255_v36 = vand.u32 4294901760, %v6254_v1  ;;  %v12607_v35 = vand.u32 4294901760, %v11374_v4  ;;  %v11391_v27 = vsub.f32 %v5992_v62, %v11376_v55  ;;  %v11393_v6 = vand.u32 4294901760, %v5991_v0  ;;  %7999 = vmatprep.subr.mxu0 %v11376_v55  ;;  %v12939_v55 = vld [vmem:[#allocation36_spill] sm:$0xff] }
 0x827   :  { %12921 = vst [vmem:[#allocation64_spill] sm:$0xff] %v11384_v21  ;;  %12922 = vst [vmem:[#allocation67_spill] sm:$0xff] %v11386_v61  ;;  %8031 = vmatprep.subr.mxu1 %v6367_v31  ;;  %v6374_v48 = vand.u32 4294901760, %v6373_v44  ;;  %v6261_v56 = vsub.f32 %v11362_v8, %v12604_v60  ;;  %v12610_v1 = vand.u32 4294901760, %v11384_v21  ;;  %v11401_v46 = vsub.f32 %v5976_v32, %v11386_v61 }
 0x828   :  { %12923 = vst [vmem:[#allocation66_spill] sm:$0xff] %v11391_v27  ;;  %12924 = vst [vmem:[#allocation71_spill] sm:$0xff] %v11393_v6  ;;  %8032 = vmatpush3.msra.mxu1 %v6255_v36  ;;  %v11403_v31 = vand.u32 4294901760, %v5975_v25  ;;  %8000 = vmatpush3.msra.mxu0 %v11386_v61  ;;  %v6380_v62 = vsub.f32 %v11374_v4, %v12607_v35  ;;  %v12613_v36 = vand.u32 4294901760, %v11391_v27 }
 0x829   :  { %12925 = vst [vmem:[#allocation60_spill] sm:$0xff] %v11401_v46  ;;  %8033 = vmatprep.subr.mxu1 %v6374_v48  ;;  %v11411_v44 = vsub.f32 %v5991_v0, %v11393_v6  ;;  %8001 = vmatprep.subr.mxu0 %v11393_v6  ;;  %v6262_v60 = vand.u32 4294901760, %v6261_v56  ;;  %v6268_v32 = vsub.f32 %v11384_v21, %v12610_v1  ;;  %v12616_v8 = vand.u32 4294901760, %v11401_v46 }
 0x82a   :  { %12926 = vst [vmem:[#allocation74_spill] sm:$0xff] %v11403_v31  ;;  %v11419_v48 = vsub.f32 %v5975_v25, %v11403_v31  ;;  %8002 = vmatpush3.msra.mxu0 %v11403_v31  ;;  %v6381_v35 = vand.u32 4294901760, %v6380_v62  ;;  %v6387_v0 = vsub.f32 %v11391_v27, %v12613_v36  ;;  %v12936_v27 = vld [vmem:[#allocation25_spill] sm:$0xff] }
 0x82b   :  { %12927 = vst [vmem:[#allocation69_spill] sm:$0xff] %v11411_v44  ;;  %v12615_v4 = vand.u32 4294901760, %v11411_v44  ;;  %8047 = vmatprep.subr.mxu0 %v11023_v5  ;;  %8034 = vmatpush3.msra.mxu1 %v6262_v60  ;;  %v6269_v56 = vand.u32 4294901760, %v6268_v32  ;;  %v6275_v1 = vsub.f32 %v11401_v46, %v12616_v8 }
 0x82c   :  { %12928 = vst [vmem:[#allocation72_spill] sm:$0xff] %v11419_v48  ;;  %v12619_v25 = vand.u32 4294901760, %v11419_v48  ;;  %8035 = vmatprep.subr.mxu1 %v6381_v35  ;;  %v6388_v21 = vand.u32 4294901760, %v6387_v0  ;;  %v8739_v35 = vld [vmem:[%s12469_s2] sm:$0x1f]  ;;  %v12929_v0 = vld [vmem:[#allocation42_spill] sm:$0xff] }
 0x82d   :  { %v6394_v62 = vsub.f32 %v11411_v44, %v12615_v4  ;;  %8036 = vmatpush3.msra.mxu1 %v6269_v56  ;;  %v6276_v36 = vand.u32 4294901760, %v6275_v1  ;;  %v479_v4 = vrot.slane %v8739_v35, %v12929_v0  ;;  %v11442_v56 = vpop.f32.mrf.mxu1  ;;  %v12931_v1 = vld [vmem:[#allocation28_spill] sm:$0xff]  ;;  %v12937_v35 = vld [vmem:[#allocation34_spill] sm:$0xff] }
 0x82e   :  { %v6282_v5 = vsub.f32 %v11419_v48, %v12619_v25  ;;  %8037 = vmatprep.subr.mxu1 %v6388_v21  ;;  %12930 = vst [vmem:[#allocation75_spill] sm:$0xff] %v11442_v56  ;;  %v12932_v25 = vld [vmem:[#allocation30_spill] sm:$0xff]  ;;  %v11448_v48 = vpop.f32.mrf.mxu0  ;;  %v12938_v56 = vld [vmem:[#allocation29_spill] sm:$0xff] }
 0x82f   :  { %v6395_v60 = vand.u32 4294901760, %v6394_v62  ;;  %8038 = vmatpush3.msra.mxu1 %v6276_v36  ;;  %v1157_v8 = vadd.f32 %v12931_v1, %v479_v4  ;;  %v1168_v21 = vadd.f32 %v12932_v25, %v479_v4  ;;  %v12933_v62 = vld [vmem:[#allocation23_spill] sm:$0xff]  ;;  %12935 = vst [vmem:[#allocation7_spill] sm:$0xff] %v11448_v48 }
 0x830   :  { %v6283_v32 = vand.u32 4294901760, %v6282_v5 }
 0x831   :  { %8039 = vmatprep.subr.mxu1 %v6395_v60  ;;  %v1250_v36 = vadd.f32 %v12933_v62, %v1157_v8  ;;  %v12934_v60 = vld [vmem:[#allocation32_spill] sm:$0xff]  ;;  %v12941_v62 = vld [vmem:[#allocation26_spill] sm:$0xff] }
 0x832   :  { %8040 = vmatpush3.msra.mxu1 %v6283_v32  ;;  %v12940_v8 = vld [vmem:[#allocation24_spill] sm:$0xff] }
 0x833   :  { %8085 = vmatprep.subr.mxu1 %v11015_v19  ;;  %v1334_v32 = vadd.f32 %v12934_v60, %v1250_v36  ;;  %v1257_v19 = vadd.f32 %v12936_v27, %v1168_v21  ;;  %v1000_v30 = vadd.f32 %v12941_v62, %v12940_v8  ;;  %v12942_v36 = vld [vmem:[#allocation31_spill] sm:$0xff] }
 0x834   :  { %v12944_v21 = vld [vmem:[#allocation27_spill] sm:$0xff] }
 0x835   :  { %v1342_v0 = vadd.f32 %v12937_v35, %v1257_v19  ;;  %v1418_v61 = vadd.f32 %v12938_v56, %v1334_v32  ;;  %v12946_v32 = vld [vmem:[#allocation22_spill] sm:$0xff] }
 0x836   :  { %v1081_v43 = vadd.f32 %v12946_v32, %v1000_v30 }
 0x837   :  { %v1505_v45 = vadd.f32 %v12939_v55, %v1418_v61  ;;  %v1427_v60 = vadd.f32 %v12942_v36, %v1342_v0 }
 0x839   :  { %v1512_v27 = vadd.f32 %v12943_v3, %v1427_v60  ;;  %v1586_v19 = vadd.f32 %v12945_v54, %v1505_v45 }
 0x83b   :  { %v1593_v57 = vadd.f32 %v12947_v39, %v1512_v27 }
 0x87e   :  { %v5065_v44 = vpop.f32.mrf.mxu1 }
 0x880   :  { %v5067_v5 = vpop.f32.mrf.mxu1 }
 0x886   :  { %v4962_v31 = vpop.f32.mrf.mxu0 }
 0x887   :  { %v4963_v11 = vadd.f32 %v4962_v31, %v12944_v21 }
 0x888   :  { %v4964_v4 = vpop.f32.mrf.mxu0 }
 0x889   :  { %v4965_v56 = vadd.f32 %v4964_v4, %v1586_v19  ;;  %v5066_v8 = vadd.f32 %v5065_v44, %v4963_v11 }
 0x88b   :  { %v5068_v12 = vadd.f32 %v5067_v5, %v4965_v56 }
 0x89a   :  { %v5072_v46 = vpop.f32.mrf.mxu1 }
 0x89c   :  { %v5074_v6 = vpop.f32.mrf.mxu1 }
 0x89e   :  { %v5239_v1 = vpop.f32.mrf.mxu1 }
 0x8a0   :  { %v5241_v25 = vpop.f32.mrf.mxu1 }
 0x8a2   :  { %v4973_v48 = vpop.f32.mrf.mxu0  ;;  %v5248_v13 = vpop.f32.mrf.mxu1 }
 0x8a3   :  { %v4974_v29 = vadd.f32 %v4973_v48, %v1081_v43 }
 0x8a4   :  { %v4975_v35 = vpop.f32.mrf.mxu0  ;;  %v5250_v61 = vpop.f32.mrf.mxu1 }
 0x8a5   :  { %v4976_v0 = vadd.f32 %v4975_v35, %v1593_v57  ;;  %v5073_v31 = vadd.f32 %v5072_v46, %v4974_v29 }
 0x8a6   :  { %v5153_v55 = vpop.f32.mrf.mxu0  ;;  %v5415_v16 = vpop.f32.mrf.mxu1 }
 0x8a7   :  { %v5154_v36 = vadd.f32 %v5153_v55, %v5066_v8  ;;  %v5075_v45 = vadd.f32 %v5074_v6, %v4976_v0 }
 0x8a8   :  { %v5155_v62 = vpop.f32.mrf.mxu0  ;;  %v5417_v19 = vpop.f32.mrf.mxu1 }
 0x8a9   :  { %v5156_v60 = vadd.f32 %v5155_v62, %v5068_v12  ;;  %v5240_v4 = vadd.f32 %v5239_v1, %v5154_v36 }
 0x8aa   :  { %v5161_v3 = vpop.f32.mrf.mxu0  ;;  %v5422_v57 = vpop.f32.mrf.mxu1 }
 0x8ab   :  { %v5162_v54 = vadd.f32 %v5161_v3, %v5073_v31  ;;  %v5242_v43 = vadd.f32 %v5241_v25, %v5156_v60 }
 0x8ac   :  { %v5163_v21 = vpop.f32.mrf.mxu0  ;;  %v5424_v8 = vpop.f32.mrf.mxu1 }
 0x8ad   :  { %v5164_v32 = vadd.f32 %v5163_v21, %v5075_v45  ;;  %v5249_v44 = vadd.f32 %v5248_v13, %v5162_v54 }
 0x8ae   :  { %v5332_v30 = vpop.f32.mrf.mxu0 }
 0x8af   :  { %v5333_v33 = vadd.f32 %v5332_v30, %v5240_v4  ;;  %v5251_v12 = vadd.f32 %v5250_v61, %v5164_v32 }
 0x8b0   :  { %v5334_v48 = vpop.f32.mrf.mxu0 }
 0x8b1   :  { %v5416_v39 = vadd.f32 %v5415_v16, %v5333_v33  ;;  %v5335_v11 = vadd.f32 %v5334_v48, %v5242_v43 }
 0x8b2   :  { %v5339_v27 = vpop.f32.mrf.mxu0 }
 0x8b3   :  { %v5967_v5 = vmax.f32 %v5416_v39, 0.0  ;;  %v5418_v35 = vadd.f32 %v5417_v19, %v5335_v11  ;;  %v5340_v56 = vadd.f32 %v5339_v27, %v5249_v44 }
 0x8b4   :  { %v5341_v29 = vpop.f32.mrf.mxu0 }
 0x8b5   :  { %v11462_v46 = vand.u32 4294901760, %v5967_v5  ;;  %v5968_v6 = vmax.f32 %v5418_v35, 0.0  ;;  %v5423_v1 = vadd.f32 %v5422_v57, %v5340_v56  ;;  %v5342_v55 = vadd.f32 %v5341_v29, %v5251_v12  ;;  %v12952_v57 = vld [vmem:[#allocation48_spill] sm:$0xff]  ;;  %v12954_v35 = vld [vmem:[#allocation62_spill] sm:$0xff]  ;;  %v12955_v56 = vld [vmem:[#allocation43_spill] sm:$0xff]  ;;  %v11534_v29 = vpop.f32.mrf.mxu1 }
 0x8b6   :  { %v11518_v44 = vpop.f32.mrf.mxu0  ;;  %v12956_v12 = vld [vmem:[#allocation65_spill] sm:$0xff]  ;;  %12957 = vst [vmem:[#allocation11_spill] sm:$0xff] %v11534_v29  ;;  %v12978_v29 = vld [vmem:[#allocation71_spill] sm:$0xff] }
 0x8b7   :  { %12948 = vst [vmem:[#allocation6_spill] sm:$0xff] %v11462_v46  ;;  %v11465_v62 = vsub.f32 %v5967_v5, %v11462_v46  ;;  %v11467_v25 = vand.u32 4294901760, %v5968_v6  ;;  %v5971_v16 = vmax.f32 %v5423_v1, 0.0  ;;  %v5425_v33 = vadd.f32 %v5424_v8, %v5342_v55  ;;  %12951 = vst [vmem:[#allocation10_spill] sm:$0xff] %v11518_v44  ;;  %v12953_v5 = vld [vmem:[#allocation45_spill] sm:$0xff]  ;;  %v12959_v1 = vld [vmem:[#allocation50_spill] sm:$0xff] }
 0x8b8   :  { %v11528_v27 = vpop.f32.mrf.mxu0  ;;  %v12960_v55 = vld [vmem:[#allocation54_spill] sm:$0xff]  ;;  %v12961_v8 = vld [vmem:[#allocation76_spill] sm:$0xff] }
 0x8b9   :  { %v12663_v13 = vand.u32 4294901760, %v11465_v62  ;;  %v6143_v0 = vsub.f32 %v5968_v6, %v11467_v25  ;;  %v11471_v36 = vand.u32 4294901760, %v5971_v16  ;;  %v5972_v61 = vmax.f32 %v5425_v33, 0.0  ;;  %6398 = vmatprep.mubr.f32.mxu1 %v11467_v25  ;;  %v12958_v6 = vld [vmem:[#allocation49_spill] sm:$0xff]  ;;  %v12980_v44 = vld [vmem:[#allocation74_spill] sm:$0xff] }
 0x8ba   :  { %6400 = vmatmul.mubr.f32.vlgmr.msra.gmra.mxu1 %v11462_v46  ;;  %v12963_v33 = vld [vmem:[#allocation53_spill] sm:$0xff]  ;;  %v12983_v46 = vand.u32 4294901760, %v11465_v62 }
 0x8bb   :  { %12949 = vst [vmem:[#allocation8_spill] sm:$0xff] %v11471_v36  ;;  %v11476_v3 = vsub.f32 %v5971_v16, %v11471_v36  ;;  %v11478_v60 = vand.u32 4294901760, %v5972_v61  ;;  %8086 = vmatpush3.msra.mxu1 %v11036_v52  ;;  %v6144_v31 = vand.u32 4294901760, %v6143_v0  ;;  %v6151_v21 = vsub.f32 %v11465_v62, %v12663_v13  ;;  %v11540_v16 = vpop.f32.mrf.mxu0 }
 0x8bc   :  { %8087 = vmatprep.subr.mxu1 %v11041_v58  ;;  %12962 = vst [vmem:[#allocation12_spill] sm:$0xff] %v11540_v16  ;;  %v12977_v16 = vld [vmem:[#allocation52_spill] sm:$0xff] }
 0x8bd   :  { %12950 = vst [vmem:[#allocation9_spill] sm:$0xff] %v11478_v60  ;;  %v11486_v54 = vsub.f32 %v5972_v61, %v11478_v60  ;;  %8088 = vmatpush3.msra.mxu1 %v11049_v28  ;;  %6405 = vmatprep.mubr.f32.mxu1 %v11478_v60  ;;  %v6145_v45 = vsub.f32 %v6143_v0, %v6144_v31  ;;  %v12661_v4 = vand.u32 4294901760, %v11476_v3  ;;  %v6152_v32 = vand.u32 4294901760, %v6151_v21  ;;  %v12965_v61 = vld [vmem:[#allocation56_spill] sm:$0xff]  ;;  %v11546_v21 = vpop.f32.mrf.mxu1 }
 0x8be   :  { %8089 = vmatprep.subr.mxu1 %v11058_v2  ;;  %6407 = vmatmul.mubr.f32.gmra.mxu1 %v11471_v36  ;;  %v12979_v36 = vld [vmem:[#allocation78_spill] sm:$0xff] }
 0x8bf   :  { %8090 = vmatpush3.msra.mxu1 %v11068_v38  ;;  %6658 = vmatprep.mubr.f32.mxu1 %v6144_v31  ;;  %v12662_v19 = vand.u32 4294901760, %v11486_v54  ;;  %v6146_v30 = vand.u32 4294901760, %v6145_v45  ;;  %v6166_v48 = vsub.f32 %v11476_v3, %v12661_v4  ;;  %v12966_v31 = vld [vmem:[#allocation73_spill] sm:$0xff]  ;;  %v12967_v45 = vld [vmem:[#allocation58_spill] sm:$0xff]  ;;  %v12974_v4 = vld [vmem:[#allocation68_spill] sm:$0xff]  ;;  %v11558_v13 = vpop.f32.mrf.mxu1 }
 0x8c0   :  { %8091 = vmatprep.subr.mxu1 %v11078_v51  ;;  %12976 = vst [vmem:[#allocation17_spill] sm:$0xff] %v11558_v13 }
 0x8c1   :  { %8092 = vmatpush3.msra.mxu1 %v11091_v47  ;;  %v6160_v43 = vsub.f32 %v11486_v54, %v12662_v19  ;;  %6147 = vmatprep.mubr.f32.mxu0 %v6146_v30  ;;  %v6167_v11 = vand.u32 4294901760, %v6166_v48  ;;  %v12968_v30 = vld [vmem:[#allocation77_spill] sm:$0xff]  ;;  %v11552_v48 = vpop.f32.mrf.mxu0  ;;  %v12975_v19 = vld [vmem:[#allocation67_spill] sm:$0xff]  ;;  %v11571_v13 = vpop.f32.mrf.mxu1 }
 0x8c2   :  { %8093 = vmatprep.subr.mxu1 %v11104_v50  ;;  %6153 = vmatmul.mubr.f32.vlgmr.msra.gmra.mxu0 %v6152_v32  ;;  %v12969_v32 = vld [vmem:[#allocation47_spill] sm:$0xff]  ;;  %12971 = vst [vmem:[#allocation14_spill] sm:$0xff] %v11552_v48  ;;  %v12982_v48 = vld [vmem:[#allocation57_spill] sm:$0xff]  ;;  %12986 = vst [vmem:[#allocation15_spill] sm:$0xff] %v11571_v13 }
 0x8c3   :  { %8094 = vmatpush3.msra.mxu1 %v11136_v40  ;;  %v6161_v39 = vand.u32 4294901760, %v6160_v43  ;;  %8048 = vmatpush3.msra.mxu0 %v11047_v7  ;;  %v12970_v43 = vld [vmem:[#allocation79_spill] sm:$0xff]  ;;  %v11564_v60 = vpop.f32.mrf.mxu0 }
 0x8c4   :  { %8095 = vmatprep.subr.mxu1 %v11145_v63  ;;  %8049 = vmatprep.subr.mxu0 %v11056_v14  ;;  %12981 = vst [vmem:[#allocation13_spill] sm:$0xff] %v11564_v60  ;;  %v6038_v60 = vld [vmem:[%s12471_s4 + $0x1f8] sm:$0xff] }
 0x8c5   :  { %8096 = vmatpush3.msra.mxu1 %v11156_v59  ;;  %8050 = vmatpush3.msra.mxu0 %v11066_v17  ;;  %v12991_v13 = vld [vmem:[#allocation7_spill] sm:$0xff] }
 0x8c6   :  { %6162 = vmatprep.mubr.f32.mxu0 %v6161_v39  ;;  %8051 = vmatprep.subr.mxu0 %v11076_v42  ;;  %v12972_v39 = vld [vmem:[#allocation70_spill] sm:$0xff] }
 0x8c7   :  { %8097 = vmatprep.subr.mxu1 %v11168_v53  ;;  %6168 = vmatmul.mubr.f32.gmra.mxu0 %v6167_v11  ;;  %v12973_v11 = vld [vmem:[#allocation59_spill] sm:$0xff] }
 0x8c8   :  { %8098 = vmatpush3.msra.mxu1 %v11178_v41  ;;  %8052 = vmatpush3.msra.mxu0 %v11089_v10 }
 0x8c9   :  { %6542 = vmatprep.mubr.f32.mxu0 %v6143_v0  ;;  %8053 = vmatprep.subr.mxu0 %v11102_v24  ;;  %v12964_v0 = vld [vmem:[#allocation63_spill] sm:$0xff] }
 0x8ca   :  { %8099 = vmatprep.subr.mxu1 %v11188_v18  ;;  %8054 = vmatpush3.msra.mxu0 %v11115_v37 }
 0x8cb   :  { %8100 = vmatpush3.msra.mxu1 %v11198_v9  ;;  %8055 = vmatprep.subr.mxu0 %v11126_v49 }
 0x8cc   :  { %8101 = vmatprep.subr.mxu1 %v11208_v34  ;;  %8056 = vmatpush3.msra.mxu0 %v11154_v15 }
 0x8cd   :  { %8102 = vmatpush3.msra.mxu1 %v11240_v20  ;;  %8057 = vmatprep.subr.mxu0 %v11166_v23 }
 0x8ce   :  { %8103 = vmatprep.subr.mxu1 %v11249_v26  ;;  %8058 = vmatpush3.msra.mxu0 %v11176_v22 }
 0x8cf   :  { %8104 = vmatpush3.msra.mxu1 %v12952_v57  ;;  %8059 = vmatprep.subr.mxu0 %v12953_v5 }
 0x8d0   :  { %8105 = vmatprep.subr.mxu1 %v12954_v35  ;;  %8060 = vmatpush3.msra.mxu0 %v12955_v56 }
 0x8d1   :  { %8106 = vmatpush3.msra.mxu1 %v12956_v12  ;;  %8061 = vmatprep.subr.mxu0 %v12958_v6 }
 0x8d2   :  { %8107 = vmatprep.subr.mxu1 %v12959_v1  ;;  %8062 = vmatpush3.msra.mxu0 %v12960_v55 }
 0x8d3   :  { %8108 = vmatpush3.msra.mxu1 %v12961_v8  ;;  %8063 = vmatprep.subr.mxu0 %v12963_v33 }
 0x8d4   :  { %8109 = vmatprep.subr.mxu1 %v12964_v0  ;;  %8064 = vmatpush3.msra.mxu0 %v12965_v61 }
 0x8d5   :  { %8110 = vmatpush3.msra.mxu1 %v12966_v31  ;;  %8065 = vmatprep.subr.mxu0 %v12967_v45 }
 0x8d6   :  { %8111 = vmatprep.subr.mxu1 %v12968_v30  ;;  %8066 = vmatpush3.msra.mxu0 %v12969_v32 }
 0x8d7   :  { %8112 = vmatpush3.msra.mxu1 %v12970_v43  ;;  %8067 = vmatprep.subr.mxu0 %v12972_v39 }
 0x8d8   :  { %8113 = vmatprep.subr.mxu1 %v12973_v11  ;;  %8068 = vmatpush3.msra.mxu0 %v12974_v4  ;;  %v12984_v4 = vld [vmem:[#allocation46_spill] sm:$0xff]  ;;  %v13000_v11 = vld [vmem:[#allocation44_spill] sm:$0xff] }
 0x8d9   :  { %8114 = vmatpush3.msra.mxu1 %v12975_v19  ;;  %8069 = vmatprep.subr.mxu0 %v12977_v16  ;;  %v12985_v19 = vld [vmem:[#allocation51_spill] sm:$0xff]  ;;  %v12987_v16 = vand.u32 4294901760, %v11486_v54  ;;  %v13001_v39 = vand.u32 4294901760, %v13000_v11 }
 0x8da   :  { %8115 = vmatprep.subr.mxu1 %v12978_v29  ;;  %8070 = vmatpush3.msra.mxu0 %v12979_v36  ;;  %v12988_v36 = vld [vmem:[#allocation55_spill] sm:$0xff] }
 0x8db   :  { %8116 = vmatpush3.msra.mxu1 %v12980_v44  ;;  %8071 = vmatprep.subr.mxu0 %v12982_v48  ;;  %v12989_v48 = vld [vmem:[#allocation64_spill] sm:$0xff] }
 0x8dc   :  { %6662 = vmatmul.mubr.f32.vlgmr.msra.gmra.mxu1 %v12983_v46  ;;  %8161 = vmatprep.subr.mxu1 %v12984_v4  ;;  %v5695_v46 = vpop.f32.mrf.mxu0  ;;  %v6022_v4 = vld [vmem:[%s12471_s4 + $0x178] sm:$0xff]  ;;  %v12995_v44 = vld [vmem:[#allocation60_spill] sm:$0xff] }
 0x8dd   :  { %8072 = vmatpush3.msra.mxu0 %v12985_v19  ;;  %6669 = vmatprep.mubr.f32.mxu1 %v12987_v16  ;;  %v12990_v16 = vld [vmem:[#allocation40_spill] sm:$0xff]  ;;  %v12992_v19 = vld [vmem:[#allocation66_spill] sm:$0xff] }
 0x8de   :  { %8162 = vmatpush3.msra.mxu1 %v11036_v52  ;;  %8073 = vmatprep.subr.mxu0 %v12988_v36  ;;  %v1999_v52 = vadd.f32 %v12991_v13, %v12990_v16  ;;  %v11591_v36 = vpop.f32.mrf.mxu1  ;;  %v6037_v13 = vld [vmem:[%s12471_s4 + $0x1f0] sm:$0xff] }
 0x8df   :  { %8163 = vmatprep.subr.mxu1 %v11041_v58  ;;  %8074 = vmatpush3.msra.mxu0 %v12989_v48  ;;  %v12993_v58 = vand.u32 4294901760, %v11476_v3  ;;  %12994 = vst [vmem:[#allocation18_spill] sm:$0xff] %v11591_v36  ;;  %v11595_v48 = vand.u32 4294901760, %v6038_v60  ;;  %v6021_v16 = vld [vmem:[%s12471_s4 + $0x170] sm:$0xff]  ;;  %v12998_v36 = vld [vmem:[#allocation75_spill] sm:$0xff] }
 0x8e0   :  { %8164 = vmatpush3.msra.mxu1 %v11049_v28  ;;  %8075 = vmatprep.subr.mxu0 %v12992_v19  ;;  %v11599_v28 = vand.u32 4294901760, %v6022_v4  ;;  %v12999_v19 = vld [vmem:[#allocation72_spill] sm:$0xff]  ;;  %v5781_v29 = vpop.f32.mrf.mxu1 }
 0x8e1   :  { %6673 = vmatmul.mubr.f32.gmra.mxu1 %v12993_v58  ;;  %8165 = vmatprep.subr.mxu1 %v11058_v2  ;;  %v11607_v58 = vpop.f32.mrf.mxu0  ;;  %v12997_v2 = vld [vmem:[#allocation69_spill] sm:$0xff] }
 0x8e2   :  { %8076 = vmatpush3.msra.mxu0 %v12995_v44  ;;  %8166 = vmatpush3.msra.mxu1 %v11068_v38  ;;  %12996 = vst [vmem:[#allocation16_spill] sm:$0xff] %v11607_v58  ;;  %v6036_v38 = vld [vmem:[%s12471_s4 + $0x1e8] sm:$0xff]  ;;  %v2077_v44 = vadd.f32 %v12998_v36, %v1999_v52  ;;  %v11621_v58 = vsub.f32 %v6038_v60, %v11595_v48  ;;  %v13004_v60 = vand.u32 4294901760, %v11047_v7 }
 0x8e3   :  { %6950 = vmatprep.mubr.f32.mxu1 %v11467_v25  ;;  %8077 = vmatprep.subr.mxu0 %v12997_v2  ;;  %v11625_v2 = vand.u32 4294901760, %v6021_v16  ;;  %v11635_v36 = vpop.f32.mrf.mxu0 }
 0x8e4   :  { %8167 = vmatprep.subr.mxu1 %v11078_v51  ;;  %8078 = vmatpush3.msra.mxu0 %v12999_v19  ;;  %13002 = vst [vmem:[#allocation19_spill] sm:$0xff] %v11621_v58  ;;  %v11623_v51 = vand.u32 4294901760, %v6037_v13  ;;  %v5505_v43 = vadd.f32 %v11528_v27, %v2077_v44  ;;  %v13006_v44 = vand.u32 4294901760, %v11066_v17  ;;  %v12674_v7 = vand.u32 4294901760, %v11621_v58 }
 0x8e5   :  { %8168 = vmatpush3.msra.mxu1 %v11091_v47  ;;  %6545 = vmatmul.mubr.f32.vlgmr.msra.gmra.mxu0 %v11465_v62  ;;  %v11631_v47 = vsub.f32 %v6022_v4, %v11599_v28  ;;  %v11633_v62 = vand.u32 4294901760, %v6036_v38  ;;  %v13009_v27 = vand.u32 4294901760, %v11076_v42  ;;  %v13011_v4 = vand.u32 4294901760, %v11089_v10  ;;  %v6034_v10 = vld [vmem:[%s12471_s4 + $0x1d8] sm:$0xff] }
 0x8e6   :  { %8123 = vmatprep.subr.mxu0 %v13001_v39  ;;  %8169 = vmatprep.subr.mxu1 %v11104_v50  ;;  %v13005_v39 = vand.u32 4294901760, %v11056_v14  ;;  %v6020_v50 = vld [vmem:[%s12471_s4 + $0x168] sm:$0xff]  ;;  %v11656_v14 = vsub.f32 %v6021_v16, %v11625_v2  ;;  %v13013_v16 = vand.u32 4294901760, %v11115_v37 }
 0x8e7   :  { %6551 = vmatprep.mubr.f32.mxu0 %v11486_v54  ;;  %13003 = vst [vmem:[#allocation20_spill] sm:$0xff] %v11631_v47  ;;  %8124 = vmatpush3.msra.mxu0 %v13004_v60  ;;  %v11646_v54 = vpop.f32.mrf.mxu1  ;;  %v12673_v17 = vand.u32 4294901760, %v11631_v47  ;;  %v11664_v11 = vsub.f32 %v6036_v38, %v11633_v62  ;;  %v11671_v52 = vand.u32 4294901760, %v6020_v50 }
 0x8e8   :  { %8170 = vmatpush3.msra.mxu1 %v11136_v40  ;;  %8125 = vmatprep.subr.mxu0 %v13005_v39  ;;  %v11653_v40 = vsub.f32 %v6037_v13, %v11623_v51  ;;  %13008 = vst [vmem:[#allocation61_spill] sm:$0xff] %v11656_v14  ;;  %v6018_v13 = vld [vmem:[%s12471_s4 + $0x158] sm:$0xff] }
 0x8e9   :  { %8171 = vmatprep.subr.mxu1 %v11145_v63  ;;  %8126 = vmatpush3.msra.mxu0 %v13006_v44  ;;  %v5608_v63 = vadd.f32 %v11546_v21, %v5505_v43  ;;  %13010 = vst [vmem:[#allocation42_spill] sm:$0xff] %v11664_v11  ;;  %v6019_v21 = vld [vmem:[%s12471_s4 + $0x160] sm:$0xff]  ;;  %v13012_v43 = vand.u32 4294901760, %v11102_v24  ;;  %v6033_v24 = vld [vmem:[%s12471_s4 + $0x1d0] sm:$0xff]  ;;  %v12672_v38 = vand.u32 4294901760, %v11664_v11  ;;  %v13014_v44 = vand.u32 4294901760, %v11126_v49 }
 0x8ea   :  { %8172 = vmatpush3.msra.mxu1 %v11156_v59  ;;  %13007 = vst [vmem:[#allocation21_spill] sm:$0xff] %v11653_v40  ;;  %6554 = vmatmul.mubr.f32.gmra.mxu0 %v11476_v3  ;;  %v11666_v59 = vpop.f32.mrf.mxu0  ;;  %v6035_v3 = vld [vmem:[%s12471_s4 + $0x1e0] sm:$0xff]  ;;  %v11717_v37 = vsub.f32 %v6020_v50, %v11671_v52  ;;  %v6017_v49 = vld [vmem:[%s12471_s4 + $0x150] sm:$0xff]  ;;  %v13017_v50 = vand.u32 4294901760, %v11166_v23  ;;  %v6016_v23 = vld [vmem:[%s12471_s4 + $0x148] sm:$0xff] }
 0x8eb   :  { %8127 = vmatprep.subr.mxu0 %v13009_v27  ;;  %8173 = vmatprep.subr.mxu1 %v11168_v53  ;;  %v5696_v42 = vadd.f32 %v5695_v46, %v5608_v63  ;;  %v11684_v53 = vpop.f32.mrf.mxu1  ;;  %v12670_v46 = vand.u32 4294901760, %v11656_v14  ;;  %v11711_v60 = vand.u32 4294901760, %v6035_v3  ;;  %v11719_v63 = vand.u32 4294901760, %v6019_v21 }
 0x8ec   :  { %8128 = vmatpush3.msra.mxu0 %v13011_v4  ;;  %6839 = vmatprep.mubr.f32.mxu0 %v11467_v25  ;;  %v11692_v25 = vsub.f32 %v11621_v58, %v12674_v7  ;;  %v5874_v39 = vpop.f32.mrf.mxu0  ;;  %13015 = vst [vmem:[#allocation28_spill] sm:$0xff] %v11717_v37  ;;  %v13016_v4 = vand.u32 4294901760, %v11154_v15  ;;  %v13026_v7 = vand.u32 4294901760, %v12958_v6  ;;  %v13086_v58 = vld [vmem:[#allocation64_spill] sm:$0xff] }
 0x8ed   :  { %8174 = vmatpush3.msra.mxu1 %v11178_v41  ;;  %8129 = vmatprep.subr.mxu0 %v13012_v43  ;;  %v12671_v41 = vand.u32 4294901760, %v11653_v40  ;;  %v5782_v27 = vadd.f32 %v5781_v29, %v5696_v42  ;;  %v11726_v43 = vand.u32 4294901760, %v6018_v13  ;;  %v11747_v29 = vsub.f32 %v11656_v14, %v12670_v46  ;;  %v6032_v42 = vld [vmem:[%s12471_s4 + $0x1c8] sm:$0xff] }
 0x8ee   :  { %8175 = vmatprep.subr.mxu1 %v11188_v18  ;;  %8130 = vmatpush3.msra.mxu0 %v13013_v16  ;;  %v11708_v18 = vsub.f32 %v11631_v47, %v12673_v17  ;;  %v11728_v16 = vand.u32 4294901760, %v6033_v24  ;;  %v11765_v46 = vsub.f32 %v6035_v3, %v11711_v60  ;;  %v13023_v17 = vand.u32 4294901760, %v12955_v56  ;;  %v6013_v56 = vld [vmem:[%s12471_s4 + $0x130] sm:$0xff] }
 0x8ef   :  { %8176 = vmatpush3.msra.mxu1 %v11198_v9  ;;  %8131 = vmatprep.subr.mxu0 %v13014_v44  ;;  %v11721_v9 = vand.u32 4294901760, %v6034_v10  ;;  %v13018_v44 = vand.u32 4294901760, %v11176_v22  ;;  %v6015_v22 = vld [vmem:[%s12471_s4 + $0x140] sm:$0xff]  ;;  %v13085_v47 = vld [vmem:[#allocation10_spill] sm:$0xff] }
 0x8f0   :  { %8177 = vmatprep.subr.mxu1 %v11208_v34  ;;  %8132 = vmatpush3.msra.mxu0 %v13016_v4  ;;  %v11733_v34 = vpop.f32.mrf.mxu1  ;;  %13019 = vst [vmem:[#allocation30_spill] sm:$0xff] %v11765_v46  ;;  %v13029_v4 = vand.u32 4294901760, %v12960_v55 }
 0x8f1   :  { %8178 = vmatpush3.msra.mxu1 %v11240_v20  ;;  %8133 = vmatprep.subr.mxu0 %v13017_v50  ;;  %v11742_v20 = vsub.f32 %v11653_v40, %v12671_v41  ;;  %v11762_v50 = vsub.f32 %v11664_v11, %v12672_v38  ;;  %v6031_v41 = vld [vmem:[%s12471_s4 + $0x1c0] sm:$0xff]  ;;  %v11781_v3 = vsub.f32 %v6034_v10, %v11721_v9  ;;  %v6030_v38 = vld [vmem:[%s12471_s4 + $0x1b8] sm:$0xff]  ;;  %v11799_v10 = vand.u32 4294901760, %v6016_v23 }
 0x8f2   :  { %8179 = vmatprep.subr.mxu1 %v11249_v26  ;;  %v5875_v26 = vadd.f32 %v5874_v39, %v5782_v27  ;;  %8134 = vmatpush3.msra.mxu0 %v13018_v44  ;;  %v12675_v39 = vand.u32 4294901760, %v11717_v37  ;;  %v11778_v27 = vsub.f32 %v6019_v21, %v11719_v63  ;;  %v11783_v44 = vand.u32 4294901760, %v6017_v49 }
 0x8f3   :  { %8180 = vmatpush3.msra.mxu1 %v12952_v57  ;;  %v13020_v57 = vand.u32 4294901760, %v12953_v5  ;;  %13022 = vst [vmem:[#allocation32_spill] sm:$0xff] %v11781_v3  ;;  %v11792_v5 = vsub.f32 %v6018_v13, %v11726_v43  ;;  %v11797_v21 = vand.u32 4294901760, %v6032_v42  ;;  %v11808_v13 = vand.u32 4294901760, %v6015_v22 }
 0x8f4   :  { %8181 = vmatprep.subr.mxu1 %v12954_v35  ;;  %13021 = vst [vmem:[#allocation23_spill] sm:$0xff] %v11778_v27  ;;  %v11795_v35 = vsub.f32 %v6033_v24, %v11728_v16  ;;  %v11831_v55 = vsub.f32 %v11717_v37, %v12675_v39  ;;  %v11836_v6 = vsub.f32 %v6017_v49, %v11783_v44  ;;  %v13036_v49 = vand.u32 4294901760, %v12967_v45 }
 0x8f5   :  { %8135 = vmatprep.subr.mxu0 %v13020_v57  ;;  %8182 = vmatpush3.msra.mxu1 %v12956_v12  ;;  %13024 = vst [vmem:[#allocation25_spill] sm:$0xff] %v11792_v5  ;;  %v5957_v57 = vpop.f32.mrf.mxu1  ;;  %13028 = vst [vmem:[#allocation36_spill] sm:$0xff] %v11808_v13  ;;  %v6014_v12 = vld [vmem:[%s12471_s4 + $0x138] sm:$0xff]  ;;  %v11847_v39 = vsub.f32 %v6032_v42, %v11797_v21  ;;  %v11850_v15 = vsub.f32 %v6016_v23, %v11799_v10  ;;  %v13041_v23 = vand.u32 4294901760, %v12969_v32 }
 0x8f6   :  { %8136 = vmatpush3.msra.mxu0 %v13023_v17  ;;  %13025 = vst [vmem:[#allocation34_spill] sm:$0xff] %v11795_v35  ;;  %8183 = vmatprep.subr.mxu1 %v12959_v1  ;;  %v11806_v17 = vand.u32 4294901760, %v6031_v41  ;;  %v11810_v24 = vadd.f32 %v5957_v57, %v5875_v26  ;;  %v11817_v1 = vand.u32 4294901760, %v6030_v38  ;;  %v6029_v26 = vld [vmem:[%s12471_s4 + $0x1b0] sm:$0xff]  ;;  %v13031_v57 = vand.u32 4294901760, %v12963_v33  ;;  %13032 = vst [vmem:[#allocation26_spill] sm:$0xff] %v11836_v6 }
 0x8f7   :  { %8137 = vmatprep.subr.mxu0 %v13026_v7  ;;  %8184 = vmatpush3.msra.mxu1 %v12961_v8  ;;  %v12676_v7 = vand.u32 4294901760, %v11765_v46  ;;  %v12677_v8 = vand.u32 4294901760, %v11778_v27  ;;  %v13033_v33 = vand.u32 4294901760, %v12965_v61  ;;  %13034 = vst [vmem:[#allocation31_spill] sm:$0xff] %v11847_v39  ;;  %13035 = vst [vmem:[#allocation37_spill] sm:$0xff] %v11850_v15  ;;  %v13052_v32 = vand.u32 4294901760, %v11792_v5 }
 0x8f8   :  { %13027 = vst [vmem:[#allocation29_spill] sm:$0xff] %v11806_v17  ;;  %8138 = vmatpush3.msra.mxu0 %v13029_v4  ;;  %13030 = vst [vmem:[#allocation24_spill] sm:$0xff] %v11817_v1  ;;  %8185 = vmatprep.subr.mxu1 %v12964_v0  ;;  %v11856_v61 = vsub.f32 %v6031_v41, %v11806_v17  ;;  %v5970_v42 = vmax.f32 %v11810_v24, 0.0  ;;  %v13042_v0 = vld [vmem:[#allocation79_spill] sm:$0xff]  ;;  %v11877_v41 = vand.u32 4294901760, %v6013_v56  ;;  %v13110_v17 = vand.u32 4294901760, %v12999_v19 }
 0x8f9   :  { %8139 = vmatprep.subr.mxu0 %v13031_v57  ;;  %8186 = vmatpush3.msra.mxu1 %v12966_v31  ;;  %v11859_v31 = vsub.f32 %v6015_v22, %v11808_v13  ;;  %v11863_v57 = vand.u32 4294901760, %v6029_v26  ;;  %v11872_v45 = vsub.f32 %v11765_v46, %v12676_v7  ;;  %v13045_v22 = vld [vmem:[#allocation70_spill] sm:$0xff]  ;;  %v13047_v4 = vld [vmem:[#allocation59_spill] sm:$0xff]  ;;  %v11886_v24 = vsub.f32 %v11778_v27, %v12677_v8  ;;  %v13054_v46 = vld [vmem:[#allocation52_spill] sm:$0xff] }
 0x8fa   :  { %8140 = vmatpush3.msra.mxu0 %v13033_v33  ;;  %8187 = vmatprep.subr.mxu1 %v12968_v30  ;;  %13037 = vst [vmem:[#allocation27_spill] sm:$0xff] %v11856_v61  ;;  %v11861_v33 = vand.u32 4294901760, %v6014_v12  ;;  %v11875_v30 = vsub.f32 %v6030_v38, %v11817_v1  ;;  %13044 = vst [vmem:[#allocation45_spill] sm:$0xff] %v11877_v41  ;;  %v13051_v7 = vld [vmem:[#allocation67_spill] sm:$0xff]  ;;  %v11903_v8 = vsub.f32 %v11792_v5, %v13052_v32  ;;  %v13060_v38 = vld [vmem:[#allocation78_spill] sm:$0xff] }
 0x8fb   :  { %8141 = vmatprep.subr.mxu0 %v13036_v49  ;;  %13038 = vst [vmem:[#allocation33_spill] sm:$0xff] %v11859_v31  ;;  %13040 = vst [vmem:[#allocation35_spill] sm:$0xff] %v11863_v57  ;;  %8188 = vmatpush3.msra.mxu1 %v13042_v0  ;;  %v13046_v49 = vand.u32 4294901760, %v13045_v22  ;;  %v13048_v0 = vand.u32 4294901760, %v11781_v3  ;;  %v6028_v22 = vld [vmem:[%s12471_s4 + $0x1a8] sm:$0xff]  ;;  %v13053_v27 = vand.u32 4294901760, %v11795_v35  ;;  %v11921_v5 = vsub.f32 %v6029_v26, %v11863_v57 }
 0x8fc   :  { %13039 = vst [vmem:[#allocation22_spill] sm:$0xff] %v11861_v33  ;;  %8142 = vmatpush3.msra.mxu0 %v13041_v23  ;;  %13043 = vst [vmem:[#allocation48_spill] sm:$0xff] %v11875_v30  ;;  %8189 = vmatprep.subr.mxu1 %v13047_v4  ;;  %v13055_v37 = vand.u32 4294901760, %v13054_v46  ;;  %v11918_v32 = vsub.f32 %v6014_v12, %v11861_v33  ;;  %v7229_v26 = vand.u32 4294901760, %v11872_v45  ;;  %v7117_v11 = vand.u32 4294901760, %v11886_v24  ;;  %v13070_v46 = vld [vmem:[#allocation51_spill] sm:$0xff] }
 0x8fd   :  { %8143 = vmatprep.subr.mxu0 %v13046_v49  ;;  %v11891_v23 = vsub.f32 %v11781_v3, %v13048_v0  ;;  %v13049_v49 = vld [vmem:[#allocation68_spill] sm:$0xff]  ;;  %8190 = vmatpush3.msra.mxu1 %v13051_v7  ;;  %v11908_v0 = vsub.f32 %v11795_v35, %v13053_v27  ;;  %13058 = vst [vmem:[#allocation43_spill] sm:$0xff] %v11921_v5  ;;  %v11923_v27 = vand.u32 4294901760, %v5970_v42  ;;  %v13061_v35 = vand.u32 4294901760, %v13060_v38  ;;  %v13062_v3 = vld [vmem:[#allocation74_spill] sm:$0xff]  ;;  %v13109_v1 = vld [vmem:[#allocation15_spill] sm:$0xff] }
 0x8fe   :  { %v13050_v4 = vand.u32 4294901760, %v13049_v49  ;;  %v13056_v49 = vld [vmem:[#allocation71_spill] sm:$0xff]  ;;  %13057 = vst [vmem:[#allocation62_spill] sm:$0xff] %v11918_v32  ;;  %v13067_v7 = vld [vmem:[#allocation6_spill] sm:$0xff]  ;;  %v13071_v14 = vand.u32 4294901760, %v13070_v46  ;;  %v13072_v45 = vand.u32 4294901760, %v11847_v39 }
 0x8ff   :  { %8191 = vmatprep.subr.mxu1 %v13056_v49  ;;  %13059 = vst [vmem:[#allocation65_spill] sm:$0xff] %v11923_v27  ;;  %v11932_v49 = vand.u32 4294901760, %v6028_v22  ;;  %v13074_v46 = vld [vmem:[#allocation9_spill] sm:$0xff]  ;;  %v13095_v57 = vld [vmem:[#allocation8_spill] sm:$0xff] }
 0x900   :  { %8144 = vmatpush3.msra.mxu0 %v13050_v4  ;;  %8192 = vmatpush3.msra.mxu1 %v13062_v3  ;;  %v13065_v4 = vld [vmem:[#allocation57_spill] sm:$0xff]  ;;  %v13068_v3 = vand.u32 4294901760, %v11836_v6  ;;  %v11954_v24 = vsub.f32 %v11847_v39, %v13072_v45  ;;  %v13076_v45 = vand.u32 4294901760, %v11856_v61  ;;  %v13092_v39 = vld [vmem:[#allocation14_spill] sm:$0xff] }
 0x901   :  { %8145 = vmatprep.subr.mxu0 %v13055_v37  ;;  %v11930_v37 = vsub.f32 %v6013_v56, %v11877_v41  ;;  %13064 = vst [vmem:[#allocation50_spill] sm:$0xff] %v11932_v49  ;;  %v13066_v12 = vand.u32 4294901760, %v13065_v4  ;;  %6952 = vmatmul.mubr.f32.vlgmr.msra.gmra.mxu1 %v13067_v7  ;;  %v13069_v56 = vand.u32 4294901760, %v11692_v25  ;;  %v6012_v25 = vld [vmem:[%s12471_s4 + $0x128] sm:$0xff]  ;;  %v13087_v41 = vand.u32 4294901760, %v13086_v58 }
 0x902   :  { %8146 = vmatpush3.msra.mxu0 %v13061_v35  ;;  %v11943_v38 = vsub.f32 %v11836_v6, %v13068_v3  ;;  %v13073_v35 = vand.u32 4294901760, %v11850_v15  ;;  %6957 = vmatprep.mubr.f32.mxu1 %v13074_v46  ;;  %v6011_v6 = vld [vmem:[%s12471_s4 + $0x120] sm:$0xff]  ;;  %v13100_v58 = vand.u32 4294901760, %v11921_v5 }
 0x903   :  { %13063 = vst [vmem:[#allocation49_spill] sm:$0xff] %v11930_v37  ;;  %8147 = vmatprep.subr.mxu0 %v13066_v12  ;;  %8237 = vmatprep.subr.mxu1 %v13069_v56  ;;  %v13075_v56 = vand.u32 4294901760, %v11708_v18  ;;  %v11973_v12 = vsub.f32 %v11856_v61, %v13076_v45  ;;  %v11986_v18 = vsub.f32 %v5970_v42, %v11923_v27  ;;  %v13081_v45 = vand.u32 4294901760, %v11742_v20  ;;  %v13084_v61 = vld [vmem:[#allocation38_spill] sm:$0xff] }
 0x904   :  { %8148 = vmatpush3.msra.mxu0 %v13071_v14  ;;  %v11959_v3 = vsub.f32 %v11850_v15, %v13073_v35  ;;  %v6027_v14 = vld [vmem:[%s12471_s4 + $0x1a0] sm:$0xff]  ;;  %v13077_v35 = vand.u32 4294901760, %v11859_v31  ;;  %v11999_v15 = vsub.f32 %v6028_v22, %v11932_v49  ;;  %v5503_v42 = vadd.f32 %v13085_v47, %v13084_v61  ;;  %v13093_v22 = vld [vmem:[#allocation66_spill] sm:$0xff] }
 0x905   :  { %8238 = vmatpush3.msra.mxu1 %v13075_v56  ;;  %13078 = vst [vmem:[#allocation54_spill] sm:$0xff] %v11986_v18  ;;  %v13079_v56 = vld [vmem:[#allocation55_spill] sm:$0xff]  ;;  %v13094_v49 = vand.u32 4294901760, %v13093_v22  ;;  %v13099_v22 = vand.u32 4294901760, %v11918_v32  ;;  %v12038_v20 = vsub.f32 %v11921_v5, %v13100_v58 }
 0x906   :  { %v11978_v4 = vsub.f32 %v11859_v31, %v13077_v35  ;;  %v13080_v40 = vand.u32 4294901760, %v13079_v56  ;;  %8239 = vmatprep.subr.mxu1 %v13081_v45  ;;  %v13082_v35 = vand.u32 4294901760, %v11875_v30  ;;  %13083 = vst [vmem:[#allocation76_spill] sm:$0xff] %v11999_v15  ;;  %v12008_v56 = vand.u32 4294901760, %v6012_v25  ;;  %6959 = vmatmul.mubr.f32.gmra.mxu1 %v13095_v57  ;;  %v6026_v61 = vld [vmem:[%s12471_s4 + $0x198] sm:$0xff] }
 0x907   :  { %v12010_v45 = vand.u32 4294901760, %v6027_v14  ;;  %v12033_v47 = vsub.f32 %v11918_v32, %v13099_v22  ;;  %7316 = vmatprep.mubr.f32.mxu1 %v11923_v27  ;;  %v13102_v22 = vand.u32 4294901760, %v11930_v37  ;;  %v12069_v58 = vand.u32 4294901760, %v6026_v61  ;;  %v13108_v32 = vld [vmem:[#allocation12_spill] sm:$0xff] }
 0x908   :  { %8149 = vmatprep.subr.mxu0 %v13080_v40  ;;  %v11995_v31 = vsub.f32 %v11875_v30, %v13082_v35  ;;  %v13088_v40 = vand.u32 4294901760, %v11747_v29  ;;  %13089 = vst [vmem:[#allocation53_spill] sm:$0xff] %v12008_v56  ;;  %v13091_v35 = vld [vmem:[#allocation41_spill] sm:$0xff]  ;;  %v12019_v29 = vand.u32 4294901760, %v6011_v6 }
 0x909   :  { %8150 = vmatpush3.msra.mxu0 %v13087_v41  ;;  %13090 = vst [vmem:[#allocation63_spill] sm:$0xff] %v12010_v45  ;;  %v5516_v30 = vadd.f32 %v13092_v39, %v13091_v35  ;;  %v13096_v41 = vand.u32 4294901760, %v11762_v50  ;;  %v6010_v50 = vld [vmem:[%s12471_s4 + $0x118] sm:$0xff]  ;;  %v12051_v35 = vsub.f32 %v11930_v37, %v13102_v22  ;;  %v12067_v22 = vsub.f32 %v6027_v14, %v12010_v45  ;;  %v13111_v14 = vld [vmem:[#allocation13_spill] sm:$0xff] }
 0x90a   :  { %8240 = vmatpush3.msra.mxu1 %v13088_v40  ;;  %8151 = vmatprep.subr.mxu0 %v13094_v49  ;;  %v13097_v40 = vld [vmem:[#allocation60_spill] sm:$0xff]  ;;  %v6025_v49 = vld [vmem:[%s12471_s4 + $0x190] sm:$0xff]  ;;  %v13107_v37 = vld [vmem:[#allocation39_spill] sm:$0xff] }
 0x90b   :  { %8241 = vmatprep.subr.mxu1 %v13096_v41  ;;  %v13098_v39 = vand.u32 4294901760, %v13097_v40  ;;  %v13101_v41 = vand.u32 4294901760, %v11831_v55  ;;  %v6009_v55 = vld [vmem:[%s12471_s4 + $0x110] sm:$0xff]  ;;  %v5514_v33 = vadd.f32 %v13108_v32, %v13107_v37  ;;  %v5615_v13 = vadd.f32 %v13109_v1, %v5516_v30 }
 0x90c   :  { %v13104_v40 = vld [vmem:[#allocation69_spill] sm:$0xff]  ;;  %v13113_v30 = vand.u32 4294901760, %v11891_v23  ;;  %v13115_v37 = vand.u32 4294901760, %v11999_v15 }
 0x90d   :  { %8152 = vmatpush3.msra.mxu0 %v13098_v39  ;;  %8242 = vmatpush3.msra.mxu1 %v13101_v41  ;;  %v13103_v41 = vld [vmem:[#allocation11_spill] sm:$0xff]  ;;  %v13105_v5 = vand.u32 4294901760, %v13104_v40  ;;  %v12064_v39 = vsub.f32 %v6012_v25, %v12008_v56  ;;  %v6024_v25 = vld [vmem:[%s12471_s4 + $0x188] sm:$0xff]  ;;  %v12085_v40 = vpop.f32.mrf.mxu0  ;;  %v5704_v1 = vadd.f32 %v11635_v36, %v5615_v13  ;;  %v13116_v13 = vand.u32 4294901760, %v11903_v8 }
 0x90e   :  { %v5606_v27 = vadd.f32 %v13103_v41, %v5503_v42  ;;  %8243 = vmatprep.subr.mxu1 %v7229_v26  ;;  %v12079_v26 = vand.u32 4294901760, %v6010_v50  ;;  %v12108_v41 = vsub.f32 %v11999_v15, %v13115_v37  ;;  %v6023_v36 = vld [vmem:[%s12471_s4 + $0x180] sm:$0xff]  ;;  %v13117_v37 = vld [vmem:[#allocation17_spill] sm:$0xff]  ;;  %v13118_v8 = vand.u32 4294901760, %v11908_v0 }
 0x90f   :  { %8153 = vmatprep.subr.mxu0 %v13105_v5  ;;  %13106 = vst [vmem:[#allocation56_spill] sm:$0xff] %v12064_v39  ;;  %8244 = vmatpush3.msra.mxu1 %v7117_v11  ;;  %v12077_v5 = vsub.f32 %v6011_v6, %v12019_v29  ;;  %v12090_v11 = vand.u32 4294901760, %v6025_v49  ;;  %v6008_v6 = vld [vmem:[%s12471_s4 + $0x108] sm:$0xff]  ;;  %v5881_v15 = vpop.f32.mrf.mxu0 }
 0x910   :  { %8154 = vmatpush3.msra.mxu0 %v13110_v17  ;;  %v5694_v42 = vadd.f32 %v13111_v14, %v5606_v27  ;;  %v12092_v17 = vand.u32 4294901760, %v6009_v55  ;;  %8245 = vmatprep.subr.mxu1 %v13113_v30  ;;  %v12119_v14 = vsub.f32 %v6026_v61, %v12069_v58  ;;  %v12121_v30 = vand.u32 4294901760, %v6024_v25 }
 0x911   :  { %6841 = vmatmul.mubr.f32.vlgmr.msra.gmra.mxu0 %v13067_v7  ;;  %8199 = vmatprep.subr.mxu0 %v11595_v48  ;;  %v13114_v7 = vand.u32 4294901760, %v11986_v18  ;;  %v5613_v27 = vadd.f32 %v13117_v37, %v5514_v33  ;;  %v12132_v19 = vsub.f32 %v6010_v50, %v12079_v26  ;;  %v12134_v61 = vand.u32 4294901760, %v6008_v6  ;;  %v13121_v50 = vld [vmem:[#allocation16_spill] sm:$0xff] }
 0x912   :  { %13112 = vst [vmem:[#allocation73_spill] sm:$0xff] %v12092_v17  ;;  %6846 = vmatprep.mubr.f32.mxu0 %v13074_v46  ;;  %8200 = vmatpush3.msra.mxu0 %v11599_v28  ;;  %v13119_v46 = vld [vmem:[#allocation18_spill] sm:$0xff]  ;;  %v12141_v33 = vsub.f32 %v6025_v49, %v12090_v11  ;;  %v12144_v0 = vsub.f32 %v6009_v55, %v12092_v17  ;;  %v12146_v37 = vand.u32 4294901760, %v6023_v36  ;;  %v13122_v49 = vand.u32 4294901760, %v11954_v24 }
 0x913   :  { %v7063_v32 = vsub.f32 %v11986_v18, %v13114_v7  ;;  %8246 = vmatpush3.msra.mxu1 %v13116_v13  ;;  %v6007_v7 = vld [vmem:[%s12471_s4 + $0x100] sm:$0xff]  ;;  %8201 = vmatprep.subr.mxu0 %v11623_v51  ;;  %v5780_v23 = vadd.f32 %v13119_v46, %v5694_v42  ;;  %v13120_v18 = vand.u32 4294901760, %v11943_v38  ;;  %v5791_v13 = vadd.f32 %v11684_v53, %v5704_v1  ;;  %v5962_v38 = vpop.f32.mrf.mxu1  ;;  %s8773_s4 = smov [#allocation3]  }
 0x914   :  { %8247 = vmatprep.subr.mxu1 %v13118_v8  ;;  %8202 = vmatpush3.msra.mxu0 %v11625_v2  ;;  %v5702_v8 = vadd.f32 %v13121_v50, %v5613_v27  ;;  %v12152_v46 = vand.u32 4294901760, %v6007_v7  ;;  %v13123_v55 = vand.u32 4294901760, %v12064_v39  ;;  %v12745_v53 = vand.u32 4294901760, %v12119_v14  ;;  %s7905_s23 = sshll.u32 %s8773_s4, 4  ;;  %s7906_s23 = int_to_ptr.vmem [resolvable:$true] %s7905_s23 }
 0x915   :  { %8248 = vmatpush3.msra.mxu1 %v13120_v18  ;;  %6848 = vmatmul.mubr.f32.gmra.mxu0 %v13095_v57  ;;  %v7064_v42 = vand.u32 4294901760, %v7063_v32  ;;  %v5873_v18 = vadd.f32 %v11666_v59, %v5780_v23  ;;  %v12163_v57 = vsub.f32 %v6024_v25, %v12121_v30  ;;  %v5882_v1 = vadd.f32 %v5881_v15, %v5791_v13  ;;  %s8740_s24 = scalar_lea.vmem %s7906_s23, 256  ;;  %p8745_p1 = scmp.lt.s32.totalorder %s7906_s23, %s7906_s23 }
 0x916   :  { %8203 = vmatprep.subr.mxu0 %v11633_v62  ;;  %8249 = vmatprep.subr.mxu1 %v13122_v49  ;;  %v7165_v27 = vsub.f32 %v12064_v39, %v13123_v55  ;;  %v13124_v32 = vand.u32 4294901760, %v11959_v3  ;;  %v7159_v59 = vand.u32 4294901760, %v12051_v35  ;;  %v12744_v24 = vand.u32 4294901760, %v12132_v19  ;;  %p8741_p0 = scmp.ne.s32.totalorder %s7906_s23, %s8740_s24  ;;  %p8746_p2 = scmp.lt.s32.totalorder %s8740_s24, %s8740_s24 }
 0x917   :  { %8204 = vmatpush3.msra.mxu0 %v11671_v52  ;;  %7065 = vmatprep.mubr.f32.mxu0 %v7064_v42  ;;  %v12170_v23 = vsub.f32 %v6008_v6, %v12134_v61  ;;  %v13125_v50 = vand.u32 4294901760, %v11973_v12  ;;  %v7278_v25 = vand.u32 4294901760, %v12108_v41  ;;  %v13126_v15 = vand.u32 4294901760, %v12067_v22 }
 0x918   :  { %8250 = vmatpush3.msra.mxu1 %v13124_v32  ;;  %8205 = vmatprep.subr.mxu0 %v11711_v60  ;;  %v12743_v3 = vand.u32 4294901760, %v12141_v33  ;;  %v12181_v35 = vsub.f32 %v6023_v36, %v12146_v37  ;;  %v5789_v42 = vadd.f32 %v11646_v54, %v5702_v8  ;;  %v13127_v6 = vand.u32 4294901760, %v11978_v4  ;;  %v5964_v32 = vpop.f32.mrf.mxu1  ;;  %p8747_p3 = por %p8746_p2, %p8745_p1 }
 0x919   :  { %8251 = vmatprep.subr.mxu1 %v13125_v50  ;;  %v7284_v13 = vsub.f32 %v12067_v22, %v13126_v15  ;;  %8206 = vmatpush3.msra.mxu0 %v11719_v63  ;;  %v13128_v12 = vand.u32 4294901760, %v12077_v5  ;;  %v12742_v49 = vand.u32 4294901760, %v12144_v0  ;;  %v12192_v55 = vsub.f32 %v6007_v7, %v12152_v46 }
 0x91a   :  { %8252 = vmatpush3.msra.mxu1 %v13127_v6  ;;  %v5956_v36 = vadd.f32 %v11733_v34, %v5873_v18  ;;  %8207 = vmatprep.subr.mxu0 %v11721_v9  ;;  %v13129_v54 = vand.u32 4294901760, %v11995_v31  ;;  %v7166_v8 = vand.u32 4294901760, %v7165_v27  ;;  %v7291_v4 = vsub.f32 %v12119_v14, %v12745_v53  ;;  %v13154_v53 = vld [vmem:[#allocation34_spill] sm:$0xff]  ;;  %p8748_p4 = pnand %p8747_p3, %p8741_p0 }
 0x91b   :  { %v7172_v41 = vsub.f32 %v12077_v5, %v13128_v12  ;;  %v12740_v50 = vand.u32 4294901760, %v12163_v57  ;;  %v5880_v15 = vadd.f32 %v12085_v40, %v5789_v42  ;;  %v5965_v6 = vadd.f32 %v5964_v32, %v5882_v1  ;;  %8208 = vmatpush3.msra.mxu0 %v11726_v43 }
 0x91c   :  { %8253 = vmatprep.subr.mxu1 %v13129_v54  ;;  %v13130_v7 = vand.u32 4294901760, %v12033_v47  ;;  %v7179_v34 = vsub.f32 %v12132_v19, %v12744_v24  ;;  %v12738_v31 = vand.u32 4294901760, %v12170_v23  ;;  %8209 = vmatprep.subr.mxu0 %v11728_v16  ;;  %v13131_v18 = vand.u32 4294901760, %v12038_v20  ;;  %v13152_v24 = vld [vmem:[#allocation32_spill] sm:$0xff] }
 0x91d   :  { %v7285_v27 = vand.u32 4294901760, %v7284_v13  ;;  %v7298_v40 = vsub.f32 %v12141_v33, %v12743_v3  ;;  %v12739_v1 = vand.u32 4294901760, %v12181_v35  ;;  %8210 = vmatpush3.msra.mxu0 %v11783_v44  ;;  %v7173_v47 = vand.u32 4294901760, %v7172_v41  ;;  %v13149_v3 = vld [vmem:[#allocation28_spill] sm:$0xff] }
 0x91e   :  { %8254 = vmatpush3.msra.mxu1 %v13130_v7  ;;  %v7186_v42 = vsub.f32 %v12144_v0, %v12742_v49  ;;  %v12741_v12 = vand.u32 4294901760, %v12192_v55  ;;  %v5969_v32 = vmax.f32 %v5956_v36, 0.0  ;;  %8211 = vmatprep.subr.mxu0 %v11797_v21  ;;  %v7292_v20 = vand.u32 4294901760, %v7291_v4  ;;  %v13133_v4 = vld [vmem:[#allocation36_spill] sm:$0xff] }
 0x91f   :  { %8255 = vmatprep.subr.mxu1 %v13131_v18  ;;  %v7305_v13 = vsub.f32 %v12163_v57, %v12740_v50  ;;  %v5963_v54 = vadd.f32 %v5962_v38, %v5880_v15  ;;  %v5974_v7 = vmax.f32 %v5965_v6, 0.0  ;;  %8212 = vmatpush3.msra.mxu0 %v11799_v10  ;;  %v7193_v41 = vsub.f32 %v12170_v23, %v12738_v31  ;;  %v13132_v18 = vld [vmem:[#allocation29_spill] sm:$0xff]  ;;  %v13135_v6 = vld [vmem:[#allocation24_spill] sm:$0xff]  ;;  %v13137_v31 = vld [vmem:[#allocation22_spill] sm:$0xff] }
 0x920   :  { %8256 = vmatpush3.msra.mxu1 %v7159_v59  ;;  %v7180_v59 = vand.u32 4294901760, %v7179_v34  ;;  %8213 = vmatprep.subr.mxu0 %v13132_v18  ;;  %v7299_v36 = vand.u32 4294901760, %v7298_v40  ;;  %v7187_v38 = vand.u32 4294901760, %v7186_v42  ;;  %v12238_v15 = vand.u32 4294901760, %v5969_v32  ;;  %v13138_v50 = vld [vmem:[#allocation35_spill] sm:$0xff]  ;;  %v13139_v42 = vld [vmem:[#allocation45_spill] sm:$0xff] }
 0x921   :  { %8257 = vmatprep.subr.mxu1 %v7278_v25  ;;  %v7312_v25 = vsub.f32 %v12181_v35, %v12739_v1  ;;  %8214 = vmatpush3.msra.mxu0 %v13133_v4  ;;  %v7306_v34 = vand.u32 4294901760, %v7305_v13  ;;  %v12241_v40 = vand.u32 4294901760, %v5974_v7  ;;  %v7194_v1 = vand.u32 4294901760, %v7193_v41 }
 0x922   :  { %8258 = vmatpush3.msra.mxu1 %v7166_v8  ;;  %v7200_v8 = vsub.f32 %v12192_v55, %v12741_v12  ;;  %13134 = vst [vmem:[#allocation58_spill] sm:$0xff] %v12238_v15  ;;  %8215 = vmatprep.subr.mxu0 %v13135_v6  ;;  %v12247_v49 = vsub.f32 %v5969_v32, %v12238_v15 }
 0x923   :  { %8259 = vmatprep.subr.mxu1 %v7285_v27  ;;  %v5973_v27 = vmax.f32 %v5963_v54, 0.0  ;;  %13136 = vst [vmem:[#allocation77_spill] sm:$0xff] %v12241_v40  ;;  %8216 = vmatpush3.msra.mxu0 %v13137_v31  ;;  %v12253_v54 = vsub.f32 %v5974_v7, %v12241_v40 }
 0x924   :  { %8260 = vmatpush3.msra.mxu1 %v7173_v47  ;;  %8217 = vmatprep.subr.mxu0 %v13138_v50  ;;  %v7313_v47 = vand.u32 4294901760, %v7312_v25  ;;  %v7201_v12 = vand.u32 4294901760, %v7200_v8  ;;  %v12748_v32 = vand.u32 4294901760, %v12247_v49 }
 0x925   :  { %8261 = vmatprep.subr.mxu1 %v7292_v20  ;;  %8218 = vmatpush3.msra.mxu0 %v13139_v42  ;;  %v13140_v20 = vld [vmem:[#allocation50_spill] sm:$0xff]  ;;  %v12250_v13 = vand.u32 4294901760, %v5973_v27 }
 0x926   :  { %8262 = vmatpush3.msra.mxu1 %v7180_v59  ;;  %8219 = vmatprep.subr.mxu0 %v13140_v20 }
 0x927   :  { %8263 = vmatprep.subr.mxu1 %v7299_v36  ;;  %13141 = vst [vmem:[#allocation47_spill] sm:$0xff] %v12250_v13  ;;  %8220 = vmatpush3.msra.mxu0 %v12008_v56  ;;  %v12262_v59 = vsub.f32 %v5973_v27, %v12250_v13  ;;  %v13142_v36 = vld [vmem:[#allocation54_spill] sm:$0xff]  ;;  %v13144_v27 = vld [vmem:[#allocation19_spill] sm:$0xff] }
 0x928   :  { %8264 = vmatpush3.msra.mxu1 %v7187_v38  ;;  %8221 = vmatprep.subr.mxu0 %v12010_v45  ;;  %v13143_v25 = vand.u32 4294901760, %v13142_v36 }
 0x929   :  { %8265 = vmatprep.subr.mxu1 %v7306_v34  ;;  %8222 = vmatpush3.msra.mxu0 %v12019_v29  ;;  %v12746_v41 = vand.u32 4294901760, %v12262_v59 }
 0x92a   :  { %8266 = vmatpush3.msra.mxu1 %v7194_v1  ;;  %8223 = vmatprep.subr.mxu0 %v12069_v58  ;;  %v12747_v1 = vand.u32 4294901760, %v12253_v54 }
 0x92b   :  { %8267 = vmatprep.subr.mxu1 %v7313_v47  ;;  %8224 = vmatpush3.msra.mxu0 %v12079_v26  ;;  %v7084_v34 = vsub.f32 %v12262_v59, %v12746_v41  ;;  %v13145_v47 = vld [vmem:[#allocation20_spill] sm:$0xff]  ;;  %v13156_v41 = vld [vmem:[#allocation31_spill] sm:$0xff] }
 0x92c   :  { %8268 = vmatpush3.msra.mxu1 %v7201_v12  ;;  %8225 = vmatprep.subr.mxu0 %v12090_v11  ;;  %v7069_v12 = vsub.f32 %v12247_v49, %v12748_v32  ;;  %v7078_v7 = vsub.f32 %v12253_v54, %v12747_v1  ;;  %v13157_v1 = vld [vmem:[#allocation37_spill] sm:$0xff]  ;;  %v13158_v32 = vld [vmem:[#allocation27_spill] sm:$0xff] }
 0x92d   :  { %7318 = vmatmul.mubr.f32.vlgmr.msra.gmra.mxu1 %v12238_v15  ;;  %8313 = vmatprep.subr.mxu1 %v11595_v48  ;;  %v13161_v15 = vld [vmem:[#allocation62_spill] sm:$0xff] }
 0x92e   :  { %7323 = vmatprep.mubr.f32.mxu1 %v12241_v40  ;;  %8314 = vmatpush3.msra.mxu1 %v11599_v28  ;;  %v7070_v38 = vand.u32 4294901760, %v7069_v12  ;;  %v7079_v8 = vand.u32 4294901760, %v7078_v7  ;;  %v13146_v12 = vld [vmem:[#allocation21_spill] sm:$0xff]  ;;  %v13160_v40 = vld [vmem:[#allocation48_spill] sm:$0xff] }
 0x92f   :  { %8315 = vmatprep.subr.mxu1 %v11623_v51  ;;  %8226 = vmatpush3.msra.mxu0 %v12092_v17  ;;  %v13147_v7 = vld [vmem:[#allocation61_spill] sm:$0xff] }
 0x930   :  { %8316 = vmatpush3.msra.mxu1 %v11625_v2  ;;  %8227 = vmatprep.subr.mxu0 %v12121_v30 }
 0x931   :  { %7325 = vmatmul.mubr.f32.gmra.mxu1 %v12250_v13  ;;  %8317 = vmatprep.subr.mxu1 %v11633_v62  ;;  %v13159_v13 = vld [vmem:[#allocation33_spill] sm:$0xff] }
 0x932   :  { %8228 = vmatpush3.msra.mxu0 %v12134_v61  ;;  %8318 = vmatpush3.msra.mxu1 %v11671_v52 }
 0x933   :  { %7576 = vmatprep.mubr.f32.mxu1 %v13143_v25  ;;  %8229 = vmatprep.subr.mxu0 %v12146_v37  ;;  %v7085_v25 = vand.u32 4294901760, %v7084_v34  ;;  %v13151_v34 = vld [vmem:[#allocation23_spill] sm:$0xff] }
 0x934   :  { %8319 = vmatprep.subr.mxu1 %v11711_v60  ;;  %8230 = vmatpush3.msra.mxu0 %v12152_v46 }
 0x935   :  { %8320 = vmatpush3.msra.mxu1 %v11719_v63  ;;  %7071 = vmatmul.mubr.f32.vlgmr.msra.gmra.mxu0 %v7070_v38  ;;  %v13148_v38 = vld [vmem:[#allocation42_spill] sm:$0xff] }
 0x936   :  { %8275 = vmatprep.subr.mxu0 %v13144_v27  ;;  %8321 = vmatprep.subr.mxu1 %v11721_v9 }
 0x937   :  { %7080 = vmatprep.mubr.f32.mxu0 %v7079_v8  ;;  %8276 = vmatpush3.msra.mxu0 %v13145_v47  ;;  %v13150_v8 = vld [vmem:[#allocation30_spill] sm:$0xff] }
 0x938   :  { %8322 = vmatpush3.msra.mxu1 %v11726_v43  ;;  %8277 = vmatprep.subr.mxu0 %v13146_v12 }
 0x939   :  { %8323 = vmatprep.subr.mxu1 %v11728_v16  ;;  %8278 = vmatpush3.msra.mxu0 %v13147_v7 }
 0x93a   :  { %8324 = vmatpush3.msra.mxu1 %v11783_v44  ;;  %7086 = vmatmul.mubr.f32.gmra.mxu0 %v7085_v25  ;;  %v13153_v25 = vld [vmem:[#allocation25_spill] sm:$0xff] }
 0x93b   :  { %8279 = vmatprep.subr.mxu0 %v13148_v38  ;;  %8325 = vmatprep.subr.mxu1 %v11797_v21 }
 0x93c   :  { %8280 = vmatpush3.msra.mxu0 %v13149_v3  ;;  %7460 = vmatprep.mubr.f32.mxu0 %v13142_v36  ;;  %v13155_v36 = vld [vmem:[#allocation26_spill] sm:$0xff] }
 0x93d   :  { %8326 = vmatpush3.msra.mxu1 %v11799_v10  ;;  %8281 = vmatprep.subr.mxu0 %v13150_v8 }
 0x93e   :  { %8327 = vmatprep.subr.mxu1 %v13132_v18  ;;  %8282 = vmatpush3.msra.mxu0 %v13151_v34 }
 0x93f   :  { %8328 = vmatpush3.msra.mxu1 %v13133_v4  ;;  %8283 = vmatprep.subr.mxu0 %v13152_v24 }
 0x940   :  { %8329 = vmatprep.subr.mxu1 %v13135_v6  ;;  %8284 = vmatpush3.msra.mxu0 %v13153_v25 }
 0x941   :  { %8330 = vmatpush3.msra.mxu1 %v13137_v31  ;;  %8285 = vmatprep.subr.mxu0 %v13154_v53 }
 0x942   :  { %8331 = vmatprep.subr.mxu1 %v13138_v50  ;;  %8286 = vmatpush3.msra.mxu0 %v13155_v36 }
 0x943   :  { %8332 = vmatpush3.msra.mxu1 %v13139_v42  ;;  %8287 = vmatprep.subr.mxu0 %v13156_v41 }
 0x944   :  { %8333 = vmatprep.subr.mxu1 %v13140_v20  ;;  %8288 = vmatpush3.msra.mxu0 %v13157_v1  ;;  %v13162_v20 = vld [vmem:[#allocation43_spill] sm:$0xff] }
 0x945   :  { %8334 = vmatpush3.msra.mxu1 %v12008_v56  ;;  %8289 = vmatprep.subr.mxu0 %v13158_v32  ;;  %v13163_v56 = vld [vmem:[#allocation49_spill] sm:$0xff] }
 0x946   :  { %8335 = vmatprep.subr.mxu1 %v12010_v45  ;;  %8290 = vmatpush3.msra.mxu0 %v13159_v13  ;;  %v13164_v45 = vld [vmem:[#allocation76_spill] sm:$0xff] }
 0x947   :  { %8336 = vmatpush3.msra.mxu1 %v12019_v29  ;;  %8291 = vmatprep.subr.mxu0 %v13160_v40 }
 0x948   :  { %8337 = vmatprep.subr.mxu1 %v12069_v58  ;;  %8292 = vmatpush3.msra.mxu0 %v13161_v15 }
 0x949   :  { %8338 = vmatpush3.msra.mxu1 %v12079_v26  ;;  %8293 = vmatprep.subr.mxu0 %v13162_v20 }
 0x94a   :  { %8339 = vmatprep.subr.mxu1 %v12090_v11  ;;  %8294 = vmatpush3.msra.mxu0 %v13163_v56 }
 0x94b   :  { %8340 = vmatpush3.msra.mxu1 %v12092_v17  ;;  %8295 = vmatprep.subr.mxu0 %v13164_v45  ;;  %v13165_v17 = vand.u32 4294901760, %v12247_v49 }
 0x94c   :  { %8341 = vmatprep.subr.mxu1 %v12121_v30  ;;  %8296 = vmatpush3.msra.mxu0 %v12064_v39  ;;  %v13166_v39 = vand.u32 4294901760, %v12253_v54 }
 0x94d   :  { %8342 = vmatpush3.msra.mxu1 %v12134_v61  ;;  %8297 = vmatprep.subr.mxu0 %v12067_v22 }
 0x94e   :  { %8343 = vmatprep.subr.mxu1 %v12146_v37  ;;  %8298 = vmatpush3.msra.mxu0 %v12077_v5 }
 0x94f   :  { %8344 = vmatpush3.msra.mxu1 %v12152_v46  ;;  %8299 = vmatprep.subr.mxu0 %v12119_v14 }
 0x950   :  { %7580 = vmatmul.mubr.f32.vlgmr.msra.gmra.mxu1 %v13165_v17  ;;  %8389 = vmatprep.subr.mxu1 %v11595_v48  ;;  %v13167_v17 = vand.u32 4294901760, %v12262_v59  ;;  %v13168_v48 = vld [vmem:[#allocation65_spill] sm:$0xff] }
 0x951   :  { %8300 = vmatpush3.msra.mxu0 %v12132_v19  ;;  %7587 = vmatprep.mubr.f32.mxu1 %v13166_v39  ;;  %v13182_v39 = vld [vmem:[#allocation50_spill] sm:$0xff] }
 0x952   :  { %8390 = vmatpush3.msra.mxu1 %v11599_v28  ;;  %8301 = vmatprep.subr.mxu0 %v12141_v33  ;;  %v13169_v28 = vand.u32 4294901760, %v13144_v27 }
 0x953   :  { %8391 = vmatprep.subr.mxu1 %v11623_v51  ;;  %8302 = vmatpush3.msra.mxu0 %v12144_v0  ;;  %v13171_v51 = vand.u32 4294901760, %v13146_v12 }
 0x954   :  { %8392 = vmatpush3.msra.mxu1 %v11625_v2  ;;  %8303 = vmatprep.subr.mxu0 %v12163_v57  ;;  %v13170_v2 = vand.u32 4294901760, %v13145_v47 }
 0x955   :  { %7591 = vmatmul.mubr.f32.gmra.mxu1 %v13167_v17  ;;  %8393 = vmatprep.subr.mxu1 %v11633_v62  ;;  %v13172_v62 = vand.u32 4294901760, %v13147_v7 }
 0x956   :  { %8304 = vmatpush3.msra.mxu0 %v12170_v23  ;;  %8394 = vmatpush3.msra.mxu1 %v11671_v52  ;;  %v13173_v52 = vand.u32 4294901760, %v13148_v38 }
 0x957   :  { %7868 = vmatprep.mubr.f32.mxu1 %v13168_v48  ;;  %8305 = vmatprep.subr.mxu0 %v12181_v35 }
 0x958   :  { %8395 = vmatprep.subr.mxu1 %v11711_v60  ;;  %8306 = vmatpush3.msra.mxu0 %v12192_v55  ;;  %v13174_v60 = vand.u32 4294901760, %v13149_v3  ;;  %v13184_v3 = vld [vmem:[#allocation53_spill] sm:$0xff] }
 0x959   :  { %8396 = vmatpush3.msra.mxu1 %v11719_v63  ;;  %7463 = vmatmul.mubr.f32.vlgmr.msra.gmra.mxu0 %v12247_v49  ;;  %v13175_v63 = vand.u32 4294901760, %v13150_v8  ;;  %v13186_v49 = vld [vmem:[#allocation63_spill] sm:$0xff] }
 0x95a   :  { %8351 = vmatprep.subr.mxu0 %v13169_v28  ;;  %8397 = vmatprep.subr.mxu1 %v11721_v9  ;;  %v13176_v9 = vand.u32 4294901760, %v13151_v34 }
 0x95b   :  { %7469 = vmatprep.mubr.f32.mxu0 %v12253_v54  ;;  %8352 = vmatpush3.msra.mxu0 %v13170_v2 }
 0x95c   :  { %8398 = vmatpush3.msra.mxu1 %v11726_v43  ;;  %8353 = vmatprep.subr.mxu0 %v13171_v51  ;;  %v13177_v43 = vand.u32 4294901760, %v13152_v24  ;;  %v13183_v24 = vand.u32 4294901760, %v13157_v1 }
 0x95d   :  { %8399 = vmatprep.subr.mxu1 %v11728_v16  ;;  %8354 = vmatpush3.msra.mxu0 %v13172_v62  ;;  %v13178_v16 = vand.u32 4294901760, %v13153_v25 }
 0x95e   :  { %8400 = vmatpush3.msra.mxu1 %v11783_v44  ;;  %7472 = vmatmul.mubr.f32.gmra.mxu0 %v12262_v59  ;;  %v13179_v44 = vand.u32 4294901760, %v13154_v53  ;;  %v13185_v53 = vand.u32 4294901760, %v13158_v32 }
 0x95f   :  { %8355 = vmatprep.subr.mxu0 %v13173_v52  ;;  %8401 = vmatprep.subr.mxu1 %v11797_v21  ;;  %v13180_v21 = vand.u32 4294901760, %v13155_v36 }
 0x960   :  { %8356 = vmatpush3.msra.mxu0 %v13174_v60  ;;  %7757 = vmatprep.mubr.f32.mxu0 %v13168_v48  ;;  %v7952_v60 = vld [vmem:[#allocation2] ss:$0 sm:$0xff] }
 0x961   :  { %8402 = vmatpush3.msra.mxu1 %v11799_v10  ;;  %8357 = vmatprep.subr.mxu0 %v13175_v63  ;;  %v13181_v10 = vand.u32 4294901760, %v13156_v41 }
 0x962   :  { %8403 = vmatprep.subr.mxu1 %v13132_v18  ;;  %8358 = vmatpush3.msra.mxu0 %v13176_v9  ;;  %v13189_v18 = vand.u32 4294901760, %v13161_v15 }
 0x963   :  { %8404 = vmatpush3.msra.mxu1 %v13133_v4  ;;  %8359 = vmatprep.subr.mxu0 %v13177_v43  ;;  %v13190_v4 = vand.u32 4294901760, %v13162_v20 }
 0x964   :  { %8405 = vmatprep.subr.mxu1 %v13135_v6  ;;  %8360 = vmatpush3.msra.mxu0 %v13178_v16  ;;  %v13191_v6 = vand.u32 4294901760, %v13163_v56  ;;  %v13197_v56 = vand.u32 4294901760, %v12077_v5  ;;  %v13204_v5 = vand.u32 4294901760, %v12163_v57 }
 0x965   :  { %8406 = vmatpush3.msra.mxu1 %v13137_v31  ;;  %8361 = vmatprep.subr.mxu0 %v13179_v44  ;;  %v13188_v31 = vand.u32 4294901760, %v13160_v40  ;;  %v13201_v40 = vld [vmem:[#allocation77_spill] sm:$0xff] }
 0x966   :  { %8407 = vmatprep.subr.mxu1 %v13138_v50  ;;  %8362 = vmatpush3.msra.mxu0 %v13180_v21  ;;  %v13187_v50 = vand.u32 4294901760, %v13159_v13 }
 0x967   :  { %8408 = vmatpush3.msra.mxu1 %v13139_v42  ;;  %8363 = vmatprep.subr.mxu0 %v13181_v10  ;;  %v13192_v42 = vld [vmem:[#allocation73_spill] sm:$0xff] }
 0x968   :  { %8409 = vmatprep.subr.mxu1 %v13182_v39  ;;  %8364 = vmatpush3.msra.mxu0 %v13183_v24 }
 0x969   :  { %8410 = vmatpush3.msra.mxu1 %v13184_v3  ;;  %8365 = vmatprep.subr.mxu0 %v13185_v53 }
 0x96a   :  { %8411 = vmatprep.subr.mxu1 %v13186_v49  ;;  %8366 = vmatpush3.msra.mxu0 %v13187_v50 }
 0x96b   :  { %8412 = vmatpush3.msra.mxu1 %v12019_v29  ;;  %8367 = vmatprep.subr.mxu0 %v13188_v31  ;;  %v13193_v29 = vand.u32 4294901760, %v13164_v45  ;;  %v13198_v45 = vand.u32 4294901760, %v12119_v14  ;;  %v13206_v14 = vand.u32 4294901760, %v12170_v23 }
 0x96c   :  { %8413 = vmatprep.subr.mxu1 %v12069_v58  ;;  %8368 = vmatpush3.msra.mxu0 %v13189_v18  ;;  %v13194_v58 = vld [vmem:[#allocation56_spill] sm:$0xff] }
 0x96d   :  { %8414 = vmatpush3.msra.mxu1 %v12079_v26  ;;  %8369 = vmatprep.subr.mxu0 %v13190_v4  ;;  %v13195_v15 = vand.u32 4294901760, %v13194_v58  ;;  %v13196_v26 = vand.u32 4294901760, %v12067_v22  ;;  %v13202_v22 = vand.u32 4294901760, %v12141_v33  ;;  %v8772_v33 = vmov 0  }
 0x96e   :  { %8415 = vmatprep.subr.mxu1 %v12090_v11  ;;  %8370 = vmatpush3.msra.mxu0 %v13191_v6  ;;  %v13199_v11 = vld [vmem:[#allocation58_spill] sm:$0xff] }
 0x96f   :  { %8416 = vmatpush3.msra.mxu1 %v13192_v42  ;;  %8371 = vmatprep.subr.mxu0 %v13193_v29 }
 0x970   :  { %8417 = vmatprep.subr.mxu1 %v12121_v30  ;;  %8372 = vmatpush3.msra.mxu0 %v13195_v15  ;;  %v13200_v30 = vand.u32 4294901760, %v12132_v19  ;;  %v13208_v19 = vand.u32 4294901760, %v12192_v55 }
 0x971   :  { %8418 = vmatpush3.msra.mxu1 %v12134_v61  ;;  %8373 = vmatprep.subr.mxu0 %v13196_v26  ;;  %v13203_v61 = vand.u32 4294901760, %v12144_v0 }
 0x972   :  { %8419 = vmatprep.subr.mxu1 %v12146_v37  ;;  %8374 = vmatpush3.msra.mxu0 %v13197_v56  ;;  %v13205_v37 = vld [vmem:[#allocation47_spill] sm:$0xff] }
 0x973   :  { %8420 = vmatpush3.msra.mxu1 %v12152_v46  ;;  %8375 = vmatprep.subr.mxu0 %v13198_v45  ;;  %v13207_v46 = vand.u32 4294901760, %v12181_v35 }
 0x974   :  { %7870 = vmatmul.mubr.f32.vlgmr.msra.gmra.mxu1 %v13199_v11  ;;  %8376 = vmatpush3.msra.mxu0 %v13200_v30 }
 0x975   :  { %7875 = vmatprep.mubr.f32.mxu1 %v13201_v40  ;;  %8377 = vmatprep.subr.mxu0 %v13202_v22 }
 0x976   :  { %8378 = vmatpush3.msra.mxu0 %v13203_v61  ;;  %8589 = vset.pattern.permute.xlu1 %v8772_v33 }
 0x977   :  { %8379 = vmatprep.subr.mxu0 %v13204_v5  ;;  %8590 = vset.pattern.permute.xlu0 %v8772_v33 }
 0x978   :  { %7877 = vmatmul.mubr.f32.gmra.mxu1 %v13205_v37  ;;  %8380 = vmatpush3.msra.mxu0 %v13206_v14 }
 0x979   :  { %8381 = vmatprep.subr.mxu0 %v13207_v46 }
 0x97a   :  { %8382 = vmatpush3.msra.mxu0 %v13208_v19  ;;  %v8041_v0 = vpop.f32.mrf.mxu1 }
 0x97b   :  { %7759 = vmatmul.mubr.f32.vlgmr.msra.gmra.mxu0 %v13199_v11 }
 0x97c   :  { %7764 = vmatprep.mubr.f32.mxu0 %v13201_v40  ;;  %v8042_v57 = vpop.f32.mrf.mxu1 }
 0x97d   :  { %v8043_v44 = vadd.f32 %v8042_v57, %v8041_v0 }
 0x97e   :  { %v8044_v23 = vpop.f32.mrf.mxu1 }
 0x97f   :  { %7766 = vmatmul.mubr.f32.gmra.mxu0 %v13205_v37 }
 0x980   :  { %v8045_v54 = vpop.f32.mrf.mxu1 }
 0x981   :  { %v8046_v49 = vadd.f32 %v8045_v54, %v8044_v23 }
 0x982   :  { %v8003_v20 = vpop.f32.mrf.mxu0 }
 0x984   :  { %v8004_v13 = vpop.f32.mrf.mxu0 }
 0x985   :  { %v8005_v52 = vadd.f32 %v8004_v13, %v8003_v20 }
 0x987   :  { %v8006_v35 = vpop.f32.mrf.mxu0  ;;  %v6155_v43 = vadd.f32 %v8005_v52, %v7952_v60 }
 0x989   :  { %v8007_v59 = vpop.f32.mrf.mxu0  ;;  %v6402_v3 = vadd.f32 %v8043_v44, %v6155_v43 }
 0x98a   :  { %v8008_v16 = vadd.f32 %v8007_v59, %v8006_v35 }
 0x98c   :  { %v6170_v24 = vadd.f32 %v8008_v16, %v7952_v60 }
 0x98e   :  { %v6409_v6 = vadd.f32 %v8046_v49, %v6170_v24 }
 0x99c   :  { %v8117_v32 = vpop.f32.mrf.mxu1 }
 0x99e   :  { %v8118_v55 = vpop.f32.mrf.mxu1 }
 0x99f   :  { %v8119_v4 = vadd.f32 %v8118_v55, %v8117_v32 }
 0x9a1   :  { %v8120_v41 = vpop.f32.mrf.mxu1 }
 0x9a3   :  { %v8121_v47 = vpop.f32.mrf.mxu1 }
 0x9a4   :  { %v8122_v56 = vadd.f32 %v8121_v47, %v8120_v41 }
 0x9a5   :  { %v8079_v1 = vpop.f32.mrf.mxu0 }
 0x9a7   :  { %v8080_v27 = vpop.f32.mrf.mxu0 }
 0x9a8   :  { %v8081_v21 = vadd.f32 %v8080_v27, %v8079_v1 }
 0x9aa   :  { %v8082_v12 = vpop.f32.mrf.mxu0  ;;  %v6547_v50 = vadd.f32 %v8081_v21, %v6402_v3 }
 0x9ac   :  { %v8083_v38 = vpop.f32.mrf.mxu0  ;;  %v6664_v26 = vadd.f32 %v8119_v4, %v6547_v50 }
 0x9ad   :  { %v8084_v31 = vadd.f32 %v8083_v38, %v8082_v12 }
 0x9af   :  { %v6556_v15 = vadd.f32 %v8084_v31, %v6409_v6 }
 0x9b1   :  { %v6675_v61 = vadd.f32 %v8122_v56, %v6556_v15 }
 0x9c1   :  { %v8193_v7 = vpop.f32.mrf.mxu1 }
 0x9c3   :  { %v8194_v8 = vpop.f32.mrf.mxu1 }
 0x9c4   :  { %v8195_v22 = vadd.f32 %v8194_v8, %v8193_v7 }
 0x9c6   :  { %v8196_v25 = vpop.f32.mrf.mxu1 }
 0x9c8   :  { %v8197_v17 = vpop.f32.mrf.mxu1 }
 0x9c9   :  { %v8198_v33 = vadd.f32 %v8197_v17, %v8196_v25 }
 0x9d1   :  { %v8155_v34 = vpop.f32.mrf.mxu0 }
 0x9d3   :  { %v8156_v36 = vpop.f32.mrf.mxu0 }
 0x9d4   :  { %v8157_v42 = vadd.f32 %v8156_v36, %v8155_v34 }
 0x9d5   :  { %v8158_v48 = vpop.f32.mrf.mxu0 }
 0x9d6   :  { %v6843_v45 = vadd.f32 %v8157_v42, %v6664_v26 }
 0x9d7   :  { %v8159_v2 = vpop.f32.mrf.mxu0 }
 0x9d8   :  { %v8160_v11 = vadd.f32 %v8159_v2, %v8158_v48  ;;  %v6954_v14 = vadd.f32 %v8195_v22, %v6843_v45 }
 0x9da   :  { %v6850_v37 = vadd.f32 %v8160_v11, %v6675_v61 }
 0x9dc   :  { %v6961_v13 = vadd.f32 %v8198_v33, %v6850_v37 }
 0x9ed   :  { %v8269_v28 = vpop.f32.mrf.mxu1 }
 0x9ef   :  { %v8270_v51 = vpop.f32.mrf.mxu1 }
 0x9f0   :  { %v8271_v23 = vadd.f32 %v8270_v51, %v8269_v28 }
 0x9f1   :  { %v8272_v63 = vpop.f32.mrf.mxu1 }
 0x9f3   :  { %v8273_v10 = vpop.f32.mrf.mxu1 }
 0x9f4   :  { %v8274_v1 = vadd.f32 %v8273_v10, %v8272_v63 }
 0x9f5   :  { %v8231_v62 = vpop.f32.mrf.mxu0 }
 0x9f7   :  { %v8232_v9 = vpop.f32.mrf.mxu0 }
 0x9f8   :  { %v8233_v5 = vadd.f32 %v8232_v9, %v8231_v62 }
 0x9fa   :  { %v8234_v39 = vpop.f32.mrf.mxu0  ;;  %v7073_v0 = vadd.f32 %v8233_v5, %v6954_v14 }
 0x9fc   :  { %v8235_v18 = vpop.f32.mrf.mxu0  ;;  %v7320_v59 = vadd.f32 %v8271_v23, %v7073_v0 }
 0x9fd   :  { %v8236_v57 = vadd.f32 %v8235_v18, %v8234_v39 }
 0x9ff   :  { %v7088_v32 = vadd.f32 %v8236_v57, %v6961_v13 }
 0xa01   :  { %v7327_v7 = vadd.f32 %v8274_v1, %v7088_v32 }
 0xa10   :  { %v8345_v53 = vpop.f32.mrf.mxu1 }
 0xa12   :  { %v8346_v29 = vpop.f32.mrf.mxu1 }
 0xa13   :  { %v8347_v12 = vadd.f32 %v8346_v29, %v8345_v53 }
 0xa15   :  { %v8348_v30 = vpop.f32.mrf.mxu1 }
 0xa17   :  { %v8349_v46 = vpop.f32.mrf.mxu1 }
 0xa18   :  { %v8350_v48 = vadd.f32 %v8349_v46, %v8348_v30 }
 0xa19   :  { %v8307_v58 = vpop.f32.mrf.mxu0 }
 0xa1b   :  { %v8308_v40 = vpop.f32.mrf.mxu0 }
 0xa1c   :  { %v8309_v54 = vadd.f32 %v8308_v40, %v8307_v58 }
 0xa1e   :  { %v8310_v19 = vpop.f32.mrf.mxu0  ;;  %v7465_v41 = vadd.f32 %v8309_v54, %v7320_v59 }
 0xa20   :  { %v8311_v35 = vpop.f32.mrf.mxu0  ;;  %v7582_v25 = vadd.f32 %v8347_v12, %v7465_v41 }
 0xa21   :  { %v8312_v27 = vadd.f32 %v8311_v35, %v8310_v19 }
 0xa23   :  { %v7474_v34 = vadd.f32 %v8312_v27, %v7327_v7 }
 0xa25   :  { %v7593_v60 = vadd.f32 %v8350_v48, %v7474_v34 }
 0xa34   :  { %v8421_v20 = vpop.f32.mrf.mxu1 }
 0xa36   :  { %v8422_v55 = vpop.f32.mrf.mxu1 }
 0xa37   :  { %v8423_v28 = vadd.f32 %v8422_v55, %v8421_v20 }
 0xa38   :  { %v8424_v38 = vpop.f32.mrf.mxu1 }
 0xa3a   :  { %v8425_v51 = vpop.f32.mrf.mxu1 }
 0xa3b   :  { %v8383_v47 = vpop.f32.mrf.mxu0  ;;  %v8426_v63 = vadd.f32 %v8425_v51, %v8424_v38 }
 0xa3d   :  { %v8384_v8 = vpop.f32.mrf.mxu0 }
 0xa3e   :  { %v8385_v36 = vadd.f32 %v8384_v8, %v8383_v47 }
 0xa3f   :  { %v8386_v17 = vpop.f32.mrf.mxu0 }
 0xa40   :  { %v7761_v2 = vadd.f32 %v8385_v36, %v7582_v25 }
 0xa41   :  { %v8387_v62 = vpop.f32.mrf.mxu0 }
 0xa42   :  { %v7872_v52 = vadd.f32 %v8423_v28, %v7761_v2  ;;  %v8388_v9 = vadd.f32 %v8387_v62, %v8386_v17 }
 0xa44   :  { %8719 = vtanh.f32 %v7872_v52  ;;  %v7768_v43 = vadd.f32 %v8388_v9, %v7593_v60 }
 0xa46   :  { %v7879_v16 = vadd.f32 %v8426_v63, %v7768_v43 }
 0xa48   :  { %8721 = vtanh.f32 %v7879_v16 }
 0xa51   :  { %v8720_v44 = vpop.eup %8719 }
 0xa52   :  { %v7884_v21 = vadd.f32 1.0, %v8720_v44 }
 0xa54   :  { %v7886_v10 = vmul.f32 1.5, %v7884_v21 }
 0xa55   :  { %v8722_v39 = vpop.eup %8721 }
 0xa56   :  { %7890 = vperm.xlu1 %8589, %v7886_v10   ;;  %v7885_v24 = vadd.f32 1.0, %v8722_v39 }
 0xa58   :  { %v7887_v3 = vmul.f32 1.5, %v7885_v24 }
 0xa5a   :  { %7895 = vperm.xlu0 %8590, %v7887_v3  }
 0xad1   :  { %v7891_v53 = vpop.permute.xlu1 %7890 }
 0xad2   :  { %7898 = vst [vmem:[#allocation3] sm:$0xff] %v7891_v53 }
 0xad5   :  { %v7896_v49 = vpop.permute.xlu0 %7895 }
 0xad6   :  { %7899 = vst [vmem:[#allocation3 + $0x8] sm:$0xff] %v7896_v49 }
 0xad7   :  { %8751 = shalt.err (!%p8748_p4)
}
 0xad8   :  { %s8774_s25 = smov 128   ;;  %s8775_s26 = smov 8  }
 0xad9   :  { %7911 = dma.vmem_to_hbm [thread:$0]  %s7906_s23, 256, %s12473_s6, [#allocation4], %s8774_s25, %s8774_s25, %s8775_s26  }
 0xada   :  { %8760 = dma.done.wait [#allocation4], 256  }
 0xadb   :  { %8761 = vsyncadd [#allocation4], 4294967040 }
 0xadc   :  { %7915 = vsyncpa [#allocation4], 1 }

</bundles_post_ra>
